<compile_context>
chip_gen: v7x
topology: tpu7x:2x2x1
jax: 0.10.0
libtpu: 0.0.40
codegen_flags: <defaults>
</compile_context>

<pallas_src>
import functools

import jax
import jax.numpy as jnp
from jax.experimental import pallas as pl
from jax.experimental.pallas import tpu as pltpu

_LANE = 128                      # vreg lane width
_SUBLANE = 8                     # vreg sublane count
_VOCAB_TN = 2048                 # N-tile of the vocab projection (lane-dense, multiple of 128)
_VMEM_LIMIT = 64 * 1024 * 1024   # raise the scoped-VMEM default (16/32 MiB) on all generations;
                                 # stays within v7x's 64 MiB physical VMEM.


def _round_up(n, m):
    return (n + m - 1) // m * m


def _pad_axis(x, axis, target):
    if x.shape[axis] == target:
        return x
    widths = [(0, 0)] * x.ndim
    widths[axis] = (0, target - x.shape[axis])
    return jnp.pad(x, widths)


def _pad_gate_cols(w, E, Ep):
    """(..., 4E) -> (..., 4*Ep): zero-pad each of the i,f,g,o gate blocks to Ep lanes."""
    lead = w.shape[:-1]
    w4 = w.reshape(lead + (4, E))
    w4 = jnp.pad(w4, [(0, 0)] * len(lead) + [(0, 0), (0, Ep - E)])
    return w4.reshape(lead + (4 * Ep,))


def _mxu_dot(a, b):
    """MXU dot with f32 accumulation; casts the activation to the weight dtype (bf16 path)."""
    return jnp.dot(a.astype(b.dtype), b, preferred_element_type=jnp.float32)


def _nbytes(a):
    return a.size * a.dtype.itemsize


# --------------------------- Encoder MLP (fused, K-tiled) ---------------------------
def _encoder_kernel(x_ref, w1_ref, b1_ref, w2_ref, b2_ref, w3_ref, b3_ref, out_ref, acc_ref):
    k = pl.program_id(0)

    @pl.when(k == 0)
    def _():
        acc_ref[...] = jnp.zeros_like(acc_ref)

    # K-tiled first GEMM: accumulate x_tile @ w1_tile into a VMEM f32 accumulator.
    acc_ref[...] += _mxu_dot(x_ref[...], w1_ref[...])

    @pl.when(k == pl.num_programs(0) - 1)
    def _():
        h1 = acc_ref[...] + b1_ref[...]
        h2 = _mxu_dot(h1, w2_ref[...]) + b2_ref[...]
        h3 = _mxu_dot(h2, w3_ref[...]) + b3_ref[...]
        # ReLU; dropout is eval-mode identity.
        out_ref[...] = jnp.maximum(h3, 0.0).astype(out_ref.dtype)


def _pick_enc_tk(Mp128, H1p, itemsize):
    # Size the w1 K-tile so one (tk, H1p) weight tile is ~8 MiB (=> ~16 MiB double-buffered),
    # amortizing the ~0.35 us per-grid-step overhead on every generation while staying far
    # under the raised VMEM limit.  v6e/v5e (128 MiB physical) could go larger still.
    budget_per_tile = 8 * 1024 * 1024
    tk = budget_per_tile // max(1, H1p * itemsize)
    tk = (tk // _LANE) * _LANE
    tk = max(_LANE, min(4096, tk))
    return min(tk, Mp128)


def encoder_features_padded(params, images, Bp, Ep, weights_dtype=jnp.float32):
    """Returns lane-dense padded features (Bp, Ep); padded feature columns are zero.
    NOTE: padded batch rows are ReLU(bias chain), not zero (see numerics notes)."""
    B = images.shape[0]
    # TODO(synk): ConvAutoencoder.manifold is undefined in the reference; identity flatten stand-in.
    manifold = images.reshape(B, -1).astype(jnp.float32)
    M = manifold.shape[1]
    H1, H2 = params["enc_w1"].shape[1], params["enc_w2"].shape[1]
    H1p, H2p = _round_up(H1, _LANE), _round_up(H2, _LANE)

    itemsize = jnp.dtype(weights_dtype).itemsize
    Mp128 = _round_up(M, _LANE)
    tk = _pick_enc_tk(Mp128, H1p, itemsize)
    nk = -(-Mp128 // tk)
    Mp = nk * tk                 # zero-padded K; padded columns contribute 0 to the accumulation

    x = _pad_axis(_pad_axis(manifold, 0, Bp), 1, Mp).astype(weights_dtype)      # (Bp, Mp)
    w1 = _pad_axis(_pad_axis(params["enc_w1"], 0, Mp), 1, H1p).astype(weights_dtype)
    b1 = _pad_axis(params["enc_b1"], 1, H1p)                                    # biases stay f32
    w2 = _pad_axis(_pad_axis(params["enc_w2"], 0, H1p), 1, H2p).astype(weights_dtype)
    b2 = _pad_axis(params["enc_b2"], 1, H2p)
    w3 = _pad_axis(_pad_axis(params["enc_w3"], 0, H2p), 1, Ep).astype(weights_dtype)
    b3 = _pad_axis(params["enc_b3"], 1, Ep)

    cost = pl.CostEstimate(
        flops=2 * Bp * (Mp * H1p + H1p * H2p + H2p * Ep),
        transcendentals=0,
        bytes_accessed=sum(map(_nbytes, (x, w1, b1, w2, b2, w3, b3))) + Bp * Ep * 4,
    )

    full = lambda a: pl.BlockSpec(a.shape, lambda k: (0,) * a.ndim)
    return pl.pallas_call(
        _encoder_kernel,
        out_shape=jax.ShapeDtypeStruct((Bp, Ep), jnp.float32),
        grid=(nk,),
        in_specs=[
            pl.BlockSpec((Bp, tk), lambda k: (0, k)),      # manifold K-tile
            pl.BlockSpec((tk, H1p), lambda k: (k, 0)),     # first-layer weight K-tile
            # TODO(synk): on v7x (64 MiB VMEM) give these grid-invariant blocks
            # pipeline_mode=pl.Buffered(1) (or stage via scratch + sync_copy) so they
            # are not double-buffered before enlarging tk further.
            full(b1), full(w2), full(b2), full(w3), full(b3),
        ],
        out_specs=pl.BlockSpec((Bp, Ep), lambda k: (0, 0)),
        scratch_shapes=[pltpu.VMEM((Bp, H1p), jnp.float32)],
        compiler_params=pltpu.CompilerParams(
            dimension_semantics=("arbitrary",), vmem_limit_bytes=_VMEM_LIMIT),
        cost_estimate=cost,
    )(x, w1, b1, w2, b2, w3, b3)


def encoder_forward(params, images, weights_dtype=jnp.float32):
    """Pallas equivalent of the reference PyTorch `Encoder.forward` (eval mode)."""
    B = images.shape[0]
    E = params["enc_w3"].shape[1]
    Bp, Ep = _round_up(B, _SUBLANE), _round_up(E, _LANE)
    return encoder_features_padded(params, images, Bp, Ep, weights_dtype)[:B, :E]


# ------------------------- Fused decoder: LSTM1 + LSTM2 recurrence ------------------------
def _lstm_kernel(feat_ref, emb_ref,
                 w1f_ref, w1w_ref, whh1_ref, b1_ref,
                 w2f_ref, w2w_ref, whh2_ref, b2_ref,
                 y_ref,
                 xp_sc, y1_sc):
    T, Bp, Ep = emb_ref.shape
    feats = feat_ref[...]                                            # (Bp, Ep) f32

    # Time-invariant features projection + combined bias, computed once per layer and folded
    # into the big pre-loop input projections so the serialized per-step path is only
    # h @ W_hh + one add + gates.
    bias1 = _mxu_dot(feats, w1f_ref[...]) + b1_ref[...]              # (Bp, 4Ep) f32
    bias2 = _mxu_dot(feats, w2f_ref[...]) + b2_ref[...]
    tile_rows = lambda b: jnp.concatenate([b] * T, axis=0)           # (Bp,4Ep) -> (T*Bp,4Ep)

    # Word-dependent LSTM1 input projection for ALL timesteps as one big GEMM (off the chain).
    words = emb_ref[...].reshape(T * Bp, Ep)
    xp_sc[...] = _mxu_dot(words, w1w_ref[...]) + tile_rows(bias1)

    def lstm_pass(whh_ref, y_out, h, c):
        # TODO(synk): stage whh once in the MXU weight registers (pltpu.matmul_push_rhs /
        # matmul_acc_lhs / matmul_pop) to drop the per-step weight push from the chain.
        whh = whh_ref[...]                                           # (Ep, 4Ep)
        # T small & static -> fully unrolled, 128-aligned static slices; h/c stay in vregs.
        # TODO(synk): for large T switch to lax.fori_loop(..., unroll=2-4) with (h, c) carries.
        for t in range(T):
            lo = t * Bp
            gates = xp_sc[lo:lo + Bp, :] + _mxu_dot(h, whh)          # (Bp, 4Ep) f32, i,f,g,o
            i_g = jax.nn.sigmoid(gates[:, 0 * Ep:1 * Ep])
            f_g = jax.nn.sigmoid(gates[:, 1 * Ep:2 * Ep])
            g_g = jnp.tanh(gates[:, 2 * Ep:3 * Ep])
            o_g = jax.nn.sigmoid(gates[:, 3 * Ep:4 * Ep])
            c = f_g * c + i_g * g_g
            h = o_g * jnp.tanh(c)
            y_out[lo:lo + Bp, :] = h.astype(y_out.dtype)             # only per-step VMEM write
        return h, c

    # ---- LSTM layer 1 (zero initial state) ----
    z = jnp.zeros((Bp, Ep), jnp.float32)
    h1, c1 = lstm_pass(whh1_ref, y1_sc, z, z)

    # LSTM2 input projection of all LSTM1 outputs as one big GEMM.
    xp_sc[...] = _mxu_dot(y1_sc[...], w2w_ref[...]) + tile_rows(bias2)

    # ---- LSTM layer 2: initial state = LSTM1 final state; outputs go straight to the output ref ----
    lstm_pass(whh2_ref, y_ref, h1, c1)


def _vocab_kernel(y_ref, w_ref, b_ref, out_ref):
    out_ref[...] = (_mxu_dot(y_ref[...], w_ref[...]) + b_ref[...]).astype(out_ref.dtype)


def decoder_forward(params, feats_p, captions, Bp, Ep, weights_dtype=jnp.float32):
    B, T = captions.shape
    E = params["embed"].shape[1]
    V = params["out_w"].shape[1]
    Vp = _round_up(V, _LANE)
    tn = min(_VOCAB_TN, Vp)
    nv = -(-Vp // tn)
    Vpp = nv * tn

    # Embedding lookup stays in XLA (gather); dropout on the embedding is eval-mode identity.
    words = jnp.take(params["embed"], captions, axis=0)              # (B, T, E)
    words = jnp.transpose(words, (1, 0, 2))                          # time-major (T, B, E)
    words = _pad_axis(_pad_axis(words, 1, Bp), 2, Ep)                # (T, Bp, Ep) f32 (tiny)

    def split_wih(w):
        # W_ih is (2E, 4E): rows [:E] multiply the (time-invariant) features, rows [E:] the words.
        wf = _pad_axis(_pad_gate_cols(w[:E, :], E, Ep), 0, Ep).astype(weights_dtype)
        ww = _pad_axis(_pad_gate_cols(w[E:, :], E, Ep), 0, Ep).astype(weights_dtype)
        return wf, ww

    w1f, w1w = split_wih(params["l1_wih"])
    w2f, w2w = split_wih(params["l2_wih"])
    whh1 = _pad_axis(_pad_gate_cols(params["l1_whh"], E, Ep), 0, Ep).astype(weights_dtype)
    whh2 = _pad_axis(_pad_gate_cols(params["l2_whh"], E, Ep), 0, Ep).astype(weights_dtype)
    b1 = _pad_gate_cols(params["l1_b"], E, Ep)                       # biases stay f32
    b2 = _pad_gate_cols(params["l2_b"], E, Ep)
    wout = _pad_axis(_pad_axis(params["out_w"], 0, Ep), 1, Vpp).astype(weights_dtype)
    bout = _pad_axis(params["out_b"], 1, Vpp)

    full = lambda a: pl.BlockSpec(a.shape, lambda i: (0,) * a.ndim)
    lstm_inputs = (feats_p, words, w1f, w1w, whh1, b1, w2f, w2w, whh2, b2)

    gate_flops = 2 * Bp * Ep * (4 * Ep)
    lstm_cost = pl.CostEstimate(
        flops=(2 * T + 2 * T + 2) * gate_flops,     # xp GEMMs + recurrent GEMMs + feature-bias GEMMs
        transcendentals=2 * T * 5 * Bp * Ep,
        bytes_accessed=sum(map(_nbytes, lstm_inputs)) + T * Bp * Ep * 4,
    )

    # Fused LSTM1 + LSTM2 recurrence: LSTM1 outputs never leave VMEM; y2 (tiny) goes to HBM once.
    y2 = pl.pallas_call(
        _lstm_kernel,
        out_shape=jax.ShapeDtypeStruct((T * Bp, Ep), jnp.float32),
        grid=(1,),
        in_specs=[full(a) for a in lstm_inputs],
        out_specs=pl.BlockSpec((T * Bp, Ep), lambda i: (0, 0)),
        scratch_shapes=[
            pltpu.VMEM((T * Bp, 4 * Ep), jnp.float32),   # precomputed input projections (+bias)
            pltpu.VMEM((T * Bp, Ep), jnp.float32),       # LSTM1 outputs
        ],
        compiler_params=pltpu.CompilerParams(
            dimension_semantics=("arbitrary",), vmem_limit_bytes=_VMEM_LIMIT),
        cost_estimate=lstm_cost,
    )(*lstm_inputs)

    # Vocab projection as its own pallas_call, N-tiled over the vocab: wout/logits never have to
    # be fully VMEM-resident and the tiles shard over v7x's two TensorCores ("parallel").
    vocab_cost = pl.CostEstimate(
        flops=2 * T * Bp * Ep * Vpp,
        transcendentals=0,
        bytes_accessed=_nbytes(y2) + _nbytes(wout) + _nbytes(bout) + T * Bp * Vpp * 4,
    )
    logits_p = pl.pallas_call(
        _vocab_kernel,
        out_shape=jax.ShapeDtypeStruct((T * Bp, Vpp), jnp.float32),
        grid=(nv,),
        in_specs=[
            pl.BlockSpec((T * Bp, Ep), lambda j: (0, 0)),   # y2, grid-invariant block
            pl.BlockSpec((Ep, tn), lambda j: (0, j)),       # wout N-tile
            pl.BlockSpec((1, tn), lambda j: (0, j)),        # bias N-tile
        ],
        out_specs=pl.BlockSpec((T * Bp, tn), lambda j: (0, j)),      # lane-dense logits tile
        compiler_params=pltpu.CompilerParams(
            dimension_semantics=("parallel",), vmem_limit_bytes=_VMEM_LIMIT),
        cost_estimate=vocab_cost,
    )(y2, wout, bout)

    # time-major (T, Bp, Vpp) -> batch-first (B, T, V); tiny host-side transpose/slice.
    logits = logits_p.reshape(T, Bp, Vpp)[:, :B, :V]
    return jnp.transpose(logits, (1, 0, 2))


def image_captioner_forward(params, images, captions, weights_dtype=jnp.float32):
    B = images.shape[0]
    E = params["embed"].shape[1]
    Bp = _round_up(B, _SUBLANE)
    Ep = _round_up(E, _LANE)
    feats_p = encoder_features_padded(params, images, Bp, Ep, weights_dtype)   # padded/lane-dense
    return decoder_forward(params, feats_p, captions, Bp, Ep, weights_dtype)


# ------------------------------- Param initialization ---------------------------
def init_params(key, *, in_c, H, W, E, V):
    manifold_size = in_c * H * W
    ks = jax.random.split(key, 16)
    rnd = lambda k, shape, s=0.05: s * jax.random.normal(k, shape, dtype=jnp.float32)
    return {
        # Encoder linear_mapper: M -> 5E -> 3E -> E   (weights stored as (in, out))
        "enc_w1": rnd(ks[0], (manifold_size, 5 * E)), "enc_b1": rnd(ks[1], (1, 5 * E)),
        "enc_w2": rnd(ks[2], (5 * E, 3 * E)),         "enc_b2": rnd(ks[3], (1, 3 * E)),
        "enc_w3": rnd(ks[4], (3 * E, E)),             "enc_b3": rnd(ks[5], (1, E)),
        # Decoder embedding (vocab, E)
        "embed": rnd(ks[6], (V, E), 1.0),
        # LSTM 1: input 2E, hidden E; W_ih^T (2E,4E), W_hh^T (E,4E), bias = b_ih + b_hh
        "l1_wih": rnd(ks[7], (2 * E, 4 * E)), "l1_whh": rnd(ks[8], (E, 4 * E)), "l1_b": rnd(ks[9], (1, 4 * E)),
        # LSTM 2
        "l2_wih": rnd(ks[10], (2 * E, 4 * E)), "l2_whh": rnd(ks[11], (E, 4 * E)), "l2_b": rnd(ks[12], (1, 4 * E)),
        # Output projection E -> vocab
        "out_w": rnd(ks[13], (E, V)), "out_b": rnd(ks[14], (1, V)),
    }


# ------------------------------- Pure-JAX reference -----------------------------
def _reference_encoder(params, images):
    hp = jax.lax.Precision.HIGHEST
    dot = lambda a, b: jnp.dot(a, b, precision=hp)
    B = images.shape[0]
    x = images.reshape(B, -1).astype(jnp.float32)
    h = dot(x, params["enc_w1"]) + params["enc_b1"]
    h = dot(h, params["enc_w2"]) + params["enc_b2"]
    h = dot(h, params["enc_w3"]) + params["enc_b3"]
    return jnp.maximum(h, 0.0)


def _reference_forward(params, images, captions):
    hp = jax.lax.Precision.HIGHEST
    dot = lambda a, b: jnp.dot(a, b, precision=hp)
    B = images.shape[0]
    T = captions.shape[1]
    E = params["embed"].shape[1]

    feats = _reference_encoder(params, images)
    words = jnp.take(params["embed"], captions, axis=0)

    def lstm(seq, wih, whh, b, h0, c0):
        hs, cs, ys = h0, c0, []
        for t in range(seq.shape[1]):
            g = dot(seq[:, t], wih) + dot(hs, whh) + b
            i = jax.nn.sigmoid(g[:, 0 * E:1 * E]); f = jax.nn.sigmoid(g[:, 1 * E:2 * E])
            gg = jnp.tanh(g[:, 2 * E:3 * E]);      o = jax.nn.sigmoid(g[:, 3 * E:4 * E])
            cs = f * cs + i * gg
            hs = o * jnp.tanh(cs)
            ys.append(hs)
        return jnp.stack(ys, axis=1), hs, cs

    h0 = jnp.zeros((B, E), jnp.float32)
    c0 = jnp.zeros((B, E), jnp.float32)
    fseq = jnp.broadcast_to(feats[:, None, :], (B, T, E))
    y1, h1, c1 = lstm(jnp.concatenate([fseq, words], -1),
                      params["l1_wih"], params["l1_whh"], params["l1_b"], h0, c0)
    y2, _, _ = lstm(jnp.concatenate([fseq, y1], -1),
                    params["l2_wih"], params["l2_whh"], params["l2_b"], h1, c1)
    return dot(y2.reshape(B * T, E), params["out_w"]).reshape(B, T, -1) + params["out_b"]


if __name__ == "__main__":
    B, C, H, W = 2, 4, 16, 16     # images (NCHW)
    T = 8                         # caption length
    E = 32                        # embed_size (== LSTM hidden size in the reference)
    V = 64                        # synthetic vocab size

    key = jax.random.PRNGKey(0)
    kp, ki, kc = jax.random.split(key, 3)
    params = init_params(kp, in_c=C, H=H, W=W, E=E, V=V)
    images = jax.random.normal(ki, (B, C, H, W), dtype=jnp.float32)
    captions = jax.random.randint(kc, (B, T), 0, V, dtype=jnp.int32)

    ref_feats = _reference_encoder(params, images)
    ref = _reference_forward(params, images, captions)

    # f32-weight path: matches the PyTorch module numerics (up to MXU multi-pass rounding).
    fwd = jax.jit(functools.partial(image_captioner_forward, params, weights_dtype=jnp.float32))
    out = jax.block_until_ready(fwd(images, captions))
    assert out.shape == (B, T, V) and out.dtype == jnp.float32
    assert jnp.allclose(out, ref, rtol=2e-2, atol=2e-2), float(jnp.max(jnp.abs(out - ref)))

    # Encoder-only path (the spec module).
    enc = jax.jit(functools.partial(encoder_forward, params))
    feats = jax.block_until_ready(enc(images))
    assert feats.shape == (B, E) and feats.dtype == jnp.float32
    assert jnp.allclose(feats, ref_feats, rtol=2e-2, atol=2e-2), float(jnp.max(jnp.abs(feats - ref_feats)))

    # bf16-weight deployment mode (halves weight HBM traffic); inference-parity tolerance.
    fwd_bf16 = jax.jit(functools.partial(image_captioner_forward, params,
                                         weights_dtype=jnp.bfloat16))
    out_bf16 = jax.block_until_ready(fwd_bf16(images, captions))
    assert out_bf16.shape == (B, T, V)
    assert jnp.allclose(out_bf16, ref, rtol=8e-2, atol=8e-2), float(jnp.max(jnp.abs(out_bf16 - ref)))

    print("KERNEL_OK")
</pallas_src>

<mosaic_0001>
module attributes {stable_mosaic.version = 11 : i64} {
  func.func @_encoder_kernel(%arg0: i32, %arg1: memref<8x1024xf32, #tpu.memory_space<vmem>>, %arg2: memref<1024x256xf32, #tpu.memory_space<vmem>>, %arg3: memref<1x256xf32, #tpu.memory_space<vmem>>, %arg4: memref<256x128xf32, #tpu.memory_space<vmem>>, %arg5: memref<1x128xf32, #tpu.memory_space<vmem>>, %arg6: memref<128x128xf32, #tpu.memory_space<vmem>>, %arg7: memref<1x128xf32, #tpu.memory_space<vmem>>, %arg8: memref<8x128xf32, #tpu.memory_space<vmem>>, %arg9: memref<8x256xf32, #tpu.memory_space<vmem>>) attributes {dimension_semantics = [#tpu.dimension_semantics<arbitrary>], iteration_bounds = array<i64: 1>, scalar_prefetch = 0 : i64, scratch_operands = 1 : i64, tpu.core_type = #tpu.core_type<tc>, window_params = [{transform_indices = @transform_0, window_bounds = array<i64: 8, 1024>}, {transform_indices = @transform_1, window_bounds = array<i64: 1024, 256>}, {pipeline_mode = #tpu.pipeline_mode<synchronous>, transform_indices = @transform_2, window_bounds = array<i64: 1, 256>}, {pipeline_mode = #tpu.pipeline_mode<synchronous>, transform_indices = @transform_3, window_bounds = array<i64: 256, 128>}, {pipeline_mode = #tpu.pipeline_mode<synchronous>, transform_indices = @transform_4, window_bounds = array<i64: 1, 128>}, {pipeline_mode = #tpu.pipeline_mode<synchronous>, transform_indices = @transform_5, window_bounds = array<i64: 128, 128>}, {pipeline_mode = #tpu.pipeline_mode<synchronous>, transform_indices = @transform_6, window_bounds = array<i64: 1, 128>}, {pipeline_mode = #tpu.pipeline_mode<synchronous>, transform_indices = @transform_7, window_bounds = array<i64: 8, 128>}]} {
    %c0_i32 = arith.constant 0 : i32
    %0 = arith.cmpi eq, %arg0, %c0_i32 : i32
    %1 = arith.extui %0 : i1 to i32
    %c0_i32_0 = arith.constant 0 : i32
    %2 = arith.cmpi ne, %1, %c0_i32_0 : i32
    scf.if %2 {
      %cst_10 = arith.constant 0.000000e+00 : f32
      %12 = vector.broadcast %cst_10 : f32 to vector<8x256xf32>
      %c0_11 = arith.constant 0 : index
      %c0_12 = arith.constant 0 : index
      %13 = vector.load %arg9[%c0_11, %c0_12] : memref<8x256xf32, #tpu.memory_space<vmem>>, vector<8x256xf32>
      tpu.vector_store %arg9[%c0_11, %c0_12], %12 {strides = array<i32>} : memref<8x256xf32, #tpu.memory_space<vmem>>, vector<8x256xf32>,
    } else {
    }
    %c0 = arith.constant 0 : index
    %c0_1 = arith.constant 0 : index
    %3 = vector.load %arg9[%c0, %c0_1] : memref<8x256xf32, #tpu.memory_space<vmem>>, vector<8x256xf32>
    %c0_2 = arith.constant 0 : index
    %c0_3 = arith.constant 0 : index
    %4 = vector.load %arg1[%c0_2, %c0_3] : memref<8x1024xf32, #tpu.memory_space<vmem>>, vector<8x1024xf32>
    %c0_4 = arith.constant 0 : index
    %c0_5 = arith.constant 0 : index
    %5 = vector.load %arg2[%c0_4, %c0_5] : memref<1024x256xf32, #tpu.memory_space<vmem>>, vector<1024x256xf32>
    %cst = arith.constant dense<0.000000e+00> : vector<8x256xf32>
    %6 = tpu.matmul %4, %5, %cst {dimension_numbers = #tpu.dot_dimension_numbers<[1], [0], [0], [1], [0, 0, 1, 1], [], []>} : vector<8x1024xf32>, vector<1024x256xf32>, vector<8x256xf32> -> vector<8x256xf32>
    %7 = arith.addf %3, %6 : vector<8x256xf32>
    %c0_6 = arith.constant 0 : index
    %c0_7 = arith.constant 0 : index
    %8 = vector.load %arg9[%c0_6, %c0_7] : memref<8x256xf32, #tpu.memory_space<vmem>>, vector<8x256xf32>
    tpu.vector_store %arg9[%c0_6, %c0_7], %7 {strides = array<i32>} : memref<8x256xf32, #tpu.memory_space<vmem>>, vector<8x256xf32>,
    %c0_i32_8 = arith.constant 0 : i32
    %9 = arith.cmpi eq, %arg0, %c0_i32_8 : i32
    %10 = arith.extui %9 : i1 to i32
    %c0_i32_9 = arith.constant 0 : i32
    %11 = arith.cmpi ne, %10, %c0_i32_9 : i32
    scf.if %11 {
      %c0_10 = arith.constant 0 : index
      %c0_11 = arith.constant 0 : index
      %12 = vector.load %arg9[%c0_10, %c0_11] : memref<8x256xf32, #tpu.memory_space<vmem>>, vector<8x256xf32>
      %c0_12 = arith.constant 0 : index
      %c0_13 = arith.constant 0 : index
      %13 = vector.load %arg3[%c0_12, %c0_13] : memref<1x256xf32, #tpu.memory_space<vmem>>, vector<1x256xf32>
      %14 = vector.broadcast %13 : vector<1x256xf32> to vector<8x256xf32>
      %15 = arith.addf %12, %14 : vector<8x256xf32>
      %c0_14 = arith.constant 0 : index
      %c0_15 = arith.constant 0 : index
      %16 = vector.load %arg4[%c0_14, %c0_15] : memref<256x128xf32, #tpu.memory_space<vmem>>, vector<256x128xf32>
      %cst_16 = arith.constant dense<0.000000e+00> : vector<8x128xf32>
      %17 = tpu.matmul %15, %16, %cst_16 {dimension_numbers = #tpu.dot_dimension_numbers<[1], [0], [0], [1], [0, 0, 1, 1], [], []>} : vector<8x256xf32>, vector<256x128xf32>, vector<8x128xf32> -> vector<8x128xf32>
      %c0_17 = arith.constant 0 : index
      %c0_18 = arith.constant 0 : index
      %18 = vector.load %arg5[%c0_17, %c0_18] : memref<1x128xf32, #tpu.memory_space<vmem>>, vector<1x128xf32>
      %19 = vector.broadcast %18 : vector<1x128xf32> to vector<8x128xf32>
      %20 = arith.addf %17, %19 : vector<8x128xf32>
      %c0_19 = arith.constant 0 : index
      %c0_20 = arith.constant 0 : index
      %21 = vector.load %arg6[%c0_19, %c0_20] : memref<128x128xf32, #tpu.memory_space<vmem>>, vector<128x128xf32>
      %cst_21 = arith.constant dense<0.000000e+00> : vector<8x128xf32>
      %22 = tpu.matmul %20, %21, %cst_21 {dimension_numbers = #tpu.dot_dimension_numbers<[1], [0], [0], [1], [0, 0, 1, 1], [], []>} : vector<8x128xf32>, vector<128x128xf32>, vector<8x128xf32> -> vector<8x128xf32>
      %c0_22 = arith.constant 0 : index
      %c0_23 = arith.constant 0 : index
      %23 = vector.load %arg7[%c0_22, %c0_23] : memref<1x128xf32, #tpu.memory_space<vmem>>, vector<1x128xf32>
      %24 = vector.broadcast %23 : vector<1x128xf32> to vector<8x128xf32>
      %25 = arith.addf %22, %24 : vector<8x128xf32>
      %cst_24 = arith.constant 0.000000e+00 : f32
      %26 = vector.broadcast %cst_24 : f32 to vector<8x128xf32>
      %27 = arith.maximumf %25, %26 : vector<8x128xf32>
      %c0_25 = arith.constant 0 : index
      %c0_26 = arith.constant 0 : index
      %28 = vector.load %arg8[%c0_25, %c0_26] : memref<8x128xf32, #tpu.memory_space<vmem>>, vector<8x128xf32>
      tpu.vector_store %arg8[%c0_25, %c0_26], %27 {strides = array<i32>} : memref<8x128xf32, #tpu.memory_space<vmem>>, vector<8x128xf32>,
    } else {
    }
    return
  }
  func.func @transform_0(%arg0: i32) -> (i32, i32) {
    %c0_i32 = arith.constant 0 : i32
    %c0_i32_0 = arith.constant 0 : i32
    return %c0_i32, %arg0 : i32, i32
  }
  func.func @transform_1(%arg0: i32) -> (i32, i32) {
    %c0_i32 = arith.constant 0 : i32
    %c0_i32_0 = arith.constant 0 : i32
    return %arg0, %c0_i32 : i32, i32
  }
  func.func @transform_2(%arg0: i32) -> (i32, i32) {
    %c0_i32 = arith.constant 0 : i32
    %c0_i32_0 = arith.constant 0 : i32
    %c0_i32_1 = arith.constant 0 : i32
    return %c0_i32, %c0_i32_0 : i32, i32
  }
  func.func @transform_3(%arg0: i32) -> (i32, i32) {
    %c0_i32 = arith.constant 0 : i32
    %c0_i32_0 = arith.constant 0 : i32
    %c0_i32_1 = arith.constant 0 : i32
    return %c0_i32, %c0_i32_0 : i32, i32
  }
  func.func @transform_4(%arg0: i32) -> (i32, i32) {
    %c0_i32 = arith.constant 0 : i32
    %c0_i32_0 = arith.constant 0 : i32
    %c0_i32_1 = arith.constant 0 : i32
    return %c0_i32, %c0_i32_0 : i32, i32
  }
  func.func @transform_5(%arg0: i32) -> (i32, i32) {
    %c0_i32 = arith.constant 0 : i32
    %c0_i32_0 = arith.constant 0 : i32
    %c0_i32_1 = arith.constant 0 : i32
    return %c0_i32, %c0_i32_0 : i32, i32
  }
  func.func @transform_6(%arg0: i32) -> (i32, i32) {
    %c0_i32 = arith.constant 0 : i32
    %c0_i32_0 = arith.constant 0 : i32
    %c0_i32_1 = arith.constant 0 : i32
    return %c0_i32, %c0_i32_0 : i32, i32
  }
  func.func @transform_7(%arg0: i32) -> (i32, i32) {
    %c0_i32 = arith.constant 0 : i32
    %c0_i32_0 = arith.constant 0 : i32
    %c0_i32_1 = arith.constant 0 : i32
    return %c0_i32, %c0_i32_0 : i32, i32
  }
}

module attributes {stable_mosaic.version = 11 : i64} {
  func.func @_vocab_kernel(%arg0: i32, %arg1: memref<64x128xf32, #tpu.memory_space<vmem>>, %arg2: memref<128x128xf32, #tpu.memory_space<vmem>>, %arg3: memref<1x128xf32, #tpu.memory_space<vmem>>, %arg4: memref<64x128xf32, #tpu.memory_space<vmem>>) attributes {dimension_semantics = [#tpu.dimension_semantics<parallel>], iteration_bounds = array<i64: 1>, scalar_prefetch = 0 : i64, scratch_operands = 0 : i64, tpu.core_type = #tpu.core_type<tc>, window_params = [{pipeline_mode = #tpu.pipeline_mode<synchronous>, transform_indices = @transform_0, window_bounds = array<i64: 64, 128>}, {transform_indices = @transform_1, window_bounds = array<i64: 128, 128>}, {transform_indices = @transform_2, window_bounds = array<i64: 1, 128>}, {transform_indices = @transform_3, window_bounds = array<i64: 64, 128>}]} {
    %c0 = arith.constant 0 : index
    %c0_0 = arith.constant 0 : index
    %0 = vector.load %arg1[%c0, %c0_0] : memref<64x128xf32, #tpu.memory_space<vmem>>, vector<64x128xf32>
    %c0_1 = arith.constant 0 : index
    %c0_2 = arith.constant 0 : index
    %1 = vector.load %arg2[%c0_1, %c0_2] : memref<128x128xf32, #tpu.memory_space<vmem>>, vector<128x128xf32>
    %cst = arith.constant dense<0.000000e+00> : vector<64x128xf32>
    %2 = tpu.matmul %0, %1, %cst {dimension_numbers = #tpu.dot_dimension_numbers<[1], [0], [0], [1], [0, 0, 1, 1], [], []>} : vector<64x128xf32>, vector<128x128xf32>, vector<64x128xf32> -> vector<64x128xf32>
    %c0_3 = arith.constant 0 : index
    %c0_4 = arith.constant 0 : index
    %3 = vector.load %arg3[%c0_3, %c0_4] : memref<1x128xf32, #tpu.memory_space<vmem>>, vector<1x128xf32>
    %4 = vector.broadcast %3 : vector<1x128xf32> to vector<64x128xf32>
    %5 = arith.addf %2, %4 : vector<64x128xf32>
    %c0_5 = arith.constant 0 : index
    %c0_6 = arith.constant 0 : index
    %6 = vector.load %arg4[%c0_5, %c0_6] : memref<64x128xf32, #tpu.memory_space<vmem>>, vector<64x128xf32>
    tpu.vector_store %arg4[%c0_5, %c0_6], %5 {strides = array<i32>} : memref<64x128xf32, #tpu.memory_space<vmem>>, vector<64x128xf32>,
    return
  }
  func.func @transform_0(%arg0: i32) -> (i32, i32) {
    %c0_i32 = arith.constant 0 : i32
    %c0_i32_0 = arith.constant 0 : i32
    %c0_i32_1 = arith.constant 0 : i32
    return %c0_i32, %c0_i32_0 : i32, i32
  }
  func.func @transform_1(%arg0: i32) -> (i32, i32) {
    %c0_i32 = arith.constant 0 : i32
    %c0_i32_0 = arith.constant 0 : i32
    return %c0_i32, %arg0 : i32, i32
  }
  func.func @transform_2(%arg0: i32) -> (i32, i32) {
    %c0_i32 = arith.constant 0 : i32
    %c0_i32_0 = arith.constant 0 : i32
    return %c0_i32, %arg0 : i32, i32
  }
  func.func @transform_3(%arg0: i32) -> (i32, i32) {
    %c0_i32 = arith.constant 0 : i32
    %c0_i32_0 = arith.constant 0 : i32
    return %c0_i32, %arg0 : i32, i32
  }
}

module attributes {stable_mosaic.version = 11 : i64} {
  func.func @_lstm_kernel(%arg0: i32, %arg1: memref<8x128xf32, #tpu.memory_space<vmem>>, %arg2: memref<8x8x128xf32, #tpu.memory_space<vmem>>, %arg3: memref<128x512xf32, #tpu.memory_space<vmem>>, %arg4: memref<128x512xf32, #tpu.memory_space<vmem>>, %arg5: memref<128x512xf32, #tpu.memory_space<vmem>>, %arg6: memref<1x512xf32, #tpu.memory_space<vmem>>, %arg7: memref<128x512xf32, #tpu.memory_space<vmem>>, %arg8: memref<128x512xf32, #tpu.memory_space<vmem>>, %arg9: memref<128x512xf32, #tpu.memory_space<vmem>>, %arg10: memref<1x512xf32, #tpu.memory_space<vmem>>, %arg11: memref<64x128xf32, #tpu.memory_space<vmem>>, %arg12: memref<64x512xf32, #tpu.memory_space<vmem>>, %arg13: memref<64x128xf32, #tpu.memory_space<vmem>>) attributes {dimension_semantics = [#tpu.dimension_semantics<arbitrary>], iteration_bounds = array<i64: 1>, scalar_prefetch = 0 : i64, scratch_operands = 2 : i64, tpu.core_type = #tpu.core_type<tc>, window_params = [{pipeline_mode = #tpu.pipeline_mode<synchronous>, transform_indices = @transform_0, window_bounds = array<i64: 8, 128>}, {pipeline_mode = #tpu.pipeline_mode<synchronous>, transform_indices = @transform_1, window_bounds = array<i64: 8, 8, 128>}, {pipeline_mode = #tpu.pipeline_mode<synchronous>, transform_indices = @transform_2, window_bounds = array<i64: 128, 512>}, {pipeline_mode = #tpu.pipeline_mode<synchronous>, transform_indices = @transform_3, window_bounds = array<i64: 128, 512>}, {pipeline_mode = #tpu.pipeline_mode<synchronous>, transform_indices = @transform_4, window_bounds = array<i64: 128, 512>}, {pipeline_mode = #tpu.pipeline_mode<synchronous>, transform_indices = @transform_5, window_bounds = array<i64: 1, 512>}, {pipeline_mode = #tpu.pipeline_mode<synchronous>, transform_indices = @transform_6, window_bounds = array<i64: 128, 512>}, {pipeline_mode = #tpu.pipeline_mode<synchronous>, transform_indices = @transform_7, window_bounds = array<i64: 128, 512>}, {pipeline_mode = #tpu.pipeline_mode<synchronous>, transform_indices = @transform_8, window_bounds = array<i64: 128, 512>}, {pipeline_mode = #tpu.pipeline_mode<synchronous>, transform_indices = @transform_9, window_bounds = array<i64: 1, 512>}, {pipeline_mode = #tpu.pipeline_mode<synchronous>, transform_indices = @transform_10, window_bounds = array<i64: 64, 128>}]} {
    %c0 = arith.constant 0 : index
    %c0_0 = arith.constant 0 : index
    %0 = vector.load %arg1[%c0, %c0_0] : memref<8x128xf32, #tpu.memory_space<vmem>>, vector<8x128xf32>
    %c0_1 = arith.constant 0 : index
    %c0_2 = arith.constant 0 : index
    %1 = vector.load %arg3[%c0_1, %c0_2] : memref<128x512xf32, #tpu.memory_space<vmem>>, vector<128x512xf32>
    %cst = arith.constant dense<0.000000e+00> : vector<8x512xf32>
    %2 = tpu.matmul %0, %1, %cst {dimension_numbers = #tpu.dot_dimension_numbers<[1], [0], [0], [1], [0, 0, 1, 1], [], []>} : vector<8x128xf32>, vector<128x512xf32>, vector<8x512xf32> -> vector<8x512xf32>
    %c0_3 = arith.constant 0 : index
    %c0_4 = arith.constant 0 : index
    %3 = vector.load %arg6[%c0_3, %c0_4] : memref<1x512xf32, #tpu.memory_space<vmem>>, vector<1x512xf32>
    %4 = vector.broadcast %3 : vector<1x512xf32> to vector<8x512xf32>
    %5 = arith.addf %2, %4 : vector<8x512xf32>
    %c0_5 = arith.constant 0 : index
    %c0_6 = arith.constant 0 : index
    %6 = vector.load %arg7[%c0_5, %c0_6] : memref<128x512xf32, #tpu.memory_space<vmem>>, vector<128x512xf32>
    %cst_7 = arith.constant dense<0.000000e+00> : vector<8x512xf32>
    %7 = tpu.matmul %0, %6, %cst_7 {dimension_numbers = #tpu.dot_dimension_numbers<[1], [0], [0], [1], [0, 0, 1, 1], [], []>} : vector<8x128xf32>, vector<128x512xf32>, vector<8x512xf32> -> vector<8x512xf32>
    %c0_8 = arith.constant 0 : index
    %c0_9 = arith.constant 0 : index
    %8 = vector.load %arg10[%c0_8, %c0_9] : memref<1x512xf32, #tpu.memory_space<vmem>>, vector<1x512xf32>
    %9 = vector.broadcast %8 : vector<1x512xf32> to vector<8x512xf32>
    %10 = arith.addf %7, %9 : vector<8x512xf32>
    %c0_10 = arith.constant 0 : index
    %c0_11 = arith.constant 0 : index
    %c0_12 = arith.constant 0 : index
    %11 = vector.load %arg2[%c0_10, %c0_11, %c0_12] : memref<8x8x128xf32, #tpu.memory_space<vmem>>, vector<8x8x128xf32>
    %12 = vector.shape_cast %11 : vector<8x8x128xf32> to vector<64x128xf32>
    %c0_13 = arith.constant 0 : index
    %c0_14 = arith.constant 0 : index
    %13 = vector.load %arg4[%c0_13, %c0_14] : memref<128x512xf32, #tpu.memory_space<vmem>>, vector<128x512xf32>
    %cst_15 = arith.constant dense<0.000000e+00> : vector<64x512xf32>
    %14 = tpu.matmul %12, %13, %cst_15 {dimension_numbers = #tpu.dot_dimension_numbers<[1], [0], [0], [1], [0, 0, 1, 1], [], []>} : vector<64x128xf32>, vector<128x512xf32>, vector<64x512xf32> -> vector<64x512xf32>
    %15 = tpu.concatenate %5, %5, %5, %5, %5, %5, %5, %5 in 0 : vector<8x512xf32>, vector<8x512xf32>, vector<8x512xf32>, vector<8x512xf32>, vector<8x512xf32>, vector<8x512xf32>, vector<8x512xf32>, vector<8x512xf32> -> vector<64x512xf32>
    %16 = arith.addf %14, %15 : vector<64x512xf32>
    %c0_16 = arith.constant 0 : index
    %c0_17 = arith.constant 0 : index
    %17 = vector.load %arg12[%c0_16, %c0_17] : memref<64x512xf32, #tpu.memory_space<vmem>>, vector<64x512xf32>
    tpu.vector_store %arg12[%c0_16, %c0_17], %16 {strides = array<i32>} : memref<64x512xf32, #tpu.memory_space<vmem>>, vector<64x512xf32>,
    %cst_18 = arith.constant 0.000000e+00 : f32
    %18 = vector.broadcast %cst_18 : f32 to vector<8x128xf32>
    %c0_19 = arith.constant 0 : index
    %c0_20 = arith.constant 0 : index
    %19 = vector.load %arg5[%c0_19, %c0_20] : memref<128x512xf32, #tpu.memory_space<vmem>>, vector<128x512xf32>
    %c0_21 = arith.constant 0 : index
    %c0_22 = arith.constant 0 : index
    %20 = vector.load %arg12[%c0_21, %c0_22] : memref<64x512xf32, #tpu.memory_space<vmem>>, vector<8x512xf32>
    %cst_23 = arith.constant dense<0.000000e+00> : vector<8x512xf32>
    %21 = tpu.matmul %18, %19, %cst_23 {dimension_numbers = #tpu.dot_dimension_numbers<[1], [0], [0], [1], [0, 0, 1, 1], [], []>} : vector<8x128xf32>, vector<128x512xf32>, vector<8x512xf32> -> vector<8x512xf32>
    %22 = arith.addf %20, %21 : vector<8x512xf32>
    %23 = vector.extract_strided_slice %22 {offsets = [0, 0], sizes = [8, 128], strides = [1, 1]} : vector<8x512xf32> to vector<8x128xf32>
    %24 = arith.negf %23 : vector<8x128xf32>
    %25 = math.exp %24 : vector<8x128xf32>
    %cst_24 = arith.constant 1.000000e+00 : f32
    %26 = vector.broadcast %cst_24 : f32 to vector<8x128xf32>
    %27 = arith.addf %26, %25 : vector<8x128xf32>
    %28 = arith.divf %26, %27 : vector<8x128xf32>
    %29 = vector.extract_strided_slice %22 {offsets = [0, 128], sizes = [8, 128], strides = [1, 1]} : vector<8x512xf32> to vector<8x128xf32>
    %30 = arith.negf %29 : vector<8x128xf32>
    %31 = math.exp %30 : vector<8x128xf32>
    %cst_25 = arith.constant 1.000000e+00 : f32
    %32 = vector.broadcast %cst_25 : f32 to vector<8x128xf32>
    %33 = arith.addf %32, %31 : vector<8x128xf32>
    %34 = arith.divf %32, %33 : vector<8x128xf32>
    %35 = vector.extract_strided_slice %22 {offsets = [0, 256], sizes = [8, 128], strides = [1, 1]} : vector<8x512xf32> to vector<8x128xf32>
    %36 = math.tanh %35 : vector<8x128xf32>
    %37 = vector.extract_strided_slice %22 {offsets = [0, 384], sizes = [8, 128], strides = [1, 1]} : vector<8x512xf32> to vector<8x128xf32>
    %38 = arith.negf %37 : vector<8x128xf32>
    %39 = math.exp %38 : vector<8x128xf32>
    %cst_26 = arith.constant 1.000000e+00 : f32
    %40 = vector.broadcast %cst_26 : f32 to vector<8x128xf32>
    %41 = arith.addf %40, %39 : vector<8x128xf32>
    %42 = arith.divf %40, %41 : vector<8x128xf32>
    %43 = arith.mulf %34, %18 : vector<8x128xf32>
    %44 = arith.mulf %28, %36 : vector<8x128xf32>
    %45 = arith.addf %43, %44 : vector<8x128xf32>
    %46 = math.tanh %45 : vector<8x128xf32>
    %47 = arith.mulf %42, %46 : vector<8x128xf32>
    %c0_27 = arith.constant 0 : index
    %c0_28 = arith.constant 0 : index
    %48 = vector.load %arg13[%c0_27, %c0_28] : memref<64x128xf32, #tpu.memory_space<vmem>>, vector<8x128xf32>
    tpu.vector_store %arg13[%c0_27, %c0_28], %47 {strides = array<i32>} : memref<64x128xf32, #tpu.memory_space<vmem>>, vector<8x128xf32>,
    %c8 = arith.constant 8 : index
    %c0_29 = arith.constant 0 : index
    %49 = vector.load %arg12[%c8, %c0_29] : memref<64x512xf32, #tpu.memory_space<vmem>>, vector<8x512xf32>
    %cst_30 = arith.constant dense<0.000000e+00> : vector<8x512xf32>
    %50 = tpu.matmul %47, %19, %cst_30 {dimension_numbers = #tpu.dot_dimension_numbers<[1], [0], [0], [1], [0, 0, 1, 1], [], []>} : vector<8x128xf32>, vector<128x512xf32>, vector<8x512xf32> -> vector<8x512xf32>
    %51 = arith.addf %49, %50 : vector<8x512xf32>
    %52 = vector.extract_strided_slice %51 {offsets = [0, 0], sizes = [8, 128], strides = [1, 1]} : vector<8x512xf32> to vector<8x128xf32>
    %53 = arith.negf %52 : vector<8x128xf32>
    %54 = math.exp %53 : vector<8x128xf32>
    %cst_31 = arith.constant 1.000000e+00 : f32
    %55 = vector.broadcast %cst_31 : f32 to vector<8x128xf32>
    %56 = arith.addf %55, %54 : vector<8x128xf32>
    %57 = arith.divf %55, %56 : vector<8x128xf32>
    %58 = vector.extract_strided_slice %51 {offsets = [0, 128], sizes = [8, 128], strides = [1, 1]} : vector<8x512xf32> to vector<8x128xf32>
    %59 = arith.negf %58 : vector<8x128xf32>
    %60 = math.exp %59 : vector<8x128xf32>
    %cst_32 = arith.constant 1.000000e+00 : f32
    %61 = vector.broadcast %cst_32 : f32 to vector<8x128xf32>
    %62 = arith.addf %61, %60 : vector<8x128xf32>
    %63 = arith.divf %61, %62 : vector<8x128xf32>
    %64 = vector.extract_strided_slice %51 {offsets = [0, 256], sizes = [8, 128], strides = [1, 1]} : vector<8x512xf32> to vector<8x128xf32>
    %65 = math.tanh %64 : vector<8x128xf32>
    %66 = vector.extract_strided_slice %51 {offsets = [0, 384], sizes = [8, 128], strides = [1, 1]} : vector<8x512xf32> to vector<8x128xf32>
    %67 = arith.negf %66 : vector<8x128xf32>
    %68 = math.exp %67 : vector<8x128xf32>
    %cst_33 = arith.constant 1.000000e+00 : f32
    %69 = vector.broadcast %cst_33 : f32 to vector<8x128xf32>
    %70 = arith.addf %69, %68 : vector<8x128xf32>
    %71 = arith.divf %69, %70 : vector<8x128xf32>
    %72 = arith.mulf %63, %45 : vector<8x128xf32>
    %73 = arith.mulf %57, %65 : vector<8x128xf32>
    %74 = arith.addf %72, %73 : vector<8x128xf32>
    %75 = math.tanh %74 : vector<8x128xf32>
    %76 = arith.mulf %71, %75 : vector<8x128xf32>
    %c8_34 = arith.constant 8 : index
    %c0_35 = arith.constant 0 : index
    %77 = vector.load %arg13[%c8_34, %c0_35] : memref<64x128xf32, #tpu.memory_space<vmem>>, vector<8x128xf32>
    tpu.vector_store %arg13[%c8_34, %c0_35], %76 {strides = array<i32>} : memref<64x128xf32, #tpu.memory_space<vmem>>, vector<8x128xf32>,
    %c16 = arith.constant 16 : index
    %c0_36 = arith.constant 0 : index
    %78 = vector.load %arg12[%c16, %c0_36] : memref<64x512xf32, #tpu.memory_space<vmem>>, vector<8x512xf32>
    %cst_37 = arith.constant dense<0.000000e+00> : vector<8x512xf32>
    %79 = tpu.matmul %76, %19, %cst_37 {dimension_numbers = #tpu.dot_dimension_numbers<[1], [0], [0], [1], [0, 0, 1, 1], [], []>} : vector<8x128xf32>, vector<128x512xf32>, vector<8x512xf32> -> vector<8x512xf32>
    %80 = arith.addf %78, %79 : vector<8x512xf32>
    %81 = vector.extract_strided_slice %80 {offsets = [0, 0], sizes = [8, 128], strides = [1, 1]} : vector<8x512xf32> to vector<8x128xf32>
    %82 = arith.negf %81 : vector<8x128xf32>
    %83 = math.exp %82 : vector<8x128xf32>
    %cst_38 = arith.constant 1.000000e+00 : f32
    %84 = vector.broadcast %cst_38 : f32 to vector<8x128xf32>
    %85 = arith.addf %84, %83 : vector<8x128xf32>
    %86 = arith.divf %84, %85 : vector<8x128xf32>
    %87 = vector.extract_strided_slice %80 {offsets = [0, 128], sizes = [8, 128], strides = [1, 1]} : vector<8x512xf32> to vector<8x128xf32>
    %88 = arith.negf %87 : vector<8x128xf32>
    %89 = math.exp %88 : vector<8x128xf32>
    %cst_39 = arith.constant 1.000000e+00 : f32
    %90 = vector.broadcast %cst_39 : f32 to vector<8x128xf32>
    %91 = arith.addf %90, %89 : vector<8x128xf32>
    %92 = arith.divf %90, %91 : vector<8x128xf32>
    %93 = vector.extract_strided_slice %80 {offsets = [0, 256], sizes = [8, 128], strides = [1, 1]} : vector<8x512xf32> to vector<8x128xf32>
    %94 = math.tanh %93 : vector<8x128xf32>
    %95 = vector.extract_strided_slice %80 {offsets = [0, 384], sizes = [8, 128], strides = [1, 1]} : vector<8x512xf32> to vector<8x128xf32>
    %96 = arith.negf %95 : vector<8x128xf32>
    %97 = math.exp %96 : vector<8x128xf32>
    %cst_40 = arith.constant 1.000000e+00 : f32
    %98 = vector.broadcast %cst_40 : f32 to vector<8x128xf32>
    %99 = arith.addf %98, %97 : vector<8x128xf32>
    %100 = arith.divf %98, %99 : vector<8x128xf32>
    %101 = arith.mulf %92, %74 : vector<8x128xf32>
    %102 = arith.mulf %86, %94 : vector<8x128xf32>
    %103 = arith.addf %101, %102 : vector<8x128xf32>
    %104 = math.tanh %103 : vector<8x128xf32>
    %105 = arith.mulf %100, %104 : vector<8x128xf32>
    %c16_41 = arith.constant 16 : index
    %c0_42 = arith.constant 0 : index
    %106 = vector.load %arg13[%c16_41, %c0_42] : memref<64x128xf32, #tpu.memory_space<vmem>>, vector<8x128xf32>
    tpu.vector_store %arg13[%c16_41, %c0_42], %105 {strides = array<i32>} : memref<64x128xf32, #tpu.memory_space<vmem>>, vector<8x128xf32>,
    %c24 = arith.constant 24 : index
    %c0_43 = arith.constant 0 : index
    %107 = vector.load %arg12[%c24, %c0_43] : memref<64x512xf32, #tpu.memory_space<vmem>>, vector<8x512xf32>
    %cst_44 = arith.constant dense<0.000000e+00> : vector<8x512xf32>
    %108 = tpu.matmul %105, %19, %cst_44 {dimension_numbers = #tpu.dot_dimension_numbers<[1], [0], [0], [1], [0, 0, 1, 1], [], []>} : vector<8x128xf32>, vector<128x512xf32>, vector<8x512xf32> -> vector<8x512xf32>
    %109 = arith.addf %107, %108 : vector<8x512xf32>
    %110 = vector.extract_strided_slice %109 {offsets = [0, 0], sizes = [8, 128], strides = [1, 1]} : vector<8x512xf32> to vector<8x128xf32>
    %111 = arith.negf %110 : vector<8x128xf32>
    %112 = math.exp %111 : vector<8x128xf32>
    %cst_45 = arith.constant 1.000000e+00 : f32
    %113 = vector.broadcast %cst_45 : f32 to vector<8x128xf32>
    %114 = arith.addf %113, %112 : vector<8x128xf32>
    %115 = arith.divf %113, %114 : vector<8x128xf32>
    %116 = vector.extract_strided_slice %109 {offsets = [0, 128], sizes = [8, 128], strides = [1, 1]} : vector<8x512xf32> to vector<8x128xf32>
    %117 = arith.negf %116 : vector<8x128xf32>
    %118 = math.exp %117 : vector<8x128xf32>
    %cst_46 = arith.constant 1.000000e+00 : f32
    %119 = vector.broadcast %cst_46 : f32 to vector<8x128xf32>
    %120 = arith.addf %119, %118 : vector<8x128xf32>
    %121 = arith.divf %119, %120 : vector<8x128xf32>
    %122 = vector.extract_strided_slice %109 {offsets = [0, 256], sizes = [8, 128], strides = [1, 1]} : vector<8x512xf32> to vector<8x128xf32>
    %123 = math.tanh %122 : vector<8x128xf32>
    %124 = vector.extract_strided_slice %109 {offsets = [0, 384], sizes = [8, 128], strides = [1, 1]} : vector<8x512xf32> to vector<8x128xf32>
    %125 = arith.negf %124 : vector<8x128xf32>
    %126 = math.exp %125 : vector<8x128xf32>
    %cst_47 = arith.constant 1.000000e+00 : f32
    %127 = vector.broadcast %cst_47 : f32 to vector<8x128xf32>
    %128 = arith.addf %127, %126 : vector<8x128xf32>
    %129 = arith.divf %127, %128 : vector<8x128xf32>
    %130 = arith.mulf %121, %103 : vector<8x128xf32>
    %131 = arith.mulf %115, %123 : vector<8x128xf32>
    %132 = arith.addf %130, %131 : vector<8x128xf32>
    %133 = math.tanh %132 : vector<8x128xf32>
    %134 = arith.mulf %129, %133 : vector<8x128xf32>
    %c24_48 = arith.constant 24 : index
    %c0_49 = arith.constant 0 : index
    %135 = vector.load %arg13[%c24_48, %c0_49] : memref<64x128xf32, #tpu.memory_space<vmem>>, vector<8x128xf32>
    tpu.vector_store %arg13[%c24_48, %c0_49], %134 {strides = array<i32>} : memref<64x128xf32, #tpu.memory_space<vmem>>, vector<8x128xf32>,
    %c32 = arith.constant 32 : index
    %c0_50 = arith.constant 0 : index
    %136 = vector.load %arg12[%c32, %c0_50] : memref<64x512xf32, #tpu.memory_space<vmem>>, vector<8x512xf32>
    %cst_51 = arith.constant dense<0.000000e+00> : vector<8x512xf32>
    %137 = tpu.matmul %134, %19, %cst_51 {dimension_numbers = #tpu.dot_dimension_numbers<[1], [0], [0], [1], [0, 0, 1, 1], [], []>} : vector<8x128xf32>, vector<128x512xf32>, vector<8x512xf32> -> vector<8x512xf32>
    %138 = arith.addf %136, %137 : vector<8x512xf32>
    %139 = vector.extract_strided_slice %138 {offsets = [0, 0], sizes = [8, 128], strides = [1, 1]} : vector<8x512xf32> to vector<8x128xf32>
    %140 = arith.negf %139 : vector<8x128xf32>
    %141 = math.exp %140 : vector<8x128xf32>
    %cst_52 = arith.constant 1.000000e+00 : f32
    %142 = vector.broadcast %cst_52 : f32 to vector<8x128xf32>
    %143 = arith.addf %142, %141 : vector<8x128xf32>
    %144 = arith.divf %142, %143 : vector<8x128xf32>
    %145 = vector.extract_strided_slice %138 {offsets = [0, 128], sizes = [8, 128], strides = [1, 1]} : vector<8x512xf32> to vector<8x128xf32>
    %146 = arith.negf %145 : vector<8x128xf32>
    %147 = math.exp %146 : vector<8x128xf32>
    %cst_53 = arith.constant 1.000000e+00 : f32
    %148 = vector.broadcast %cst_53 : f32 to vector<8x128xf32>
    %149 = arith.addf %148, %147 : vector<8x128xf32>
    %150 = arith.divf %148, %149 : vector<8x128xf32>
    %151 = vector.extract_strided_slice %138 {offsets = [0, 256], sizes = [8, 128], strides = [1, 1]} : vector<8x512xf32> to vector<8x128xf32>
    %152 = math.tanh %151 : vector<8x128xf32>
    %153 = vector.extract_strided_slice %138 {offsets = [0, 384], sizes = [8, 128], strides = [1, 1]} : vector<8x512xf32> to vector<8x128xf32>
    %154 = arith.negf %153 : vector<8x128xf32>
    %155 = math.exp %154 : vector<8x128xf32>
    %cst_54 = arith.constant 1.000000e+00 : f32
    %156 = vector.broadcast %cst_54 : f32 to vector<8x128xf32>
    %157 = arith.addf %156, %155 : vector<8x128xf32>
    %158 = arith.divf %156, %157 : vector<8x128xf32>
    %159 = arith.mulf %150, %132 : vector<8x128xf32>
    %160 = arith.mulf %144, %152 : vector<8x128xf32>
    %161 = arith.addf %159, %160 : vector<8x128xf32>
    %162 = math.tanh %161 : vector<8x128xf32>
    %163 = arith.mulf %158, %162 : vector<8x128xf32>
    %c32_55 = arith.constant 32 : index
    %c0_56 = arith.constant 0 : index
    %164 = vector.load %arg13[%c32_55, %c0_56] : memref<64x128xf32, #tpu.memory_space<vmem>>, vector<8x128xf32>
    tpu.vector_store %arg13[%c32_55, %c0_56], %163 {strides = array<i32>} : memref<64x128xf32, #tpu.memory_space<vmem>>, vector<8x128xf32>,
    %c40 = arith.constant 40 : index
    %c0_57 = arith.constant 0 : index
    %165 = vector.load %arg12[%c40, %c0_57] : memref<64x512xf32, #tpu.memory_space<vmem>>, vector<8x512xf32>
    %cst_58 = arith.constant dense<0.000000e+00> : vector<8x512xf32>
    %166 = tpu.matmul %163, %19, %cst_58 {dimension_numbers = #tpu.dot_dimension_numbers<[1], [0], [0], [1], [0, 0, 1, 1], [], []>} : vector<8x128xf32>, vector<128x512xf32>, vector<8x512xf32> -> vector<8x512xf32>
    %167 = arith.addf %165, %166 : vector<8x512xf32>
    %168 = vector.extract_strided_slice %167 {offsets = [0, 0], sizes = [8, 128], strides = [1, 1]} : vector<8x512xf32> to vector<8x128xf32>
    %169 = arith.negf %168 : vector<8x128xf32>
    %170 = math.exp %169 : vector<8x128xf32>
    %cst_59 = arith.constant 1.000000e+00 : f32
    %171 = vector.broadcast %cst_59 : f32 to vector<8x128xf32>
    %172 = arith.addf %171, %170 : vector<8x128xf32>
    %173 = arith.divf %171, %172 : vector<8x128xf32>
    %174 = vector.extract_strided_slice %167 {offsets = [0, 128], sizes = [8, 128], strides = [1, 1]} : vector<8x512xf32> to vector<8x128xf32>
    %175 = arith.negf %174 : vector<8x128xf32>
    %176 = math.exp %175 : vector<8x128xf32>
    %cst_60 = arith.constant 1.000000e+00 : f32
    %177 = vector.broadcast %cst_60 : f32 to vector<8x128xf32>
    %178 = arith.addf %177, %176 : vector<8x128xf32>
    %179 = arith.divf %177, %178 : vector<8x128xf32>
    %180 = vector.extract_strided_slice %167 {offsets = [0, 256], sizes = [8, 128], strides = [1, 1]} : vector<8x512xf32> to vector<8x128xf32>
    %181 = math.tanh %180 : vector<8x128xf32>
    %182 = vector.extract_strided_slice %167 {offsets = [0, 384], sizes = [8, 128], strides = [1, 1]} : vector<8x512xf32> to vector<8x128xf32>
    %183 = arith.negf %182 : vector<8x128xf32>
    %184 = math.exp %183 : vector<8x128xf32>
    %cst_61 = arith.constant 1.000000e+00 : f32
    %185 = vector.broadcast %cst_61 : f32 to vector<8x128xf32>
    %186 = arith.addf %185, %184 : vector<8x128xf32>
    %187 = arith.divf %185, %186 : vector<8x128xf32>
    %188 = arith.mulf %179, %161 : vector<8x128xf32>
    %189 = arith.mulf %173, %181 : vector<8x128xf32>
    %190 = arith.addf %188, %189 : vector<8x128xf32>
    %191 = math.tanh %190 : vector<8x128xf32>
    %192 = arith.mulf %187, %191 : vector<8x128xf32>
    %c40_62 = arith.constant 40 : index
    %c0_63 = arith.constant 0 : index
    %193 = vector.load %arg13[%c40_62, %c0_63] : memref<64x128xf32, #tpu.memory_space<vmem>>, vector<8x128xf32>
    tpu.vector_store %arg13[%c40_62, %c0_63], %192 {strides = array<i32>} : memref<64x128xf32, #tpu.memory_space<vmem>>, vector<8x128xf32>,
    %c48 = arith.constant 48 : index
    %c0_64 = arith.constant 0 : index
    %194 = vector.load %arg12[%c48, %c0_64] : memref<64x512xf32, #tpu.memory_space<vmem>>, vector<8x512xf32>
    %cst_65 = arith.constant dense<0.000000e+00> : vector<8x512xf32>
    %195 = tpu.matmul %192, %19, %cst_65 {dimension_numbers = #tpu.dot_dimension_numbers<[1], [0], [0], [1], [0, 0, 1, 1], [], []>} : vector<8x128xf32>, vector<128x512xf32>, vector<8x512xf32> -> vector<8x512xf32>
    %196 = arith.addf %194, %195 : vector<8x512xf32>
    %197 = vector.extract_strided_slice %196 {offsets = [0, 0], sizes = [8, 128], strides = [1, 1]} : vector<8x512xf32> to vector<8x128xf32>
    %198 = arith.negf %197 : vector<8x128xf32>
    %199 = math.exp %198 : vector<8x128xf32>
    %cst_66 = arith.constant 1.000000e+00 : f32
    %200 = vector.broadcast %cst_66 : f32 to vector<8x128xf32>
    %201 = arith.addf %200, %199 : vector<8x128xf32>
    %202 = arith.divf %200, %201 : vector<8x128xf32>
    %203 = vector.extract_strided_slice %196 {offsets = [0, 128], sizes = [8, 128], strides = [1, 1]} : vector<8x512xf32> to vector<8x128xf32>
    %204 = arith.negf %203 : vector<8x128xf32>
    %205 = math.exp %204 : vector<8x128xf32>
    %cst_67 = arith.constant 1.000000e+00 : f32
    %206 = vector.broadcast %cst_67 : f32 to vector<8x128xf32>
    %207 = arith.addf %206, %205 : vector<8x128xf32>
    %208 = arith.divf %206, %207 : vector<8x128xf32>
    %209 = vector.extract_strided_slice %196 {offsets = [0, 256], sizes = [8, 128], strides = [1, 1]} : vector<8x512xf32> to vector<8x128xf32>
    %210 = math.tanh %209 : vector<8x128xf32>
    %211 = vector.extract_strided_slice %196 {offsets = [0, 384], sizes = [8, 128], strides = [1, 1]} : vector<8x512xf32> to vector<8x128xf32>
    %212 = arith.negf %211 : vector<8x128xf32>
    %213 = math.exp %212 : vector<8x128xf32>
    %cst_68 = arith.constant 1.000000e+00 : f32
    %214 = vector.broadcast %cst_68 : f32 to vector<8x128xf32>
    %215 = arith.addf %214, %213 : vector<8x128xf32>
    %216 = arith.divf %214, %215 : vector<8x128xf32>
    %217 = arith.mulf %208, %190 : vector<8x128xf32>
    %218 = arith.mulf %202, %210 : vector<8x128xf32>
    %219 = arith.addf %217, %218 : vector<8x128xf32>
    %220 = math.tanh %219 : vector<8x128xf32>
    %221 = arith.mulf %216, %220 : vector<8x128xf32>
    %c48_69 = arith.constant 48 : index
    %c0_70 = arith.constant 0 : index
    %222 = vector.load %arg13[%c48_69, %c0_70] : memref<64x128xf32, #tpu.memory_space<vmem>>, vector<8x128xf32>
    tpu.vector_store %arg13[%c48_69, %c0_70], %221 {strides = array<i32>} : memref<64x128xf32, #tpu.memory_space<vmem>>, vector<8x128xf32>,
    %c56 = arith.constant 56 : index
    %c0_71 = arith.constant 0 : index
    %223 = vector.load %arg12[%c56, %c0_71] : memref<64x512xf32, #tpu.memory_space<vmem>>, vector<8x512xf32>
    %cst_72 = arith.constant dense<0.000000e+00> : vector<8x512xf32>
    %224 = tpu.matmul %221, %19, %cst_72 {dimension_numbers = #tpu.dot_dimension_numbers<[1], [0], [0], [1], [0, 0, 1, 1], [], []>} : vector<8x128xf32>, vector<128x512xf32>, vector<8x512xf32> -> vector<8x512xf32>
    %225 = arith.addf %223, %224 : vector<8x512xf32>
    %226 = vector.extract_strided_slice %225 {offsets = [0, 0], sizes = [8, 128], strides = [1, 1]} : vector<8x512xf32> to vector<8x128xf32>
    %227 = arith.negf %226 : vector<8x128xf32>
    %228 = math.exp %227 : vector<8x128xf32>
    %cst_73 = arith.constant 1.000000e+00 : f32
    %229 = vector.broadcast %cst_73 : f32 to vector<8x128xf32>
    %230 = arith.addf %229, %228 : vector<8x128xf32>
    %231 = arith.divf %229, %230 : vector<8x128xf32>
    %232 = vector.extract_strided_slice %225 {offsets = [0, 128], sizes = [8, 128], strides = [1, 1]} : vector<8x512xf32> to vector<8x128xf32>
    %233 = arith.negf %232 : vector<8x128xf32>
    %234 = math.exp %233 : vector<8x128xf32>
    %cst_74 = arith.constant 1.000000e+00 : f32
    %235 = vector.broadcast %cst_74 : f32 to vector<8x128xf32>
    %236 = arith.addf %235, %234 : vector<8x128xf32>
    %237 = arith.divf %235, %236 : vector<8x128xf32>
    %238 = vector.extract_strided_slice %225 {offsets = [0, 256], sizes = [8, 128], strides = [1, 1]} : vector<8x512xf32> to vector<8x128xf32>
    %239 = math.tanh %238 : vector<8x128xf32>
    %240 = vector.extract_strided_slice %225 {offsets = [0, 384], sizes = [8, 128], strides = [1, 1]} : vector<8x512xf32> to vector<8x128xf32>
    %241 = arith.negf %240 : vector<8x128xf32>
    %242 = math.exp %241 : vector<8x128xf32>
    %cst_75 = arith.constant 1.000000e+00 : f32
    %243 = vector.broadcast %cst_75 : f32 to vector<8x128xf32>
    %244 = arith.addf %243, %242 : vector<8x128xf32>
    %245 = arith.divf %243, %244 : vector<8x128xf32>
    %246 = arith.mulf %237, %219 : vector<8x128xf32>
    %247 = arith.mulf %231, %239 : vector<8x128xf32>
    %248 = arith.addf %246, %247 : vector<8x128xf32>
    %249 = math.tanh %248 : vector<8x128xf32>
    %250 = arith.mulf %245, %249 : vector<8x128xf32>
    %c56_76 = arith.constant 56 : index
    %c0_77 = arith.constant 0 : index
    %251 = vector.load %arg13[%c56_76, %c0_77] : memref<64x128xf32, #tpu.memory_space<vmem>>, vector<8x128xf32>
    tpu.vector_store %arg13[%c56_76, %c0_77], %250 {strides = array<i32>} : memref<64x128xf32, #tpu.memory_space<vmem>>, vector<8x128xf32>,
    %c0_78 = arith.constant 0 : index
    %c0_79 = arith.constant 0 : index
    %252 = vector.load %arg13[%c0_78, %c0_79] : memref<64x128xf32, #tpu.memory_space<vmem>>, vector<64x128xf32>
    %c0_80 = arith.constant 0 : index
    %c0_81 = arith.constant 0 : index
    %253 = vector.load %arg8[%c0_80, %c0_81] : memref<128x512xf32, #tpu.memory_space<vmem>>, vector<128x512xf32>
    %cst_82 = arith.constant dense<0.000000e+00> : vector<64x512xf32>
    %254 = tpu.matmul %252, %253, %cst_82 {dimension_numbers = #tpu.dot_dimension_numbers<[1], [0], [0], [1], [0, 0, 1, 1], [], []>} : vector<64x128xf32>, vector<128x512xf32>, vector<64x512xf32> -> vector<64x512xf32>
    %255 = tpu.concatenate %10, %10, %10, %10, %10, %10, %10, %10 in 0 : vector<8x512xf32>, vector<8x512xf32>, vector<8x512xf32>, vector<8x512xf32>, vector<8x512xf32>, vector<8x512xf32>, vector<8x512xf32>, vector<8x512xf32> -> vector<64x512xf32>
    %256 = arith.addf %254, %255 : vector<64x512xf32>
    %c0_83 = arith.constant 0 : index
    %c0_84 = arith.constant 0 : index
    %257 = vector.load %arg12[%c0_83, %c0_84] : memref<64x512xf32, #tpu.memory_space<vmem>>, vector<64x512xf32>
    tpu.vector_store %arg12[%c0_83, %c0_84], %256 {strides = array<i32>} : memref<64x512xf32, #tpu.memory_space<vmem>>, vector<64x512xf32>,
    %c0_85 = arith.constant 0 : index
    %c0_86 = arith.constant 0 : index
    %258 = vector.load %arg9[%c0_85, %c0_86] : memref<128x512xf32, #tpu.memory_space<vmem>>, vector<128x512xf32>
    %c0_87 = arith.constant 0 : index
    %c0_88 = arith.constant 0 : index
    %259 = vector.load %arg12[%c0_87, %c0_88] : memref<64x512xf32, #tpu.memory_space<vmem>>, vector<8x512xf32>
    %cst_89 = arith.constant dense<0.000000e+00> : vector<8x512xf32>
    %260 = tpu.matmul %250, %258, %cst_89 {dimension_numbers = #tpu.dot_dimension_numbers<[1], [0], [0], [1], [0, 0, 1, 1], [], []>} : vector<8x128xf32>, vector<128x512xf32>, vector<8x512xf32> -> vector<8x512xf32>
    %261 = arith.addf %259, %260 : vector<8x512xf32>
    %262 = vector.extract_strided_slice %261 {offsets = [0, 0], sizes = [8, 128], strides = [1, 1]} : vector<8x512xf32> to vector<8x128xf32>
    %263 = arith.negf %262 : vector<8x128xf32>
    %264 = math.exp %263 : vector<8x128xf32>
    %cst_90 = arith.constant 1.000000e+00 : f32
    %265 = vector.broadcast %cst_90 : f32 to vector<8x128xf32>
    %266 = arith.addf %265, %264 : vector<8x128xf32>
    %267 = arith.divf %265, %266 : vector<8x128xf32>
    %268 = vector.extract_strided_slice %261 {offsets = [0, 128], sizes = [8, 128], strides = [1, 1]} : vector<8x512xf32> to vector<8x128xf32>
    %269 = arith.negf %268 : vector<8x128xf32>
    %270 = math.exp %269 : vector<8x128xf32>
    %cst_91 = arith.constant 1.000000e+00 : f32
    %271 = vector.broadcast %cst_91 : f32 to vector<8x128xf32>
    %272 = arith.addf %271, %270 : vector<8x128xf32>
    %273 = arith.divf %271, %272 : vector<8x128xf32>
    %274 = vector.extract_strided_slice %261 {offsets = [0, 256], sizes = [8, 128], strides = [1, 1]} : vector<8x512xf32> to vector<8x128xf32>
    %275 = math.tanh %274 : vector<8x128xf32>
    %276 = vector.extract_strided_slice %261 {offsets = [0, 384], sizes = [8, 128], strides = [1, 1]} : vector<8x512xf32> to vector<8x128xf32>
    %277 = arith.negf %276 : vector<8x128xf32>
    %278 = math.exp %277 : vector<8x128xf32>
    %cst_92 = arith.constant 1.000000e+00 : f32
    %279 = vector.broadcast %cst_92 : f32 to vector<8x128xf32>
    %280 = arith.addf %279, %278 : vector<8x128xf32>
    %281 = arith.divf %279, %280 : vector<8x128xf32>
    %282 = arith.mulf %273, %248 : vector<8x128xf32>
    %283 = arith.mulf %267, %275 : vector<8x128xf32>
    %284 = arith.addf %282, %283 : vector<8x128xf32>
    %285 = math.tanh %284 : vector<8x128xf32>
    %286 = arith.mulf %281, %285 : vector<8x128xf32>
    %c0_93 = arith.constant 0 : index
    %c0_94 = arith.constant 0 : index
    %287 = vector.load %arg11[%c0_93, %c0_94] : memref<64x128xf32, #tpu.memory_space<vmem>>, vector<8x128xf32>
    tpu.vector_store %arg11[%c0_93, %c0_94], %286 {strides = array<i32>} : memref<64x128xf32, #tpu.memory_space<vmem>>, vector<8x128xf32>,
    %c8_95 = arith.constant 8 : index
    %c0_96 = arith.constant 0 : index
    %288 = vector.load %arg12[%c8_95, %c0_96] : memref<64x512xf32, #tpu.memory_space<vmem>>, vector<8x512xf32>
    %cst_97 = arith.constant dense<0.000000e+00> : vector<8x512xf32>
    %289 = tpu.matmul %286, %258, %cst_97 {dimension_numbers = #tpu.dot_dimension_numbers<[1], [0], [0], [1], [0, 0, 1, 1], [], []>} : vector<8x128xf32>, vector<128x512xf32>, vector<8x512xf32> -> vector<8x512xf32>
    %290 = arith.addf %288, %289 : vector<8x512xf32>
    %291 = vector.extract_strided_slice %290 {offsets = [0, 0], sizes = [8, 128], strides = [1, 1]} : vector<8x512xf32> to vector<8x128xf32>
    %292 = arith.negf %291 : vector<8x128xf32>
    %293 = math.exp %292 : vector<8x128xf32>
    %cst_98 = arith.constant 1.000000e+00 : f32
    %294 = vector.broadcast %cst_98 : f32 to vector<8x128xf32>
    %295 = arith.addf %294, %293 : vector<8x128xf32>
    %296 = arith.divf %294, %295 : vector<8x128xf32>
    %297 = vector.extract_strided_slice %290 {offsets = [0, 128], sizes = [8, 128], strides = [1, 1]} : vector<8x512xf32> to vector<8x128xf32>
    %298 = arith.negf %297 : vector<8x128xf32>
    %299 = math.exp %298 : vector<8x128xf32>
    %cst_99 = arith.constant 1.000000e+00 : f32
    %300 = vector.broadcast %cst_99 : f32 to vector<8x128xf32>
    %301 = arith.addf %300, %299 : vector<8x128xf32>
    %302 = arith.divf %300, %301 : vector<8x128xf32>
    %303 = vector.extract_strided_slice %290 {offsets = [0, 256], sizes = [8, 128], strides = [1, 1]} : vector<8x512xf32> to vector<8x128xf32>
    %304 = math.tanh %303 : vector<8x128xf32>
    %305 = vector.extract_strided_slice %290 {offsets = [0, 384], sizes = [8, 128], strides = [1, 1]} : vector<8x512xf32> to vector<8x128xf32>
    %306 = arith.negf %305 : vector<8x128xf32>
    %307 = math.exp %306 : vector<8x128xf32>
    %cst_100 = arith.constant 1.000000e+00 : f32
    %308 = vector.broadcast %cst_100 : f32 to vector<8x128xf32>
    %309 = arith.addf %308, %307 : vector<8x128xf32>
    %310 = arith.divf %308, %309 : vector<8x128xf32>
    %311 = arith.mulf %302, %284 : vector<8x128xf32>
    %312 = arith.mulf %296, %304 : vector<8x128xf32>
    %313 = arith.addf %311, %312 : vector<8x128xf32>
    %314 = math.tanh %313 : vector<8x128xf32>
    %315 = arith.mulf %310, %314 : vector<8x128xf32>
    %c8_101 = arith.constant 8 : index
    %c0_102 = arith.constant 0 : index
    %316 = vector.load %arg11[%c8_101, %c0_102] : memref<64x128xf32, #tpu.memory_space<vmem>>, vector<8x128xf32>
    tpu.vector_store %arg11[%c8_101, %c0_102], %315 {strides = array<i32>} : memref<64x128xf32, #tpu.memory_space<vmem>>, vector<8x128xf32>,
    %c16_103 = arith.constant 16 : index
    %c0_104 = arith.constant 0 : index
    %317 = vector.load %arg12[%c16_103, %c0_104] : memref<64x512xf32, #tpu.memory_space<vmem>>, vector<8x512xf32>
    %cst_105 = arith.constant dense<0.000000e+00> : vector<8x512xf32>
    %318 = tpu.matmul %315, %258, %cst_105 {dimension_numbers = #tpu.dot_dimension_numbers<[1], [0], [0], [1], [0, 0, 1, 1], [], []>} : vector<8x128xf32>, vector<128x512xf32>, vector<8x512xf32> -> vector<8x512xf32>
    %319 = arith.addf %317, %318 : vector<8x512xf32>
    %320 = vector.extract_strided_slice %319 {offsets = [0, 0], sizes = [8, 128], strides = [1, 1]} : vector<8x512xf32> to vector<8x128xf32>
    %321 = arith.negf %320 : vector<8x128xf32>
    %322 = math.exp %321 : vector<8x128xf32>
    %cst_106 = arith.constant 1.000000e+00 : f32
    %323 = vector.broadcast %cst_106 : f32 to vector<8x128xf32>
    %324 = arith.addf %323, %322 : vector<8x128xf32>
    %325 = arith.divf %323, %324 : vector<8x128xf32>
    %326 = vector.extract_strided_slice %319 {offsets = [0, 128], sizes = [8, 128], strides = [1, 1]} : vector<8x512xf32> to vector<8x128xf32>
    %327 = arith.negf %326 : vector<8x128xf32>
    %328 = math.exp %327 : vector<8x128xf32>
    %cst_107 = arith.constant 1.000000e+00 : f32
    %329 = vector.broadcast %cst_107 : f32 to vector<8x128xf32>
    %330 = arith.addf %329, %328 : vector<8x128xf32>
    %331 = arith.divf %329, %330 : vector<8x128xf32>
    %332 = vector.extract_strided_slice %319 {offsets = [0, 256], sizes = [8, 128], strides = [1, 1]} : vector<8x512xf32> to vector<8x128xf32>
    %333 = math.tanh %332 : vector<8x128xf32>
    %334 = vector.extract_strided_slice %319 {offsets = [0, 384], sizes = [8, 128], strides = [1, 1]} : vector<8x512xf32> to vector<8x128xf32>
    %335 = arith.negf %334 : vector<8x128xf32>
    %336 = math.exp %335 : vector<8x128xf32>
    %cst_108 = arith.constant 1.000000e+00 : f32
    %337 = vector.broadcast %cst_108 : f32 to vector<8x128xf32>
    %338 = arith.addf %337, %336 : vector<8x128xf32>
    %339 = arith.divf %337, %338 : vector<8x128xf32>
    %340 = arith.mulf %331, %313 : vector<8x128xf32>
    %341 = arith.mulf %325, %333 : vector<8x128xf32>
    %342 = arith.addf %340, %341 : vector<8x128xf32>
    %343 = math.tanh %342 : vector<8x128xf32>
    %344 = arith.mulf %339, %343 : vector<8x128xf32>
    %c16_109 = arith.constant 16 : index
    %c0_110 = arith.constant 0 : index
    %345 = vector.load %arg11[%c16_109, %c0_110] : memref<64x128xf32, #tpu.memory_space<vmem>>, vector<8x128xf32>
    tpu.vector_store %arg11[%c16_109, %c0_110], %344 {strides = array<i32>} : memref<64x128xf32, #tpu.memory_space<vmem>>, vector<8x128xf32>,
    %c24_111 = arith.constant 24 : index
    %c0_112 = arith.constant 0 : index
    %346 = vector.load %arg12[%c24_111, %c0_112] : memref<64x512xf32, #tpu.memory_space<vmem>>, vector<8x512xf32>
    %cst_113 = arith.constant dense<0.000000e+00> : vector<8x512xf32>
    %347 = tpu.matmul %344, %258, %cst_113 {dimension_numbers = #tpu.dot_dimension_numbers<[1], [0], [0], [1], [0, 0, 1, 1], [], []>} : vector<8x128xf32>, vector<128x512xf32>, vector<8x512xf32> -> vector<8x512xf32>
    %348 = arith.addf %346, %347 : vector<8x512xf32>
    %349 = vector.extract_strided_slice %348 {offsets = [0, 0], sizes = [8, 128], strides = [1, 1]} : vector<8x512xf32> to vector<8x128xf32>
    %350 = arith.negf %349 : vector<8x128xf32>
    %351 = math.exp %350 : vector<8x128xf32>
    %cst_114 = arith.constant 1.000000e+00 : f32
    %352 = vector.broadcast %cst_114 : f32 to vector<8x128xf32>
    %353 = arith.addf %352, %351 : vector<8x128xf32>
    %354 = arith.divf %352, %353 : vector<8x128xf32>
    %355 = vector.extract_strided_slice %348 {offsets = [0, 128], sizes = [8, 128], strides = [1, 1]} : vector<8x512xf32> to vector<8x128xf32>
    %356 = arith.negf %355 : vector<8x128xf32>
    %357 = math.exp %356 : vector<8x128xf32>
    %cst_115 = arith.constant 1.000000e+00 : f32
    %358 = vector.broadcast %cst_115 : f32 to vector<8x128xf32>
    %359 = arith.addf %358, %357 : vector<8x128xf32>
    %360 = arith.divf %358, %359 : vector<8x128xf32>
    %361 = vector.extract_strided_slice %348 {offsets = [0, 256], sizes = [8, 128], strides = [1, 1]} : vector<8x512xf32> to vector<8x128xf32>
    %362 = math.tanh %361 : vector<8x128xf32>
    %363 = vector.extract_strided_slice %348 {offsets = [0, 384], sizes = [8, 128], strides = [1, 1]} : vector<8x512xf32> to vector<8x128xf32>
    %364 = arith.negf %363 : vector<8x128xf32>
    %365 = math.exp %364 : vector<8x128xf32>
    %cst_116 = arith.constant 1.000000e+00 : f32
    %366 = vector.broadcast %cst_116 : f32 to vector<8x128xf32>
    %367 = arith.addf %366, %365 : vector<8x128xf32>
    %368 = arith.divf %366, %367 : vector<8x128xf32>
    %369 = arith.mulf %360, %342 : vector<8x128xf32>
    %370 = arith.mulf %354, %362 : vector<8x128xf32>
    %371 = arith.addf %369, %370 : vector<8x128xf32>
    %372 = math.tanh %371 : vector<8x128xf32>
    %373 = arith.mulf %368, %372 : vector<8x128xf32>
    %c24_117 = arith.constant 24 : index
    %c0_118 = arith.constant 0 : index
    %374 = vector.load %arg11[%c24_117, %c0_118] : memref<64x128xf32, #tpu.memory_space<vmem>>, vector<8x128xf32>
    tpu.vector_store %arg11[%c24_117, %c0_118], %373 {strides = array<i32>} : memref<64x128xf32, #tpu.memory_space<vmem>>, vector<8x128xf32>,
    %c32_119 = arith.constant 32 : index
    %c0_120 = arith.constant 0 : index
    %375 = vector.load %arg12[%c32_119, %c0_120] : memref<64x512xf32, #tpu.memory_space<vmem>>, vector<8x512xf32>
    %cst_121 = arith.constant dense<0.000000e+00> : vector<8x512xf32>
    %376 = tpu.matmul %373, %258, %cst_121 {dimension_numbers = #tpu.dot_dimension_numbers<[1], [0], [0], [1], [0, 0, 1, 1], [], []>} : vector<8x128xf32>, vector<128x512xf32>, vector<8x512xf32> -> vector<8x512xf32>
    %377 = arith.addf %375, %376 : vector<8x512xf32>
    %378 = vector.extract_strided_slice %377 {offsets = [0, 0], sizes = [8, 128], strides = [1, 1]} : vector<8x512xf32> to vector<8x128xf32>
    %379 = arith.negf %378 : vector<8x128xf32>
    %380 = math.exp %379 : vector<8x128xf32>
    %cst_122 = arith.constant 1.000000e+00 : f32
    %381 = vector.broadcast %cst_122 : f32 to vector<8x128xf32>
    %382 = arith.addf %381, %380 : vector<8x128xf32>
    %383 = arith.divf %381, %382 : vector<8x128xf32>
    %384 = vector.extract_strided_slice %377 {offsets = [0, 128], sizes = [8, 128], strides = [1, 1]} : vector<8x512xf32> to vector<8x128xf32>
    %385 = arith.negf %384 : vector<8x128xf32>
    %386 = math.exp %385 : vector<8x128xf32>
    %cst_123 = arith.constant 1.000000e+00 : f32
    %387 = vector.broadcast %cst_123 : f32 to vector<8x128xf32>
    %388 = arith.addf %387, %386 : vector<8x128xf32>
    %389 = arith.divf %387, %388 : vector<8x128xf32>
    %390 = vector.extract_strided_slice %377 {offsets = [0, 256], sizes = [8, 128], strides = [1, 1]} : vector<8x512xf32> to vector<8x128xf32>
    %391 = math.tanh %390 : vector<8x128xf32>
    %392 = vector.extract_strided_slice %377 {offsets = [0, 384], sizes = [8, 128], strides = [1, 1]} : vector<8x512xf32> to vector<8x128xf32>
    %393 = arith.negf %392 : vector<8x128xf32>
    %394 = math.exp %393 : vector<8x128xf32>
    %cst_124 = arith.constant 1.000000e+00 : f32
    %395 = vector.broadcast %cst_124 : f32 to vector<8x128xf32>
    %396 = arith.addf %395, %394 : vector<8x128xf32>
    %397 = arith.divf %395, %396 : vector<8x128xf32>
    %398 = arith.mulf %389, %371 : vector<8x128xf32>
    %399 = arith.mulf %383, %391 : vector<8x128xf32>
    %400 = arith.addf %398, %399 : vector<8x128xf32>
    %401 = math.tanh %400 : vector<8x128xf32>
    %402 = arith.mulf %397, %401 : vector<8x128xf32>
    %c32_125 = arith.constant 32 : index
    %c0_126 = arith.constant 0 : index
    %403 = vector.load %arg11[%c32_125, %c0_126] : memref<64x128xf32, #tpu.memory_space<vmem>>, vector<8x128xf32>
    tpu.vector_store %arg11[%c32_125, %c0_126], %402 {strides = array<i32>} : memref<64x128xf32, #tpu.memory_space<vmem>>, vector<8x128xf32>,
    %c40_127 = arith.constant 40 : index
    %c0_128 = arith.constant 0 : index
    %404 = vector.load %arg12[%c40_127, %c0_128] : memref<64x512xf32, #tpu.memory_space<vmem>>, vector<8x512xf32>
    %cst_129 = arith.constant dense<0.000000e+00> : vector<8x512xf32>
    %405 = tpu.matmul %402, %258, %cst_129 {dimension_numbers = #tpu.dot_dimension_numbers<[1], [0], [0], [1], [0, 0, 1, 1], [], []>} : vector<8x128xf32>, vector<128x512xf32>, vector<8x512xf32> -> vector<8x512xf32>
    %406 = arith.addf %404, %405 : vector<8x512xf32>
    %407 = vector.extract_strided_slice %406 {offsets = [0, 0], sizes = [8, 128], strides = [1, 1]} : vector<8x512xf32> to vector<8x128xf32>
    %408 = arith.negf %407 : vector<8x128xf32>
    %409 = math.exp %408 : vector<8x128xf32>
    %cst_130 = arith.constant 1.000000e+00 : f32
    %410 = vector.broadcast %cst_130 : f32 to vector<8x128xf32>
    %411 = arith.addf %410, %409 : vector<8x128xf32>
    %412 = arith.divf %410, %411 : vector<8x128xf32>
    %413 = vector.extract_strided_slice %406 {offsets = [0, 128], sizes = [8, 128], strides = [1, 1]} : vector<8x512xf32> to vector<8x128xf32>
    %414 = arith.negf %413 : vector<8x128xf32>
    %415 = math.exp %414 : vector<8x128xf32>
    %cst_131 = arith.constant 1.000000e+00 : f32
    %416 = vector.broadcast %cst_131 : f32 to vector<8x128xf32>
    %417 = arith.addf %416, %415 : vector<8x128xf32>
    %418 = arith.divf %416, %417 : vector<8x128xf32>
    %419 = vector.extract_strided_slice %406 {offsets = [0, 256], sizes = [8, 128], strides = [1, 1]} : vector<8x512xf32> to vector<8x128xf32>
    %420 = math.tanh %419 : vector<8x128xf32>
    %421 = vector.extract_strided_slice %406 {offsets = [0, 384], sizes = [8, 128], strides = [1, 1]} : vector<8x512xf32> to vector<8x128xf32>
    %422 = arith.negf %421 : vector<8x128xf32>
    %423 = math.exp %422 : vector<8x128xf32>
    %cst_132 = arith.constant 1.000000e+00 : f32
    %424 = vector.broadcast %cst_132 : f32 to vector<8x128xf32>
    %425 = arith.addf %424, %423 : vector<8x128xf32>
    %426 = arith.divf %424, %425 : vector<8x128xf32>
    %427 = arith.mulf %418, %400 : vector<8x128xf32>
    %428 = arith.mulf %412, %420 : vector<8x128xf32>
    %429 = arith.addf %427, %428 : vector<8x128xf32>
    %430 = math.tanh %429 : vector<8x128xf32>
    %431 = arith.mulf %426, %430 : vector<8x128xf32>
    %c40_133 = arith.constant 40 : index
    %c0_134 = arith.constant 0 : index
    %432 = vector.load %arg11[%c40_133, %c0_134] : memref<64x128xf32, #tpu.memory_space<vmem>>, vector<8x128xf32>
    tpu.vector_store %arg11[%c40_133, %c0_134], %431 {strides = array<i32>} : memref<64x128xf32, #tpu.memory_space<vmem>>, vector<8x128xf32>,
    %c48_135 = arith.constant 48 : index
    %c0_136 = arith.constant 0 : index
    %433 = vector.load %arg12[%c48_135, %c0_136] : memref<64x512xf32, #tpu.memory_space<vmem>>, vector<8x512xf32>
    %cst_137 = arith.constant dense<0.000000e+00> : vector<8x512xf32>
    %434 = tpu.matmul %431, %258, %cst_137 {dimension_numbers = #tpu.dot_dimension_numbers<[1], [0], [0], [1], [0, 0, 1, 1], [], []>} : vector<8x128xf32>, vector<128x512xf32>, vector<8x512xf32> -> vector<8x512xf32>
    %435 = arith.addf %433, %434 : vector<8x512xf32>
    %436 = vector.extract_strided_slice %435 {offsets = [0, 0], sizes = [8, 128], strides = [1, 1]} : vector<8x512xf32> to vector<8x128xf32>
    %437 = arith.negf %436 : vector<8x128xf32>
    %438 = math.exp %437 : vector<8x128xf32>
    %cst_138 = arith.constant 1.000000e+00 : f32
    %439 = vector.broadcast %cst_138 : f32 to vector<8x128xf32>
    %440 = arith.addf %439, %438 : vector<8x128xf32>
    %441 = arith.divf %439, %440 : vector<8x128xf32>
    %442 = vector.extract_strided_slice %435 {offsets = [0, 128], sizes = [8, 128], strides = [1, 1]} : vector<8x512xf32> to vector<8x128xf32>
    %443 = arith.negf %442 : vector<8x128xf32>
    %444 = math.exp %443 : vector<8x128xf32>
    %cst_139 = arith.constant 1.000000e+00 : f32
    %445 = vector.broadcast %cst_139 : f32 to vector<8x128xf32>
    %446 = arith.addf %445, %444 : vector<8x128xf32>
    %447 = arith.divf %445, %446 : vector<8x128xf32>
    %448 = vector.extract_strided_slice %435 {offsets = [0, 256], sizes = [8, 128], strides = [1, 1]} : vector<8x512xf32> to vector<8x128xf32>
    %449 = math.tanh %448 : vector<8x128xf32>
    %450 = vector.extract_strided_slice %435 {offsets = [0, 384], sizes = [8, 128], strides = [1, 1]} : vector<8x512xf32> to vector<8x128xf32>
    %451 = arith.negf %450 : vector<8x128xf32>
    %452 = math.exp %451 : vector<8x128xf32>
    %cst_140 = arith.constant 1.000000e+00 : f32
    %453 = vector.broadcast %cst_140 : f32 to vector<8x128xf32>
    %454 = arith.addf %453, %452 : vector<8x128xf32>
    %455 = arith.divf %453, %454 : vector<8x128xf32>
    %456 = arith.mulf %447, %429 : vector<8x128xf32>
    %457 = arith.mulf %441, %449 : vector<8x128xf32>
    %458 = arith.addf %456, %457 : vector<8x128xf32>
    %459 = math.tanh %458 : vector<8x128xf32>
    %460 = arith.mulf %455, %459 : vector<8x128xf32>
    %c48_141 = arith.constant 48 : index
    %c0_142 = arith.constant 0 : index
    %461 = vector.load %arg11[%c48_141, %c0_142] : memref<64x128xf32, #tpu.memory_space<vmem>>, vector<8x128xf32>
    tpu.vector_store %arg11[%c48_141, %c0_142], %460 {strides = array<i32>} : memref<64x128xf32, #tpu.memory_space<vmem>>, vector<8x128xf32>,
    %c56_143 = arith.constant 56 : index
    %c0_144 = arith.constant 0 : index
    %462 = vector.load %arg12[%c56_143, %c0_144] : memref<64x512xf32, #tpu.memory_space<vmem>>, vector<8x512xf32>
    %cst_145 = arith.constant dense<0.000000e+00> : vector<8x512xf32>
    %463 = tpu.matmul %460, %258, %cst_145 {dimension_numbers = #tpu.dot_dimension_numbers<[1], [0], [0], [1], [0, 0, 1, 1], [], []>} : vector<8x128xf32>, vector<128x512xf32>, vector<8x512xf32> -> vector<8x512xf32>
    %464 = arith.addf %462, %463 : vector<8x512xf32>
    %465 = vector.extract_strided_slice %464 {offsets = [0, 0], sizes = [8, 128], strides = [1, 1]} : vector<8x512xf32> to vector<8x128xf32>
    %466 = arith.negf %465 : vector<8x128xf32>
    %467 = math.exp %466 : vector<8x128xf32>
    %cst_146 = arith.constant 1.000000e+00 : f32
    %468 = vector.broadcast %cst_146 : f32 to vector<8x128xf32>
    %469 = arith.addf %468, %467 : vector<8x128xf32>
    %470 = arith.divf %468, %469 : vector<8x128xf32>
    %471 = vector.extract_strided_slice %464 {offsets = [0, 128], sizes = [8, 128], strides = [1, 1]} : vector<8x512xf32> to vector<8x128xf32>
    %472 = arith.negf %471 : vector<8x128xf32>
    %473 = math.exp %472 : vector<8x128xf32>
    %cst_147 = arith.constant 1.000000e+00 : f32
    %474 = vector.broadcast %cst_147 : f32 to vector<8x128xf32>
    %475 = arith.addf %474, %473 : vector<8x128xf32>
    %476 = arith.divf %474, %475 : vector<8x128xf32>
    %477 = vector.extract_strided_slice %464 {offsets = [0, 256], sizes = [8, 128], strides = [1, 1]} : vector<8x512xf32> to vector<8x128xf32>
    %478 = math.tanh %477 : vector<8x128xf32>
    %479 = vector.extract_strided_slice %464 {offsets = [0, 384], sizes = [8, 128], strides = [1, 1]} : vector<8x512xf32> to vector<8x128xf32>
    %480 = arith.negf %479 : vector<8x128xf32>
    %481 = math.exp %480 : vector<8x128xf32>
    %cst_148 = arith.constant 1.000000e+00 : f32
    %482 = vector.broadcast %cst_148 : f32 to vector<8x128xf32>
    %483 = arith.addf %482, %481 : vector<8x128xf32>
    %484 = arith.divf %482, %483 : vector<8x128xf32>
    %485 = arith.mulf %476, %458 : vector<8x128xf32>
    %486 = arith.mulf %470, %478 : vector<8x128xf32>
    %487 = arith.addf %485, %486 : vector<8x128xf32>
    %488 = math.tanh %487 : vector<8x128xf32>
    %489 = arith.mulf %484, %488 : vector<8x128xf32>
    %c56_149 = arith.constant 56 : index
    %c0_150 = arith.constant 0 : index
    %490 = vector.load %arg11[%c56_149, %c0_150] : memref<64x128xf32, #tpu.memory_space<vmem>>, vector<8x128xf32>
    tpu.vector_store %arg11[%c56_149, %c0_150], %489 {strides = array<i32>} : memref<64x128xf32, #tpu.memory_space<vmem>>, vector<8x128xf32>,
    return
  }
  func.func @transform_0(%arg0: i32) -> (i32, i32) {
    %c0_i32 = arith.constant 0 : i32
    %c0_i32_0 = arith.constant 0 : i32
    %c0_i32_1 = arith.constant 0 : i32
    return %c0_i32, %c0_i32_0 : i32, i32
  }
  func.func @transform_1(%arg0: i32) -> (i32, i32, i32) {
    %c0_i32 = arith.constant 0 : i32
    %c0_i32_0 = arith.constant 0 : i32
    %c0_i32_1 = arith.constant 0 : i32
    %c0_i32_2 = arith.constant 0 : i32
    return %c0_i32, %c0_i32_0, %c0_i32_1 : i32, i32, i32
  }
  func.func @transform_2(%arg0: i32) -> (i32, i32) {
    %c0_i32 = arith.constant 0 : i32
    %c0_i32_0 = arith.constant 0 : i32
    %c0_i32_1 = arith.constant 0 : i32
    return %c0_i32, %c0_i32_0 : i32, i32
  }
  func.func @transform_3(%arg0: i32) -> (i32, i32) {
    %c0_i32 = arith.constant 0 : i32
    %c0_i32_0 = arith.constant 0 : i32
    %c0_i32_1 = arith.constant 0 : i32
    return %c0_i32, %c0_i32_0 : i32, i32
  }
  func.func @transform_4(%arg0: i32) -> (i32, i32) {
    %c0_i32 = arith.constant 0 : i32
    %c0_i32_0 = arith.constant 0 : i32
    %c0_i32_1 = arith.constant 0 : i32
    return %c0_i32, %c0_i32_0 : i32, i32
  }
  func.func @transform_5(%arg0: i32) -> (i32, i32) {
    %c0_i32 = arith.constant 0 : i32
    %c0_i32_0 = arith.constant 0 : i32
    %c0_i32_1 = arith.constant 0 : i32
    return %c0_i32, %c0_i32_0 : i32, i32
  }
  func.func @transform_6(%arg0: i32) -> (i32, i32) {
    %c0_i32 = arith.constant 0 : i32
    %c0_i32_0 = arith.constant 0 : i32
    %c0_i32_1 = arith.constant 0 : i32
    return %c0_i32, %c0_i32_0 : i32, i32
  }
  func.func @transform_7(%arg0: i32) -> (i32, i32) {
    %c0_i32 = arith.constant 0 : i32
    %c0_i32_0 = arith.constant 0 : i32
    %c0_i32_1 = arith.constant 0 : i32
    return %c0_i32, %c0_i32_0 : i32, i32
  }
  func.func @transform_8(%arg0: i32) -> (i32, i32) {
    %c0_i32 = arith.constant 0 : i32
    %c0_i32_0 = arith.constant 0 : i32
    %c0_i32_1 = arith.constant 0 : i32
    return %c0_i32, %c0_i32_0 : i32, i32
  }
  func.func @transform_9(%arg0: i32) -> (i32, i32) {
    %c0_i32 = arith.constant 0 : i32
    %c0_i32_0 = arith.constant 0 : i32
    %c0_i32_1 = arith.constant 0 : i32
    return %c0_i32, %c0_i32_0 : i32, i32
  }
  func.func @transform_10(%arg0: i32) -> (i32, i32) {
    %c0_i32 = arith.constant 0 : i32
    %c0_i32_0 = arith.constant 0 : i32
    %c0_i32_1 = arith.constant 0 : i32
    return %c0_i32, %c0_i32_0 : i32, i32
  }
}

</mosaic_0001>

<bundles_post_ra>
// kernel: image_captioner_forward.5
= control target key start
LH: loop header
LB: loop body
LE: loop exit
PB: predicated region body
PF: predicated region fallthrough
CT: control target
= control target key end

     0   :  { %8 = vsyncpa [#allocation3], 0  ;;  %s523_s0 = inlined_call_operand.hbm [shape: f32[64,128], index: 0, kind: input, shape index: {}]   ;;  %s524_s1 = inlined_call_operand.hbm [shape: f32[128,128], index: 1, kind: input, shape index: {}]   ;;  %s525_s2 = inlined_call_operand.hbm [shape: f32[1,128], index: 2, kind: input, shape index: {}]   ;;  %s526_s3 = inlined_call_operand.hbm [shape: f32[64,128], index: 3, kind: output, shape index: {}]  }
   0x1   :  { %9 = vsyncpa [#allocation6], 0 }
   0x2   :  { %10 = vsyncpa [#allocation4], 0  ;;  %s433_s12 = smov [#allocation5]   ;;  %s434_s14 = smov [#allocation2]  }
   0x3   :  { %s28_s13 = sshll.u32 %s433_s12, 4  ;;  %s16_s15 = sshll.u32 %s434_s14, 4  ;;  %s29_s13 = int_to_ptr.vmem [resolvable:$true] %s28_s13  ;;  %s459_s15 = int_to_ptr.vmem [resolvable:$true] %s16_s15 }
   0x4   :  { %s339_s18 = scalar_lea.hbm %s524_s1, 2048 }
   0x5   :  { %p340_p0 = scmp.ne.s32.totalorder %s524_s1, %s339_s18  ;;  %p343_p1 = scmp.lt.u32.totalorder %s339_s18, %s524_s1 }
   0x7   :  { %p345_p2 = pnand %p343_p1, %p340_p0 }
   0x9   :  { %348 = shalt.err (!%p345_p2)
}
   0xa   :  { %s349_s23 = scalar_lea.vmem %s29_s13, 2048  ;;  %p354_p4 = scmp.lt.s32.totalorder %s29_s13, %s29_s13 }
   0xb   :  { %p350_p3 = scmp.ne.s32.totalorder %s29_s13, %s349_s23  ;;  %p355_p5 = scmp.lt.s32.totalorder %s349_s23, %s349_s23 }
   0xd   :  { %p356_p6 = por %p355_p5, %p354_p4 }
   0xf   :  { %p357_p7 = pnand %p356_p6, %p350_p3 }
  0x11   :  { %360 = shalt.err (!%p357_p7)
}
  0x12   :  { %s435_s24 = smov 128   ;;  %s436_s25 = smov 8  }
  0x13   :  { %34 = dma.hbm_to_vmem [thread:$0]  %s524_s1, 2048, %s29_s13, [#allocation6], %s435_s24, %s435_s24, %s436_s25  }
  0x14   :  { %s361_s30 = scalar_lea.hbm %s523_s0, 1024 }
  0x15   :  { %p362_p8 = scmp.ne.s32.totalorder %s523_s0, %s361_s30  ;;  %p365_p9 = scmp.lt.u32.totalorder %s361_s30, %s523_s0 }
  0x17   :  { %p367_p10 = pnand %p365_p9, %p362_p8 }
  0x19   :  { %370 = shalt.err (!%p367_p10)
}
  0x1a   :  { %s371_s8 = scalar_lea.vmem %s459_s15, 1024  ;;  %p376_p12 = scmp.lt.s32.totalorder %s459_s15, %s459_s15 }
  0x1b   :  { %p372_p11 = scmp.ne.s32.totalorder %s459_s15, %s371_s8  ;;  %p377_p13 = scmp.lt.s32.totalorder %s371_s8, %s371_s8 }
  0x1d   :  { %p378_p0 = por %p377_p13, %p376_p12 }
  0x1f   :  { %p379_p1 = pnand %p378_p0, %p372_p11 }
  0x21   :  { %382 = shalt.err (!%p379_p1)
}
  0x22   :  { %22 = dma.hbm_to_vmem [thread:$0]  %s523_s0, 1024, %s459_s15, [#allocation3], %s435_s24, %s435_s24, %s436_s25  }
  0x23   :  { %s437_s10 = smov [#allocation7]   ;;  %s383_s14 = scalar_lea.hbm %s525_s2, 16 }
  0x24   :  { %s41_s11 = sshll.u32 %s437_s10, 4  ;;  %p384_p2 = scmp.ne.s32.totalorder %s525_s2, %s383_s14  ;;  %s42_s11 = int_to_ptr.vmem [resolvable:$true] %s41_s11 }
  0x25   :  { %p387_p3 = scmp.lt.u32.totalorder %s383_s14, %s525_s2 }
  0x27   :  { %p389_p4 = pnand %p387_p3, %p384_p2 }
  0x29   :  { %392 = shalt.err (!%p389_p4)
}
  0x2a   :  { %s393_s20 = scalar_lea.vmem %s42_s11, 16  ;;  %s397_s0 = scalar_lea.vmem %s42_s11, 32 }
  0x2b   :  { %p394_p5 = scmp.ne.s32.totalorder %s42_s11, %s393_s20  ;;  %p398_p6 = scmp.lt.s32.totalorder %s42_s11, %s42_s11 }
  0x2c   :  { %p399_p7 = scmp.lt.s32.totalorder %s397_s0, %s393_s20 }
  0x2e   :  { %p400_p8 = por %p399_p7, %p398_p6 }
  0x30   :  { %p401_p9 = pnand %p400_p8, %p394_p5 }
  0x32   :  { %404 = shalt.err (!%p401_p9)
}
  0x33   :  { %44 = dma.hbm_to_vmem [thread:$0]  %s525_s2, 16, %s42_s11, [#allocation6]  }
  0x34   :  { %427 = dma.done.wait [#allocation3], 1024  }
  0x35   :  { %428 = vsyncadd [#allocation3], 4294966272 }
  0x36   :  { %429 = dma.done.wait [#allocation6], 2064  }
  0x37   :  { %430 = vsyncadd [#allocation6], 4294965232  ;;  %v62_v0 = vld [vmem:[#allocation5] sm:$0xff]  ;;  %v63_v1 = vld [vmem:[#allocation5 + $0x8] sm:$0xff]  ;;  %s438_s2 = smov [#allocation8]  }
  0x38   :  { %v64_v2 = vld [vmem:[#allocation5 + $0x10] sm:$0xff]  ;;  %v285_v3 = vpack.c.bf16 %v63_v1, %v62_v0  ;;  %v65_v4 = vld [vmem:[#allocation5 + $0x18] sm:$0xff]  ;;  %v66_v6 = vld [vmem:[#allocation5 + $0x20] sm:$0xff]  ;;  %s203_s22 = sshll.u32 %s438_s2, 4  ;;  %s204_s22 = int_to_ptr.vmem [resolvable:$true] %s203_s22 }
  0x39   :  { %v289_v5 = vpack.c.bf16 %v65_v4, %v64_v2  ;;  %v67_v7 = vld [vmem:[#allocation5 + $0x28] sm:$0xff]  ;;  %v54_v9 = vld [vmem:[#allocation2] sm:$0xff]  ;;  %v68_v11 = vld [vmem:[#allocation5 + $0x30] sm:$0xff]  ;;  %s405_s23 = scalar_lea.vmem %s204_s22, 1024  ;;  %p410_p11 = scmp.lt.s32.totalorder %s204_s22, %s204_s22 }
  0x3a   :  { %286 = vmatprep.subr.bf16.mxu0 %v285_v3  ;;  %317 = vmatprep.subr.bf16.mxu1 %v285_v3  ;;  %v293_v8 = vpack.c.bf16 %v67_v7, %v66_v6  ;;  %v58_v10 = vld [vmem:[#allocation2 + $0x20] sm:$0xff]  ;;  %v69_v12 = vld [vmem:[#allocation5 + $0x38] sm:$0xff]  ;;  %v71_v15 = vld [vmem:[#allocation5 + $0x48] sm:$0xff]  ;;  %p406_p10 = scmp.ne.s32.totalorder %s204_s22, %s405_s23  ;;  %p411_p12 = scmp.lt.s32.totalorder %s405_s23, %s405_s23 }
  0x3b   :  { %288 = vmatpush3.bf16.msra.mxu0 %v285_v3  ;;  %325 = vmatpush3.bf16.msra.mxu1 %v285_v3  ;;  %v297_v13 = vpack.c.bf16 %v69_v12, %v68_v11  ;;  %v70_v14 = vld [vmem:[#allocation5 + $0x40] sm:$0xff]  ;;  %v72_v17 = vld [vmem:[#allocation5 + $0x50] sm:$0xff]  ;;  %v73_v18 = vld [vmem:[#allocation5 + $0x58] sm:$0xff] }
  0x3c   :  { %290 = vmatprep.subr.bf16.mxu0 %v289_v5  ;;  %318 = vmatprep.subr.bf16.mxu1 %v289_v5  ;;  %v301_v16 = vpack.c.bf16 %v71_v15, %v70_v14  ;;  %v305_v19 = vpack.c.bf16 %v73_v18, %v72_v17  ;;  %v74_v20 = vld [vmem:[#allocation5 + $0x60] sm:$0xff]  ;;  %v75_v21 = vld [vmem:[#allocation5 + $0x68] sm:$0xff]  ;;  %v76_v23 = vld [vmem:[#allocation5 + $0x70] sm:$0xff]  ;;  %p412_p13 = por %p411_p12, %p410_p11 }
  0x3d   :  { %273 = vmatprep.mubr.f32.mxu0 %v54_v9  ;;  %279 = vmatprep.mubr.f32.mxu1 %v58_v10  ;;  %v309_v22 = vpack.c.bf16 %v75_v21, %v74_v20  ;;  %v77_v24 = vld [vmem:[#allocation5 + $0x78] sm:$0xff]  ;;  %v55_v26 = vld [vmem:[#allocation2 + $0x8] sm:$0xff]  ;;  %v56_v28 = vld [vmem:[#allocation2 + $0x10] sm:$0xff] }
  0x3e   :  { %v313_v25 = vpack.c.bf16 %v77_v24, %v76_v23  ;;  %v59_v27 = vld [vmem:[#allocation2 + $0x28] sm:$0xff]  ;;  %v60_v29 = vld [vmem:[#allocation2 + $0x30] sm:$0xff]  ;;  %v57_v30 = vld [vmem:[#allocation2 + $0x18] sm:$0xff]  ;;  %p413_p0 = pnand %p412_p13, %p406_p10 }
  0x3f   :  { %292 = vmatpush3.bf16.msra.mxu0 %v289_v5  ;;  %326 = vmatpush3.bf16.msra.mxu1 %v289_v5  ;;  %v61_v31 = vld [vmem:[#allocation2 + $0x38] sm:$0xff]  ;;  %v216_v32 = vld [vmem:[#allocation7] ss:$0 sm:$0xff] }
  0x40   :  { %294 = vmatprep.subr.bf16.mxu0 %v293_v8  ;;  %319 = vmatprep.subr.bf16.mxu1 %v293_v8 }
  0x43   :  { %296 = vmatpush3.bf16.msra.mxu0 %v293_v8  ;;  %327 = vmatpush3.bf16.msra.mxu1 %v293_v8 }
  0x44   :  { %298 = vmatprep.subr.bf16.mxu0 %v297_v13  ;;  %320 = vmatprep.subr.bf16.mxu1 %v297_v13 }
  0x47   :  { %300 = vmatpush3.bf16.msra.mxu0 %v297_v13  ;;  %328 = vmatpush3.bf16.msra.mxu1 %v297_v13 }
  0x48   :  { %302 = vmatprep.subr.bf16.mxu0 %v301_v16  ;;  %321 = vmatprep.subr.bf16.mxu1 %v301_v16 }
  0x4b   :  { %304 = vmatpush3.bf16.msra.mxu0 %v301_v16  ;;  %329 = vmatpush3.bf16.msra.mxu1 %v301_v16 }
  0x4c   :  { %306 = vmatprep.subr.bf16.mxu0 %v305_v19  ;;  %322 = vmatprep.subr.bf16.mxu1 %v305_v19 }
  0x4f   :  { %308 = vmatpush3.bf16.msra.mxu0 %v305_v19  ;;  %330 = vmatpush3.bf16.msra.mxu1 %v305_v19 }
  0x50   :  { %310 = vmatprep.subr.bf16.mxu0 %v309_v22  ;;  %323 = vmatprep.subr.bf16.mxu1 %v309_v22 }
  0x53   :  { %312 = vmatpush3.bf16.msra.mxu0 %v309_v22  ;;  %331 = vmatpush3.bf16.msra.mxu1 %v309_v22 }
  0x54   :  { %314 = vmatprep.subr.bf16.mxu0 %v313_v25  ;;  %324 = vmatprep.subr.bf16.mxu1 %v313_v25 }
  0x57   :  { %316 = vmatpush3.bf16.msra.mxu0 %v313_v25  ;;  %332 = vmatpush3.bf16.msra.mxu1 %v313_v25 }
  0x5a   :  { %274 = vmatmul.mubr.f32.vlgmr.msra.gmra.mrb[0].mxu0 %v55_v26  ;;  %280 = vmatmul.mubr.f32.vlgmr.msra.gmra.mrb[0].mxu1 %v59_v27 }
  0x5b   :  { %276 = vmatprep.mubr.f32.mxu0 %v56_v28  ;;  %282 = vmatprep.mubr.f32.mxu1 %v60_v29 }
  0x5e   :  { %277 = vmatmul.mubr.f32.gmra.mrb[2].mxu0 %v57_v30  ;;  %283 = vmatmul.mubr.f32.gmra.mrb[2].mxu1 %v61_v31 }
 0x12d   :  { %v275_v33 = vpop.f32.mrb[0].mxu0  ;;  %v281_v34 = vpop.f32.mrb[0].mxu1 }
 0x12e   :  { %v157_v35 = vadd.f32 %v275_v33, %v216_v32  ;;  %v177_v36 = vadd.f32 %v281_v34, %v216_v32  ;;  %v151_v37 = vpop.f32.mrb[1].mxu0  ;;  %v171_v38 = vpop.f32.mrb[1].mxu1 }
 0x12f   :  { %v152_v39 = vadd.f32 %v216_v32, %v151_v37  ;;  %v172_v40 = vadd.f32 %v216_v32, %v171_v38 }
 0x130   :  { %191 = vst [vmem:[#allocation8 + $0x8] sm:$0xff] %v157_v35  ;;  %195 = vst [vmem:[#allocation8 + $0x28] sm:$0xff] %v177_v36 }
 0x131   :  { %190 = vst [vmem:[#allocation8] sm:$0xff] %v152_v39  ;;  %194 = vst [vmem:[#allocation8 + $0x20] sm:$0xff] %v172_v40  ;;  %v278_v41 = vpop.f32.mrb[2].mxu0  ;;  %v284_v42 = vpop.f32.mrb[2].mxu1 }
 0x132   :  { %v167_v43 = vadd.f32 %v278_v41, %v216_v32  ;;  %v187_v44 = vadd.f32 %v284_v42, %v216_v32  ;;  %v161_v45 = vpop.f32.mrb[3].mxu0  ;;  %v181_v46 = vpop.f32.mrb[3].mxu1 }
 0x133   :  { %v162_v47 = vadd.f32 %v216_v32, %v161_v45  ;;  %v182_v48 = vadd.f32 %v216_v32, %v181_v46 }
 0x134   :  { %193 = vst [vmem:[#allocation8 + $0x18] sm:$0xff] %v167_v43  ;;  %197 = vst [vmem:[#allocation8 + $0x38] sm:$0xff] %v187_v44 }
 0x135   :  { %192 = vst [vmem:[#allocation8 + $0x10] sm:$0xff] %v162_v47  ;;  %196 = vst [vmem:[#allocation8 + $0x30] sm:$0xff] %v182_v48 }
 0x136   :  { %416 = shalt.err (!%p413_p0)
}
 0x137   :  { %s417_s28 = scalar_lea.hbm %s526_s3, 1024 }
 0x138   :  { %p418_p1 = scmp.ne.s32.totalorder %s526_s3, %s417_s28  ;;  %p421_p2 = scmp.lt.u32.totalorder %s417_s28, %s526_s3 }
 0x13a   :  { %p423_p3 = pnand %p421_p2, %p418_p1 }
 0x13c   :  { %426 = shalt.err (!%p423_p3)
}
 0x13d   :  { %209 = dma.vmem_to_hbm [thread:$0]  %s204_s22, 1024, %s526_s3, [#allocation4], %s435_s24, %s435_s24, %s436_s25  }
 0x13e   :  { %431 = dma.done.wait [#allocation4], 1024  }
 0x13f   :  { %432 = vsyncadd [#allocation4], 4294966272 }
 0x140   :  { %213 = vsyncpa [#allocation3], 1 }
 0x141   :  { %214 = vsyncpa [#allocation6], 1 }
 0x142   :  { %215 = vsyncpa [#allocation4], 1 }

// kernel: image_captioner_forward.3
= control target key start
LH: loop header
LB: loop body
LE: loop exit
PB: predicated region body
PF: predicated region fallthrough
CT: control target
= control target key end

     0   :  { %12 = vsyncpa [#allocation4], 0  ;;  %s1674_s0 = inlined_call_operand.hbm [shape: f32[8,1024], index: 0, kind: input, shape index: {}]   ;;  %s1675_s1 = inlined_call_operand.hbm [shape: f32[1024,256], index: 1, kind: input, shape index: {}]   ;;  %s1676_s2 = inlined_call_operand.hbm [shape: f32[1,256], index: 2, kind: input, shape index: {}]   ;;  %s1677_s3 = inlined_call_operand.hbm [shape: f32[256,128], index: 3, kind: input, shape index: {}]   ;;  %s1678_s4 = inlined_call_operand.hbm [shape: f32[1,128], index: 4, kind: input, shape index: {}]   ;;  %s1679_s5 = inlined_call_operand.hbm [shape: f32[128,128], index: 5, kind: input, shape index: {}]   ;;  %s1680_s6 = inlined_call_operand.hbm [shape: f32[1,128], index: 6, kind: input, shape index: {}]   ;;  %s1681_s7 = inlined_call_operand.hbm [shape: f32[8,128], index: 7, kind: output, shape index: {}]  }
   0x1   :  { %13 = vsyncpa [#allocation7], 0 }
   0x2   :  { %14 = vsyncpa [#allocation10], 0 }
   0x3   :  { %15 = vsyncpa [#allocation13], 0 }
   0x4   :  { %16 = vsyncpa [#allocation5], 0  ;;  %s1523_s24 = smov [#allocation6]   ;;  %s1337_s28 = scalar_lea.hbm %s1675_s1, 32768 }
   0x5   :  { %s32_s25 = sshll.u32 %s1523_s24, 4  ;;  %p1338_p0 = scmp.ne.s32.totalorder %s1675_s1, %s1337_s28  ;;  %s33_s25 = int_to_ptr.vmem [resolvable:$true] %s32_s25 }
   0x6   :  { %p1341_p1 = scmp.lt.u32.totalorder %s1337_s28, %s1675_s1 }
   0x8   :  { %p1343_p2 = pnand %p1341_p1, %p1338_p0 }
   0xa   :  { %1346 = shalt.err (!%p1343_p2)
}
   0xb   :  { %s1347_s10 = scalar_lea.vmem %s33_s25, 32768  ;;  %p1352_p4 = scmp.lt.s32.totalorder %s33_s25, %s33_s25 }
   0xc   :  { %p1348_p3 = scmp.ne.s32.totalorder %s33_s25, %s1347_s10  ;;  %p1353_p5 = scmp.lt.s32.totalorder %s1347_s10, %s1347_s10 }
   0xe   :  { %p1354_p6 = por %p1353_p5, %p1352_p4 }
  0x10   :  { %p1355_p7 = pnand %p1354_p6, %p1348_p3 }
  0x12   :  { %1358 = shalt.err (!%p1355_p7)
}
  0x13   :  { %s1524_s11 = smov 256   ;;  %s1525_s12 = smov 16  }
  0x14   :  { %38 = dma.hbm_to_vmem [thread:$0]  %s1675_s1, 32768, %s33_s25, [#allocation7], %s1524_s11, %s1524_s11, %s1525_s12  }
  0x15   :  { %s1526_s15 = smov [#allocation9]   ;;  %s1359_s19 = scalar_lea.hbm %s1677_s3, 4096 }
  0x16   :  { %s54_s16 = sshll.u32 %s1526_s15, 4  ;;  %p1360_p8 = scmp.ne.s32.totalorder %s1677_s3, %s1359_s19  ;;  %s55_s16 = int_to_ptr.vmem [resolvable:$true] %s54_s16 }
  0x17   :  { %p1363_p9 = scmp.lt.u32.totalorder %s1359_s19, %s1677_s3 }
  0x19   :  { %p1365_p10 = pnand %p1363_p9, %p1360_p8 }
  0x1b   :  { %1368 = shalt.err (!%p1365_p10)
}
  0x1c   :  { %s1369_s24 = scalar_lea.vmem %s55_s16, 4096  ;;  %p1374_p12 = scmp.lt.s32.totalorder %s55_s16, %s55_s16 }
  0x1d   :  { %p1370_p11 = scmp.ne.s32.totalorder %s55_s16, %s1369_s24  ;;  %p1375_p13 = scmp.lt.s32.totalorder %s1369_s24, %s1369_s24 }
  0x1f   :  { %p1376_p0 = por %p1375_p13, %p1374_p12 }
  0x21   :  { %p1377_p1 = pnand %p1376_p0, %p1370_p11 }
  0x23   :  { %1380 = shalt.err (!%p1377_p1)
}
  0x24   :  { %s1527_s1 = smov 128   ;;  %s1528_s25 = smov 8  }
  0x25   :  { %60 = dma.hbm_to_vmem [thread:$0]  %s1677_s3, 4096, %s55_s16, [#allocation10], %s1527_s1, %s1527_s1, %s1528_s25  }
  0x26   :  { %s1529_s28 = smov [#allocation12]   ;;  %s1530_s30 = smov [#allocation3]  }
  0x27   :  { %s76_s29 = sshll.u32 %s1529_s28, 4  ;;  %s23_s8 = sshll.u32 %s1530_s30, 4  ;;  %s77_s29 = int_to_ptr.vmem [resolvable:$true] %s76_s29  ;;  %s24_s8 = int_to_ptr.vmem [resolvable:$true] %s23_s8 }
  0x28   :  { %s1381_s11 = scalar_lea.hbm %s1679_s5, 2048 }
  0x29   :  { %p1382_p2 = scmp.ne.s32.totalorder %s1679_s5, %s1381_s11  ;;  %p1385_p3 = scmp.lt.u32.totalorder %s1381_s11, %s1679_s5 }
  0x2b   :  { %p1387_p4 = pnand %p1385_p3, %p1382_p2 }
  0x2d   :  { %1390 = shalt.err (!%p1387_p4)
}
  0x2e   :  { %s1391_s3 = scalar_lea.vmem %s77_s29, 2048  ;;  %p1396_p6 = scmp.lt.s32.totalorder %s77_s29, %s77_s29 }
  0x2f   :  { %p1392_p5 = scmp.ne.s32.totalorder %s77_s29, %s1391_s3  ;;  %p1397_p7 = scmp.lt.s32.totalorder %s1391_s3, %s1391_s3 }
  0x31   :  { %p1398_p8 = por %p1397_p7, %p1396_p6 }
  0x33   :  { %p1399_p9 = pnand %p1398_p8, %p1392_p5 }
  0x35   :  { %1402 = shalt.err (!%p1399_p9)
}
  0x36   :  { %82 = dma.hbm_to_vmem [thread:$0]  %s1679_s5, 2048, %s77_s29, [#allocation13], %s1527_s1, %s1527_s1, %s1528_s25  }
  0x37   :  { %s1403_s20 = scalar_lea.hbm %s1674_s0, 1024 }
  0x38   :  { %p1404_p10 = scmp.ne.s32.totalorder %s1674_s0, %s1403_s20  ;;  %p1407_p11 = scmp.lt.u32.totalorder %s1403_s20, %s1674_s0 }
  0x3a   :  { %p1409_p12 = pnand %p1407_p11, %p1404_p10 }
  0x3c   :  { %1412 = shalt.err (!%p1409_p12)
}
  0x3d   :  { %s1413_s26 = scalar_lea.vmem %s24_s8, 1024  ;;  %p1418_p0 = scmp.lt.s32.totalorder %s24_s8, %s24_s8 }
  0x3e   :  { %p1414_p13 = scmp.ne.s32.totalorder %s24_s8, %s1413_s26  ;;  %p1419_p1 = scmp.lt.s32.totalorder %s1413_s26, %s1413_s26 }
  0x40   :  { %p1420_p2 = por %p1419_p1, %p1418_p0 }
  0x42   :  { %p1421_p3 = pnand %p1420_p2, %p1414_p13 }
  0x44   :  { %1424 = shalt.err (!%p1421_p3)
}
  0x45   :  { %26 = dma.hbm_to_vmem [thread:$0]  %s1674_s0, 1024, %s24_s8, [#allocation4]  }
  0x46   :  { %s1531_s25 = smov [#allocation8]   ;;  %s1532_s28 = smov [#allocation11]  }
  0x47   :  { %s45_s27 = sshll.u32 %s1531_s25, 4  ;;  %s67_s29 = sshll.u32 %s1532_s28, 4  ;;  %s46_s27 = int_to_ptr.vmem [resolvable:$true] %s45_s27  ;;  %s68_s29 = int_to_ptr.vmem [resolvable:$true] %s67_s29 }
  0x48   :  { %s1425_s10 = scalar_lea.hbm %s1676_s2, 32 }
  0x49   :  { %p1426_p4 = scmp.ne.s32.totalorder %s1676_s2, %s1425_s10  ;;  %p1429_p5 = scmp.lt.u32.totalorder %s1425_s10, %s1676_s2 }
  0x4b   :  { %p1431_p6 = pnand %p1429_p5, %p1426_p4 }
  0x4d   :  { %1434 = shalt.err (!%p1431_p6)
}
  0x4e   :  { %s1435_s0 = scalar_lea.vmem %s46_s27, 32  ;;  %p1440_p8 = scmp.lt.s32.totalorder %s46_s27, %s46_s27 }
  0x4f   :  { %p1436_p7 = scmp.ne.s32.totalorder %s46_s27, %s1435_s0  ;;  %p1441_p9 = scmp.lt.s32.totalorder %s1435_s0, %s1435_s0 }
  0x51   :  { %p1442_p10 = por %p1441_p9, %p1440_p8 }
  0x53   :  { %p1443_p11 = pnand %p1442_p10, %p1436_p7 }
  0x55   :  { %1446 = shalt.err (!%p1443_p11)
}
  0x56   :  { %48 = dma.hbm_to_vmem [thread:$0]  %s1676_s2, 32, %s46_s27, [#allocation7]  }
  0x57   :  { %s1447_s17 = scalar_lea.hbm %s1678_s4, 16 }
  0x58   :  { %p1448_p12 = scmp.ne.s32.totalorder %s1678_s4, %s1447_s17  ;;  %p1451_p13 = scmp.lt.u32.totalorder %s1447_s17, %s1678_s4 }
  0x5a   :  { %p1453_p0 = pnand %p1451_p13, %p1448_p12 }
  0x5c   :  { %1456 = shalt.err (!%p1453_p0)
}
  0x5d   :  { %s1457_s22 = scalar_lea.vmem %s68_s29, 16  ;;  %s1461_s23 = scalar_lea.vmem %s68_s29, 32 }
  0x5e   :  { %p1458_p1 = scmp.ne.s32.totalorder %s68_s29, %s1457_s22  ;;  %p1462_p2 = scmp.lt.s32.totalorder %s68_s29, %s68_s29 }
  0x5f   :  { %p1463_p3 = scmp.lt.s32.totalorder %s1461_s23, %s1457_s22 }
  0x61   :  { %p1464_p4 = por %p1463_p3, %p1462_p2 }
  0x63   :  { %p1465_p5 = pnand %p1464_p4, %p1458_p1 }
  0x65   :  { %1468 = shalt.err (!%p1465_p5)
}
  0x66   :  { %70 = dma.hbm_to_vmem [thread:$0]  %s1678_s4, 16, %s68_s29, [#allocation10]  }
  0x67   :  { %s1533_s26 = smov [#allocation14]   ;;  %s1469_s27 = scalar_lea.hbm %s1680_s6, 16 }
  0x68   :  { %s89_s5 = sshll.u32 %s1533_s26, 4  ;;  %p1470_p6 = scmp.ne.s32.totalorder %s1680_s6, %s1469_s27  ;;  %s90_s5 = int_to_ptr.vmem [resolvable:$true] %s89_s5 }
  0x69   :  { %p1473_p7 = scmp.lt.u32.totalorder %s1469_s27, %s1680_s6 }
  0x6b   :  { %p1475_p8 = pnand %p1473_p7, %p1470_p6 }
  0x6d   :  { %1478 = shalt.err (!%p1475_p8)
}
  0x6e   :  { %s1479_s11 = scalar_lea.vmem %s90_s5, 16  ;;  %s1483_s4 = scalar_lea.vmem %s90_s5, 32 }
  0x6f   :  { %p1480_p9 = scmp.ne.s32.totalorder %s90_s5, %s1479_s11  ;;  %p1484_p10 = scmp.lt.s32.totalorder %s90_s5, %s90_s5 }
  0x70   :  { %p1485_p11 = scmp.lt.s32.totalorder %s1483_s4, %s1479_s11 }
  0x72   :  { %p1486_p12 = por %p1485_p11, %p1484_p10 }
  0x74   :  { %p1487_p13 = pnand %p1486_p12, %p1480_p9 }
  0x76   :  { %1490 = shalt.err (!%p1487_p13)
}
  0x77   :  { %92 = dma.hbm_to_vmem [thread:$0]  %s1680_s6, 16, %s90_s5, [#allocation13]  }
  0x78   :  { %1513 = dma.done.wait [#allocation4], 1024  }
  0x79   :  { %1514 = vsyncadd [#allocation4], 4294966272 }
  0x7a   :  { %1515 = dma.done.wait [#allocation7], 32800  }
  0x7b   :  { %1516 = vsyncadd [#allocation7], 4294934496 }
  0x7c   :  { %1517 = dma.done.wait [#allocation10], 4112  }
  0x7d   :  { %1518 = vsyncadd [#allocation10], 4294963184 }
  0x7e   :  { %1519 = dma.done.wait [#allocation13], 2064  }
  0x7f   :  { %1520 = vsyncadd [#allocation13], 4294965232  ;;  %v195_v0 = vld [vmem:[#allocation6 + $0x208] sm:$0xff]  ;;  %v197_v1 = vld [vmem:[#allocation6 + $0x218] sm:$0xff]  ;;  %vm1535_vm0 = vmmov 0   ;;  %s1537_s6 = smov [#allocation15]  }
  0x80   :  { %v194_v2 = vld [vmem:[#allocation6 + $0x200] sm:$0xff]  ;;  %v1068_v3 = vpack.c.bf16 %v197_v1, %v195_v0  ;;  %v196_v4 = vld [vmem:[#allocation6 + $0x210] sm:$0xff]  ;;  %v199_v5 = vld [vmem:[#allocation6 + $0x228] sm:$0xff]  ;;  %s903_s13 = sshll.u32 %s1537_s6, 4  ;;  %s904_s13 = int_to_ptr.vmem [resolvable:$true] %s903_s13 }
  0x81   :  { %v201_v6 = vld [vmem:[#allocation6 + $0x238] sm:$0xff]  ;;  %v1070_v7 = vpack.c.bf16 %v196_v4, %v194_v2  ;;  %v198_v9 = vld [vmem:[#allocation6 + $0x220] sm:$0xff]  ;;  %v200_v10 = vld [vmem:[#allocation6 + $0x230] sm:$0xff]  ;;  %s1491_s14 = scalar_lea.vmem %s904_s13, 128  ;;  %p1496_p1 = scmp.lt.s32.totalorder %s904_s13, %s904_s13 }
  0x82   :  { %v1072_v8 = vpack.c.bf16 %v201_v6, %v199_v5  ;;  %v203_v11 = vld [vmem:[#allocation6 + $0x248] sm:$0xff]  ;;  %1069 = vmatprep.subr.bf16.mxu0 %v1068_v3  ;;  %v205_v12 = vld [vmem:[#allocation6 + $0x258] sm:$0xff]  ;;  %v1074_v13 = vpack.c.bf16 %v200_v10, %v198_v9  ;;  %v202_v15 = vld [vmem:[#allocation6 + $0x240] sm:$0xff]  ;;  %p1492_p0 = scmp.ne.s32.totalorder %s904_s13, %s1491_s14  ;;  %p1497_p2 = scmp.lt.s32.totalorder %s1491_s14, %s1491_s14 }
  0x83   :  { %1071 = vmatpush1.bf16.msra.mxu0 %v1070_v7  ;;  %v1076_v14 = vpack.c.bf16 %v205_v12, %v203_v11  ;;  %v204_v16 = vld [vmem:[#allocation6 + $0x250] sm:$0xff]  ;;  %v207_v17 = vld [vmem:[#allocation6 + $0x268] sm:$0xff]  ;;  %v209_v18 = vld [vmem:[#allocation6 + $0x278] sm:$0xff] }
  0x84   :  { %1073 = vmatprep.subr.bf16.mxu0 %v1072_v8  ;;  %v1078_v19 = vpack.c.bf16 %v204_v16, %v202_v15  ;;  %v1080_v20 = vpack.c.bf16 %v209_v18, %v207_v17  ;;  %v206_v21 = vld [vmem:[#allocation6 + $0x260] sm:$0xff]  ;;  %v208_v22 = vld [vmem:[#allocation6 + $0x270] sm:$0xff]  ;;  %v211_v23 = vld [vmem:[#allocation6 + $0x288] sm:$0xff]  ;;  %p1498_p3 = por %p1497_p2, %p1496_p1 }
  0x85   :  { %v213_v24 = vld [vmem:[#allocation6 + $0x298] sm:$0xff]  ;;  %v1082_v25 = vpack.c.bf16 %v208_v22, %v206_v21  ;;  %v210_v27 = vld [vmem:[#allocation6 + $0x280] sm:$0xff]  ;;  %v212_v28 = vld [vmem:[#allocation6 + $0x290] sm:$0xff] }
  0x86   :  { %v1084_v26 = vpack.c.bf16 %v213_v24, %v211_v23  ;;  %v215_v29 = vld [vmem:[#allocation6 + $0x2a8] sm:$0xff]  ;;  %v217_v30 = vld [vmem:[#allocation6 + $0x2b8] sm:$0xff]  ;;  %v1086_v31 = vpack.c.bf16 %v212_v28, %v210_v27  ;;  %v214_v33 = vld [vmem:[#allocation6 + $0x2a0] sm:$0xff]  ;;  %p1499_p4 = pnand %p1498_p3, %p1492_p0 }
  0x87   :  { %1075 = vmatpush1.bf16.msra.mxu0 %v1074_v13  ;;  %v1088_v32 = vpack.c.bf16 %v217_v30, %v215_v29  ;;  %v216_v34 = vld [vmem:[#allocation6 + $0x2b0] sm:$0xff]  ;;  %v219_v35 = vld [vmem:[#allocation6 + $0x2c8] sm:$0xff]  ;;  %v221_v36 = vld [vmem:[#allocation6 + $0x2d8] sm:$0xff] }
  0x88   :  { %1077 = vmatprep.subr.bf16.mxu0 %v1076_v14  ;;  %v1090_v37 = vpack.c.bf16 %v216_v34, %v214_v33  ;;  %v1092_v38 = vpack.c.bf16 %v221_v36, %v219_v35  ;;  %v218_v39 = vld [vmem:[#allocation6 + $0x2c0] sm:$0xff]  ;;  %v220_v40 = vld [vmem:[#allocation6 + $0x2d0] sm:$0xff]  ;;  %v125_v41 = vld [vmem:[#allocation3 + $0x18] sm:$0xff] }
  0x89   :  { %v223_v42 = vld [vmem:[#allocation6 + $0x2e8] sm:$0xff]  ;;  %v225_v43 = vld [vmem:[#allocation6 + $0x2f8] sm:$0xff]  ;;  %521 = vmatprep.mubr.f32.mxu0 %v125_v41  ;;  %v1094_v44 = vpack.c.bf16 %v220_v40, %v218_v39  ;;  %v222_v46 = vld [vmem:[#allocation6 + $0x2e0] sm:$0xff] }
  0x8a   :  { %v1096_v45 = vpack.c.bf16 %v225_v43, %v223_v42  ;;  %v224_v47 = vld [vmem:[#allocation6 + $0x2f0] sm:$0xff]  ;;  %v227_v48 = vld [vmem:[#allocation6 + $0x308] sm:$0xff]  ;;  %v229_v49 = vld [vmem:[#allocation6 + $0x318] sm:$0xff] }
  0x8b   :  { %1079 = vmatpush1.bf16.msra.mxu0 %v1078_v19  ;;  %v1098_v50 = vpack.c.bf16 %v224_v47, %v222_v46  ;;  %v1100_v51 = vpack.c.bf16 %v229_v49, %v227_v48  ;;  %v226_v52 = vld [vmem:[#allocation6 + $0x300] sm:$0xff]  ;;  %v228_v53 = vld [vmem:[#allocation6 + $0x310] sm:$0xff]  ;;  %v231_v54 = vld [vmem:[#allocation6 + $0x328] sm:$0xff] }
  0x8c   :  { %1081 = vmatprep.subr.bf16.mxu0 %v1080_v20  ;;  %v233_v55 = vld [vmem:[#allocation6 + $0x338] sm:$0xff]  ;;  %v1102_v56 = vpack.c.bf16 %v228_v53, %v226_v52  ;;  %v230_v58 = vld [vmem:[#allocation6 + $0x320] sm:$0xff]  ;;  %v232_v59 = vld [vmem:[#allocation6 + $0x330] sm:$0xff] }
  0x8d   :  { %v1104_v57 = vpack.c.bf16 %v233_v55, %v231_v54  ;;  %v235_v60 = vld [vmem:[#allocation6 + $0x348] sm:$0xff]  ;;  %v237_v61 = vld [vmem:[#allocation6 + $0x358] sm:$0xff]  ;;  %v1106_v62 = vpack.c.bf16 %v232_v59, %v230_v58  ;;  %v234_v0 = vld [vmem:[#allocation6 + $0x340] sm:$0xff] }
  0x8e   :  { %v1108_v63 = vpack.c.bf16 %v237_v61, %v235_v60  ;;  %v236_v1 = vld [vmem:[#allocation6 + $0x350] sm:$0xff]  ;;  %v239_v2 = vld [vmem:[#allocation6 + $0x368] sm:$0xff]  ;;  %v241_v3 = vld [vmem:[#allocation6 + $0x378] sm:$0xff] }
  0x8f   :  { %1083 = vmatpush1.bf16.msra.mxu0 %v1082_v25  ;;  %v1110_v4 = vpack.c.bf16 %v236_v1, %v234_v0  ;;  %v1112_v5 = vpack.c.bf16 %v241_v3, %v239_v2  ;;  %v238_v6 = vld [vmem:[#allocation6 + $0x360] sm:$0xff]  ;;  %v240_v7 = vld [vmem:[#allocation6 + $0x370] sm:$0xff]  ;;  %v243_v8 = vld [vmem:[#allocation6 + $0x388] sm:$0xff] }
  0x90   :  { %1085 = vmatprep.subr.bf16.mxu0 %v1084_v26  ;;  %v245_v9 = vld [vmem:[#allocation6 + $0x398] sm:$0xff]  ;;  %v131_v10 = vld [vmem:[#allocation6 + $0x8] sm:$0xff]  ;;  %v1114_v12 = vpack.c.bf16 %v240_v7, %v238_v6  ;;  %v130_v14 = vld [vmem:[#allocation6] sm:$0xff] }
  0x91   :  { %v133_v11 = vld [vmem:[#allocation6 + $0x18] sm:$0xff]  ;;  %v132_v15 = vld [vmem:[#allocation6 + $0x10] sm:$0xff]  ;;  %v1116_v16 = vpack.c.bf16 %v245_v9, %v243_v8  ;;  %v242_v17 = vld [vmem:[#allocation6 + $0x380] sm:$0xff] }
  0x92   :  { %v1004_v13 = vpack.c.bf16 %v133_v11, %v131_v10  ;;  %v244_v18 = vld [vmem:[#allocation6 + $0x390] sm:$0xff]  ;;  %v1006_v19 = vpack.c.bf16 %v132_v15, %v130_v14  ;;  %v247_v20 = vld [vmem:[#allocation6 + $0x3a8] sm:$0xff]  ;;  %v249_v21 = vld [vmem:[#allocation6 + $0x3b8] sm:$0xff] }
  0x93   :  { %1087 = vmatpush1.bf16.msra.mxu0 %v1086_v31  ;;  %v135_v22 = vld [vmem:[#allocation6 + $0x28] sm:$0xff]  ;;  %v137_v23 = vld [vmem:[#allocation6 + $0x38] sm:$0xff]  ;;  %v134_v24 = vld [vmem:[#allocation6 + $0x20] sm:$0xff]  ;;  %v1118_v26 = vpack.c.bf16 %v244_v18, %v242_v17  ;;  %v1120_v31 = vpack.c.bf16 %v249_v21, %v247_v20 }
  0x94   :  { %1089 = vmatprep.subr.bf16.mxu0 %v1088_v32  ;;  %1005 = vmatprep.subr.bf16.mxu1 %v1004_v13  ;;  %v136_v25 = vld [vmem:[#allocation6 + $0x30] sm:$0xff]  ;;  %v246_v27 = vld [vmem:[#allocation6 + $0x3a0] sm:$0xff]  ;;  %v1008_v29 = vpack.c.bf16 %v137_v23, %v135_v22  ;;  %v251_v32 = vld [vmem:[#allocation6 + $0x3c8] sm:$0xff] }
  0x95   :  { %1007 = vmatpush1.bf16.msra.mxu1 %v1006_v19  ;;  %v248_v28 = vld [vmem:[#allocation6 + $0x3b0] sm:$0xff]  ;;  %v1010_v30 = vpack.c.bf16 %v136_v25, %v134_v24  ;;  %v139_v33 = vld [vmem:[#allocation6 + $0x48] sm:$0xff]  ;;  %v141_v34 = vld [vmem:[#allocation6 + $0x58] sm:$0xff] }
  0x96   :  { %v253_v35 = vld [vmem:[#allocation6 + $0x3d8] sm:$0xff]  ;;  %1009 = vmatprep.subr.bf16.mxu1 %v1008_v29  ;;  %v1012_v36 = vpack.c.bf16 %v141_v34, %v139_v33  ;;  %v1122_v40 = vpack.c.bf16 %v248_v28, %v246_v27  ;;  %v143_v41 = vld [vmem:[#allocation6 + $0x68] sm:$0xff]  ;;  %v142_v43 = vld [vmem:[#allocation6 + $0x60] sm:$0xff] }
  0x97   :  { %1091 = vmatpush1.bf16.msra.mxu0 %v1090_v37  ;;  %v138_v37 = vld [vmem:[#allocation6 + $0x40] sm:$0xff]  ;;  %v145_v42 = vld [vmem:[#allocation6 + $0x78] sm:$0xff]  ;;  %v252_v46 = vld [vmem:[#allocation6 + $0x3d0] sm:$0xff] }
  0x98   :  { %1093 = vmatprep.subr.bf16.mxu0 %v1092_v38  ;;  %v140_v38 = vld [vmem:[#allocation6 + $0x50] sm:$0xff]  ;;  %v1016_v47 = vpack.c.bf16 %v145_v42, %v143_v41  ;;  %v255_v49 = vld [vmem:[#allocation6 + $0x3e8] sm:$0xff]  ;;  %v149_v53 = vld [vmem:[#allocation6 + $0x98] sm:$0xff] }
  0x99   :  { %1011 = vmatpush1.bf16.msra.mxu1 %v1010_v30  ;;  %v1014_v39 = vpack.c.bf16 %v140_v38, %v138_v37  ;;  %v144_v48 = vld [vmem:[#allocation6 + $0x70] sm:$0xff]  ;;  %v254_v55 = vld [vmem:[#allocation6 + $0x3e0] sm:$0xff]  ;;  %v151_v61 = vld [vmem:[#allocation6 + $0xa8] sm:$0xff] }
  0x9a   :  { %1013 = vmatprep.subr.bf16.mxu1 %v1012_v36  ;;  %v1018_v52 = vpack.c.bf16 %v144_v48, %v142_v43  ;;  %v148_v58 = vld [vmem:[#allocation6 + $0x90] sm:$0xff]  ;;  %v261_v0 = vld [vmem:[#allocation6 + $0x418] sm:$0xff]  ;;  %v258_v7 = vld [vmem:[#allocation6 + $0x400] sm:$0xff] }
  0x9b   :  { %1095 = vmatpush1.bf16.msra.mxu0 %v1094_v44  ;;  %v1124_v44 = vpack.c.bf16 %v253_v35, %v251_v32  ;;  %v256_v60 = vld [vmem:[#allocation6 + $0x3f0] sm:$0xff]  ;;  %v263_v9 = vld [vmem:[#allocation6 + $0x428] sm:$0xff]  ;;  %v265_v10 = vld [vmem:[#allocation6 + $0x438] sm:$0xff] }
  0x9c   :  { %1097 = vmatprep.subr.bf16.mxu0 %v1096_v45  ;;  %v250_v45 = vld [vmem:[#allocation6 + $0x3c0] sm:$0xff]  ;;  %v1130_v2 = vpack.c.bf16 %v256_v60, %v254_v55  ;;  %v260_v8 = vld [vmem:[#allocation6 + $0x410] sm:$0xff]  ;;  %v155_v11 = vld [vmem:[#allocation6 + $0xc8] sm:$0xff]  ;;  %v1136_v20 = vpack.c.bf16 %v265_v10, %v263_v9 }
  0x9d   :  { %1015 = vmatpush1.bf16.msra.mxu1 %v1014_v39  ;;  %v1126_v54 = vpack.c.bf16 %v252_v46, %v250_v45  ;;  %v124_v13 = vld [vmem:[#allocation3 + $0x10] sm:$0xff]  ;;  %v262_v14 = vld [vmem:[#allocation6 + $0x420] sm:$0xff]  ;;  %v127_v21 = vld [vmem:[#allocation3 + $0x28] sm:$0xff] }
  0x9e   :  { %1017 = vmatprep.subr.bf16.mxu1 %v1016_v47  ;;  %v264_v17 = vld [vmem:[#allocation6 + $0x430] sm:$0xff]  ;;  %v154_v18 = vld [vmem:[#allocation6 + $0xc0] sm:$0xff]  ;;  %v159_v23 = vld [vmem:[#allocation6 + $0xe8] sm:$0xff] }
  0x9f   :  { %1099 = vmatpush1.bf16.msra.mxu0 %v1098_v50  ;;  %v257_v50 = vld [vmem:[#allocation6 + $0x3f8] sm:$0xff]  ;;  %v156_v19 = vld [vmem:[#allocation6 + $0xd0] sm:$0xff]  ;;  %v267_v25 = vld [vmem:[#allocation6 + $0x448] sm:$0xff]  ;;  %v1138_v28 = vpack.c.bf16 %v264_v17, %v262_v14 }
  0xa0   :  { %1101 = vmatprep.subr.bf16.mxu0 %v1100_v51  ;;  %v147_v51 = vld [vmem:[#allocation6 + $0x88] sm:$0xff]  ;;  %v1128_v59 = vpack.c.bf16 %v257_v50, %v255_v49  ;;  %v161_v24 = vld [vmem:[#allocation6 + $0xf8] sm:$0xff]  ;;  %v1030_v27 = vpack.c.bf16 %v156_v19, %v154_v18  ;;  %v266_v29 = vld [vmem:[#allocation6 + $0x440] sm:$0xff] }
  0xa1   :  { %1019 = vmatpush1.bf16.msra.mxu1 %v1018_v52  ;;  %v1032_v30 = vpack.c.bf16 %v161_v24, %v159_v23  ;;  %v160_v32 = vld [vmem:[#allocation6 + $0xf0] sm:$0xff]  ;;  %v163_v35 = vld [vmem:[#allocation6 + $0x108] sm:$0xff]  ;;  %v165_v36 = vld [vmem:[#allocation6 + $0x118] sm:$0xff] }
  0xa2   :  { %v268_v34 = vld [vmem:[#allocation6 + $0x450] sm:$0xff]  ;;  %v271_v37 = vld [vmem:[#allocation6 + $0x468] sm:$0xff]  ;;  %v273_v38 = vld [vmem:[#allocation6 + $0x478] sm:$0xff]  ;;  %v1036_v42 = vpack.c.bf16 %v165_v36, %v163_v35 }
  0xa3   :  { %1103 = vmatpush1.bf16.msra.mxu0 %v1102_v56  ;;  %v1020_v56 = vpack.c.bf16 %v149_v53, %v147_v51  ;;  %v270_v41 = vld [vmem:[#allocation6 + $0x460] sm:$0xff]  ;;  %v1144_v45 = vpack.c.bf16 %v273_v38, %v271_v37  ;;  %v272_v46 = vld [vmem:[#allocation6 + $0x470] sm:$0xff]  ;;  %v167_v47 = vld [vmem:[#allocation6 + $0x128] sm:$0xff] }
  0xa4   :  { %1105 = vmatprep.subr.bf16.mxu0 %v1104_v57  ;;  %v146_v57 = vld [vmem:[#allocation6 + $0x80] sm:$0xff]  ;;  %v169_v48 = vld [vmem:[#allocation6 + $0x138] sm:$0xff]  ;;  %v275_v49 = vld [vmem:[#allocation6 + $0x488] sm:$0xff]  ;;  %v1146_v52 = vpack.c.bf16 %v272_v46, %v270_v41 }
  0xa5   :  { %v1022_v1 = vpack.c.bf16 %v148_v58, %v146_v57  ;;  %1021 = vmatprep.subr.bf16.mxu1 %v1020_v56  ;;  %v162_v43 = vld [vmem:[#allocation6 + $0x100] sm:$0xff]  ;;  %v277_v50 = vld [vmem:[#allocation6 + $0x498] sm:$0xff]  ;;  %v168_v56 = vld [vmem:[#allocation6 + $0x130] sm:$0xff] }
  0xa6   :  { %v274_v53 = vld [vmem:[#allocation6 + $0x480] sm:$0xff]  ;;  %v1148_v57 = vpack.c.bf16 %v277_v50, %v275_v49  ;;  %v276_v58 = vld [vmem:[#allocation6 + $0x490] sm:$0xff]  ;;  %v173_v60 = vld [vmem:[#allocation6 + $0x158] sm:$0xff] }
  0xa7   :  { %1107 = vmatpush1.bf16.msra.mxu0 %v1106_v62  ;;  %v153_v62 = vld [vmem:[#allocation6 + $0xb8] sm:$0xff]  ;;  %1023 = vmatpush1.bf16.msra.mxu1 %v1022_v1  ;;  %v166_v55 = vld [vmem:[#allocation6 + $0x120] sm:$0xff]  ;;  %v283_v9 = vld [vmem:[#allocation6 + $0x4c8] sm:$0xff] }
  0xa8   :  { %1109 = vmatprep.subr.bf16.mxu0 %v1108_v63  ;;  %v259_v63 = vld [vmem:[#allocation6 + $0x408] sm:$0xff]  ;;  %v1024_v3 = vpack.c.bf16 %v153_v62, %v151_v61  ;;  %v281_v62 = vld [vmem:[#allocation6 + $0x4b8] sm:$0xff]  ;;  %v278_v1 = vld [vmem:[#allocation6 + $0x4a0] sm:$0xff] }
  0xa9   :  { %v1132_v6 = vpack.c.bf16 %v261_v0, %v259_v63  ;;  %v279_v61 = vld [vmem:[#allocation6 + $0x4a8] sm:$0xff]  ;;  %v1042_v63 = vpack.c.bf16 %v168_v56, %v166_v55  ;;  %v1150_v0 = vpack.c.bf16 %v276_v58, %v274_v53  ;;  %v285_v10 = vld [vmem:[#allocation6 + $0x4d8] sm:$0xff]  ;;  %v284_v18 = vld [vmem:[#allocation6 + $0x4d0] sm:$0xff] }
  0xaa   :  { %1025 = vmatprep.subr.bf16.mxu1 %v1024_v3  ;;  %v170_v3 = vld [vmem:[#allocation6 + $0x140] sm:$0xff]  ;;  %v1156_v17 = vpack.c.bf16 %v285_v10, %v283_v9  ;;  %v179_v19 = vld [vmem:[#allocation6 + $0x188] sm:$0xff]  ;;  %v293_v35 = vld [vmem:[#allocation6 + $0x518] sm:$0xff] }
  0xab   :  { %1111 = vmatpush1.bf16.msra.mxu0 %v1110_v4  ;;  %v150_v4 = vld [vmem:[#allocation6 + $0xa0] sm:$0xff]  ;;  %v123_v23 = vld [vmem:[#allocation3 + $0x8] sm:$0xff]  ;;  %v184_v41 = vld [vmem:[#allocation6 + $0x1b0] sm:$0xff] }
  0xac   :  { %1113 = vmatprep.subr.bf16.mxu0 %v1112_v5  ;;  %v152_v5 = vld [vmem:[#allocation6 + $0xb0] sm:$0xff]  ;;  %450 = vmatprep.mubr.f32.mxu1 %v123_v23  ;;  %v290_v38 = vld [vmem:[#allocation6 + $0x500] sm:$0xff]  ;;  %v295_v46 = vld [vmem:[#allocation6 + $0x528] sm:$0xff] }
  0xad   :  { %v1026_v15 = vpack.c.bf16 %v152_v5, %v150_v4  ;;  %v172_v4 = vld [vmem:[#allocation6 + $0x150] sm:$0xff]  ;;  %v1152_v5 = vpack.c.bf16 %v281_v62, %v279_v61  ;;  %v294_v50 = vld [vmem:[#allocation6 + $0x520] sm:$0xff]  ;;  %v191_v56 = vld [vmem:[#allocation6 + $0x1e8] sm:$0xff] }
  0xae   :  { %v188_v53 = vld [vmem:[#allocation6 + $0x1d0] sm:$0xff]  ;;  %v299_v58 = vld [vmem:[#allocation6 + $0x548] sm:$0xff]  ;;  %v298_v62 = vld [vmem:[#allocation6 + $0x540] sm:$0xff] }
  0xaf   :  { %1115 = vmatpush1.bf16.msra.mxu0 %v1114_v12  ;;  %v157_v12 = vld [vmem:[#allocation6 + $0xd8] sm:$0xff]  ;;  %1027 = vmatpush1.bf16.msra.mxu1 %v1026_v15  ;;  %v174_v15 = vld [vmem:[#allocation6 + $0x160] sm:$0xff]  ;;  %v296_v55 = vld [vmem:[#allocation6 + $0x530] sm:$0xff] }
  0xb0   :  { %1117 = vmatprep.subr.bf16.mxu0 %v1116_v16  ;;  %v1134_v16 = vpack.c.bf16 %v260_v8, %v258_v7  ;;  %v1028_v22 = vpack.c.bf16 %v157_v12, %v155_v11  ;;  %v175_v7 = vld [vmem:[#allocation6 + $0x168] sm:$0xff]  ;;  %v177_v8 = vld [vmem:[#allocation6 + $0x178] sm:$0xff]  ;;  %v1046_v11 = vpack.c.bf16 %v172_v4, %v170_v3  ;;  %v1170_v61 = vpack.c.bf16 %v296_v55, %v294_v50  ;;  %v300_v3 = vld [vmem:[#allocation6 + $0x550] sm:$0xff] }
  0xb1   :  { %v1048_v14 = vpack.c.bf16 %v177_v8, %v175_v7  ;;  %v709_v4 = vld [vmem:[#allocation9 + $0x80] sm:$0xff]  ;;  %v305_v7 = vld [vmem:[#allocation6 + $0x578] sm:$0xff]  ;;  %v1174_v9 = vpack.c.bf16 %v300_v3, %v298_v62  ;;  %v702_v62 = vld [vmem:[#allocation9 + $0x48] sm:$0xff] }
  0xb2   :  { %1029 = vmatprep.subr.bf16.mxu1 %v1028_v22  ;;  %v289_v22 = vld [vmem:[#allocation6 + $0x4f8] sm:$0xff]  ;;  %v302_v10 = vld [vmem:[#allocation6 + $0x560] sm:$0xff]  ;;  %v319_v55 = vld [vmem:[#allocation6 + $0x5e8] sm:$0xff] }
  0xb3   :  { %1119 = vmatpush1.bf16.msra.mxu0 %v1118_v26  ;;  %v269_v26 = vld [vmem:[#allocation6 + $0x458] sm:$0xff]  ;;  %1031 = vmatpush1.bf16.msra.mxu1 %v1030_v27  ;;  %v306_v23 = vld [vmem:[#allocation6 + $0x580] sm:$0xff]  ;;  %v323_v3 = vld [vmem:[#allocation6 + $0x608] sm:$0xff] }
  0xb4   :  { %1121 = vmatprep.subr.bf16.mxu0 %v1120_v31  ;;  %v158_v31 = vld [vmem:[#allocation6 + $0xe0] sm:$0xff]  ;;  %v1140_v33 = vpack.c.bf16 %v269_v26, %v267_v25  ;;  %1033 = vmatprep.subr.bf16.mxu1 %v1032_v30 }
  0xb5   :  { %v1034_v39 = vpack.c.bf16 %v160_v32, %v158_v31  ;;  %v286_v26 = vld [vmem:[#allocation6 + $0x4e0] sm:$0xff]  ;;  %v288_v31 = vld [vmem:[#allocation6 + $0x4f0] sm:$0xff]  ;;  %v183_v32 = vld [vmem:[#allocation6 + $0x1a8] sm:$0xff] }
  0xb6   :  { %v1162_v37 = vpack.c.bf16 %v288_v31, %v286_v26  ;;  %v696_v26 = vld [vmem:[#allocation9 + $0x18] sm:$0xff]  ;;  %v311_v31 = vld [vmem:[#allocation6 + $0x5a8] sm:$0xff] }
  0xb7   :  { %1123 = vmatpush1.bf16.msra.mxu0 %v1122_v40  ;;  %v1142_v40 = vpack.c.bf16 %v268_v34, %v266_v29  ;;  %1035 = vmatpush1.bf16.msra.mxu1 %v1034_v39  ;;  %v180_v29 = vld [vmem:[#allocation6 + $0x190] sm:$0xff]  ;;  %v291_v34 = vld [vmem:[#allocation6 + $0x508] sm:$0xff]  ;;  %v700_v50 = vld [vmem:[#allocation9 + $0x38] sm:$0xff] }
  0xb8   :  { %1125 = vmatprep.subr.bf16.mxu0 %v1124_v44  ;;  %v164_v44 = vld [vmem:[#allocation6 + $0x110] sm:$0xff]  ;;  %1037 = vmatprep.subr.bf16.mxu1 %v1036_v42  ;;  %v1164_v42 = vpack.c.bf16 %v293_v35, %v291_v34  ;;  %v310_v35 = vld [vmem:[#allocation6 + $0x5a0] sm:$0xff] }
  0xb9   :  { %v1038_v51 = vpack.c.bf16 %v164_v44, %v162_v43  ;;  %v292_v43 = vld [vmem:[#allocation6 + $0x510] sm:$0xff]  ;;  %v187_v44 = vld [vmem:[#allocation6 + $0x1c8] sm:$0xff] }
  0xba   :  { %v1166_v49 = vpack.c.bf16 %v292_v43, %v290_v38  ;;  %v698_v38 = vld [vmem:[#allocation9 + $0x28] sm:$0xff] }
  0xbb   :  { %1127 = vmatpush1.bf16.msra.mxu0 %v1126_v54  ;;  %v1040_v54 = vpack.c.bf16 %v169_v48, %v167_v47  ;;  %1039 = vmatpush1.bf16.msra.mxu1 %v1038_v51  ;;  %v297_v47 = vld [vmem:[#allocation6 + $0x538] sm:$0xff]  ;;  %v315_v43 = vld [vmem:[#allocation6 + $0x5c8] sm:$0xff] }
  0xbc   :  { %1129 = vmatprep.subr.bf16.mxu0 %v1128_v59  ;;  %v171_v59 = vld [vmem:[#allocation6 + $0x148] sm:$0xff] }
  0xbd   :  { %1041 = vmatprep.subr.bf16.mxu1 %v1040_v54  ;;  %v1168_v54 = vpack.c.bf16 %v297_v47, %v295_v46  ;;  %v314_v47 = vld [vmem:[#allocation6 + $0x5c0] sm:$0xff] }
  0xbf   :  { %1131 = vmatpush1.bf16.msra.mxu0 %v1130_v2  ;;  %v1044_v2 = vpack.c.bf16 %v173_v60, %v171_v59  ;;  %1043 = vmatpush1.bf16.msra.mxu1 %v1042_v63  ;;  %v301_v59 = vld [vmem:[#allocation6 + $0x558] sm:$0xff] }
  0xc0   :  { %1133 = vmatprep.subr.bf16.mxu0 %v1132_v6  ;;  %v280_v6 = vld [vmem:[#allocation6 + $0x4b0] sm:$0xff] }
  0xc1   :  { %v1154_v12 = vpack.c.bf16 %v280_v6, %v278_v1  ;;  %1045 = vmatprep.subr.bf16.mxu1 %v1044_v2  ;;  %v192_v1 = vld [vmem:[#allocation6 + $0x1f0] sm:$0xff]  ;;  %v1172_v2 = vpack.c.bf16 %v301_v59, %v299_v58  ;;  %v303_v6 = vld [vmem:[#allocation6 + $0x568] sm:$0xff]  ;;  %v318_v59 = vld [vmem:[#allocation6 + $0x5e0] sm:$0xff] }
  0xc2   :  { %522 = vmatmul.mubr.f32.vlgmr.msra.gmra.mrb[0].mxu0 %v124_v13  ;;  %v282_v13 = vld [vmem:[#allocation6 + $0x4c0] sm:$0xff] }
  0xc3   :  { %1135 = vmatpush1.bf16.msra.mxu0 %v1134_v16  ;;  %592 = vmatprep.mubr.f32.mxu0 %v127_v21  ;;  %v176_v16 = vld [vmem:[#allocation6 + $0x170] sm:$0xff]  ;;  %v287_v21 = vld [vmem:[#allocation6 + $0x4e8] sm:$0xff]  ;;  %v1158_v25 = vpack.c.bf16 %v284_v18, %v282_v13 }
  0xc4   :  { %1137 = vmatprep.subr.bf16.mxu0 %v1136_v20  ;;  %v181_v20 = vld [vmem:[#allocation6 + $0x198] sm:$0xff]  ;;  %1047 = vmatpush1.bf16.msra.mxu1 %v1046_v11  ;;  %v1050_v24 = vpack.c.bf16 %v176_v16, %v174_v15  ;;  %v1160_v30 = vpack.c.bf16 %v289_v22, %v287_v21  ;;  %v694_v13 = vld [vmem:[#allocation9 + $0x8] sm:$0xff] }
  0xc5   :  { %1049 = vmatprep.subr.bf16.mxu1 %v1048_v14  ;;  %v1052_v27 = vpack.c.bf16 %v181_v20, %v179_v19  ;;  %v1176_v14 = vpack.c.bf16 %v305_v7, %v303_v6  ;;  %v304_v15 = vld [vmem:[#allocation6 + $0x570] sm:$0xff]  ;;  %v307_v18 = vld [vmem:[#allocation6 + $0x588] sm:$0xff]  ;;  %v309_v19 = vld [vmem:[#allocation6 + $0x598] sm:$0xff] }
  0xc6   :  { %v711_v16 = vld [vmem:[#allocation9 + $0x90] sm:$0xff]  ;;  %v122_v20 = vld [vmem:[#allocation3] sm:$0xff]  ;;  %v1178_v22 = vpack.c.bf16 %v304_v15, %v302_v10 }
  0xc7   :  { %1139 = vmatpush1.bf16.msra.mxu0 %v1138_v28  ;;  %v178_v28 = vld [vmem:[#allocation6 + $0x180] sm:$0xff] }
  0xc8   :  { %1141 = vmatprep.subr.bf16.mxu0 %v1140_v33  ;;  %v185_v33 = vld [vmem:[#allocation6 + $0x1b8] sm:$0xff]  ;;  %1051 = vmatpush1.bf16.msra.mxu1 %v1050_v24  ;;  %v1054_v36 = vpack.c.bf16 %v180_v29, %v178_v28  ;;  %v308_v28 = vld [vmem:[#allocation6 + $0x590] sm:$0xff]  ;;  %v713_v29 = vld [vmem:[#allocation9 + $0xa0] sm:$0xff] }
  0xc9   :  { %1053 = vmatprep.subr.bf16.mxu1 %v1052_v27  ;;  %v1056_v39 = vpack.c.bf16 %v185_v33, %v183_v32  ;;  %v1180_v27 = vpack.c.bf16 %v309_v19, %v307_v18  ;;  %v313_v32 = vld [vmem:[#allocation6 + $0x5b8] sm:$0xff]  ;;  %v1182_v34 = vpack.c.bf16 %v308_v28, %v306_v23  ;;  %v326_v19 = vld [vmem:[#allocation6 + $0x620] sm:$0xff]  ;;  %v335_v28 = vld [vmem:[#allocation6 + $0x668] sm:$0xff] }
  0xca   :  { %v333_v23 = vld [vmem:[#allocation6 + $0x658] sm:$0xff] }
  0xcb   :  { %1143 = vmatpush1.bf16.msra.mxu0 %v1142_v40  ;;  %v182_v40 = vld [vmem:[#allocation6 + $0x1a0] sm:$0xff] }
  0xcc   :  { %1145 = vmatprep.subr.bf16.mxu0 %v1144_v45  ;;  %v189_v45 = vld [vmem:[#allocation6 + $0x1d8] sm:$0xff]  ;;  %1055 = vmatpush1.bf16.msra.mxu1 %v1054_v36  ;;  %v1058_v48 = vpack.c.bf16 %v184_v41, %v182_v40  ;;  %v312_v40 = vld [vmem:[#allocation6 + $0x5b0] sm:$0xff] }
  0xcd   :  { %1057 = vmatprep.subr.bf16.mxu1 %v1056_v39  ;;  %v1060_v51 = vpack.c.bf16 %v189_v45, %v187_v44  ;;  %v1184_v39 = vpack.c.bf16 %v313_v32, %v311_v31  ;;  %v715_v41 = vld [vmem:[#allocation9 + $0xb0] sm:$0xff]  ;;  %v1186_v46 = vpack.c.bf16 %v312_v40, %v310_v35  ;;  %v334_v32 = vld [vmem:[#allocation6 + $0x660] sm:$0xff]  ;;  %v343_v40 = vld [vmem:[#allocation6 + $0x6a8] sm:$0xff] }
  0xce   :  { %v317_v44 = vld [vmem:[#allocation6 + $0x5d8] sm:$0xff] }
  0xcf   :  { %1147 = vmatpush1.bf16.msra.mxu0 %v1146_v52  ;;  %v186_v52 = vld [vmem:[#allocation6 + $0x1c0] sm:$0xff]  ;;  %v341_v35 = vld [vmem:[#allocation6 + $0x698] sm:$0xff] }
  0xd0   :  { %1149 = vmatprep.subr.bf16.mxu0 %v1148_v57  ;;  %v193_v57 = vld [vmem:[#allocation6 + $0x1f8] sm:$0xff]  ;;  %1059 = vmatpush1.bf16.msra.mxu1 %v1058_v48  ;;  %v1062_v60 = vpack.c.bf16 %v188_v53, %v186_v52  ;;  %v316_v52 = vld [vmem:[#allocation6 + $0x5d0] sm:$0xff]  ;;  %v717_v53 = vld [vmem:[#allocation9 + $0xc0] sm:$0xff] }
  0xd1   :  { %1061 = vmatprep.subr.bf16.mxu1 %v1060_v51  ;;  %v1064_v63 = vpack.c.bf16 %v193_v57, %v191_v56  ;;  %v1188_v51 = vpack.c.bf16 %v317_v44, %v315_v43  ;;  %v321_v56 = vld [vmem:[#allocation6 + $0x5f8] sm:$0xff]  ;;  %v1190_v58 = vpack.c.bf16 %v316_v52, %v314_v47  ;;  %v342_v44 = vld [vmem:[#allocation6 + $0x6a0] sm:$0xff]  ;;  %v351_v52 = vld [vmem:[#allocation6 + $0x6e8] sm:$0xff] }
  0xd2   :  { %v349_v47 = vld [vmem:[#allocation6 + $0x6d8] sm:$0xff] }
  0xd3   :  { %1151 = vmatpush1.bf16.msra.mxu0 %v1150_v0  ;;  %v190_v0 = vld [vmem:[#allocation6 + $0x1e0] sm:$0xff] }
  0xd4   :  { %1153 = vmatprep.subr.bf16.mxu0 %v1152_v5  ;;  %v710_v5 = vld [vmem:[#allocation9 + $0x88] sm:$0xff]  ;;  %1063 = vmatpush1.bf16.msra.mxu1 %v1062_v60  ;;  %v1066_v8 = vpack.c.bf16 %v192_v1, %v190_v0  ;;  %v719_v1 = vld [vmem:[#allocation9 + $0xd0] sm:$0xff] }
  0xd5   :  { %1065 = vmatprep.subr.bf16.mxu1 %v1064_v63  ;;  %v1260_v11 = vpack.c.bf16 %v710_v5, %v709_v4  ;;  %v1192_v63 = vpack.c.bf16 %v321_v56, %v319_v55  ;;  %v320_v0 = vld [vmem:[#allocation6 + $0x5f0] sm:$0xff]  ;;  %v325_v4 = vld [vmem:[#allocation6 + $0x618] sm:$0xff]  ;;  %v350_v56 = vld [vmem:[#allocation6 + $0x6e0] sm:$0xff] }
  0xd6   :  { %v1194_v6 = vpack.c.bf16 %v320_v0, %v318_v59  ;;  %v1196_v10 = vpack.c.bf16 %v325_v4, %v323_v3  ;;  %v357_v59 = vld [vmem:[#allocation6 + $0x718] sm:$0xff]  ;;  %v359_v0 = vld [vmem:[#allocation6 + $0x728] sm:$0xff]  ;;  %v358_v4 = vld [vmem:[#allocation6 + $0x720] sm:$0xff] }
  0xd7   :  { %1155 = vmatpush1.bf16.msra.mxu0 %v1154_v12  ;;  %v693_v12 = vld [vmem:[#allocation9] sm:$0xff] }
  0xd8   :  { %1157 = vmatprep.subr.bf16.mxu0 %v1156_v17  ;;  %v712_v17 = vld [vmem:[#allocation9 + $0x98] sm:$0xff]  ;;  %1067 = vmatpush1.bf16.msra.mxu1 %v1066_v8  ;;  %v1262_v21 = vpack.c.bf16 %v694_v13, %v693_v12  ;;  %v703_v8 = vld [vmem:[#allocation9 + $0x50] sm:$0xff]  ;;  %v327_v13 = vld [vmem:[#allocation6 + $0x628] sm:$0xff] }
  0xd9   :  { %1261 = vmatprep.subr.bf16.mxu1 %v1260_v11  ;;  %v1264_v24 = vpack.c.bf16 %v712_v17, %v711_v16  ;;  %v322_v11 = vld [vmem:[#allocation6 + $0x600] sm:$0xff]  ;;  %v324_v12 = vld [vmem:[#allocation6 + $0x610] sm:$0xff] }
  0xda   :  { %v126_v16 = vld [vmem:[#allocation3 + $0x20] sm:$0xff]  ;;  %v1198_v17 = vpack.c.bf16 %v324_v12, %v322_v11  ;;  %v364_v11 = vld [vmem:[#allocation6 + $0x750] sm:$0xff]  ;;  %v367_v12 = vld [vmem:[#allocation6 + $0x768] sm:$0xff] }
  0xdb   :  { %1159 = vmatpush1.bf16.msra.mxu0 %v1158_v25  ;;  %v695_v25 = vld [vmem:[#allocation9 + $0x10] sm:$0xff]  ;;  %451 = vmatmul.mubr.f32.vlgmr.msra.gmra.mrb[0].mxu1 %v122_v20 }
  0xdc   :  { %1161 = vmatprep.subr.bf16.mxu0 %v1160_v30  ;;  %v714_v30 = vld [vmem:[#allocation9 + $0xa8] sm:$0xff]  ;;  %1263 = vmatpush3.bf16.msra.mxu1 %v1262_v21  ;;  %v1266_v33 = vpack.c.bf16 %v696_v26, %v695_v25  ;;  %v129_v21 = vld [vmem:[#allocation3 + $0x38] sm:$0xff]  ;;  %v330_v26 = vld [vmem:[#allocation6 + $0x640] sm:$0xff] }
  0xdd   :  { %1265 = vmatprep.subr.bf16.mxu1 %v1264_v24  ;;  %v1268_v36 = vpack.c.bf16 %v714_v30, %v713_v29  ;;  %v328_v20 = vld [vmem:[#allocation6 + $0x630] sm:$0xff]  ;;  %v337_v29 = vld [vmem:[#allocation6 + $0x678] sm:$0xff] }
  0xde   :  { %v1202_v24 = vpack.c.bf16 %v328_v20, %v326_v19  ;;  %v1208_v31 = vpack.c.bf16 %v337_v29, %v335_v28  ;;  %v373_v19 = vld [vmem:[#allocation6 + $0x798] sm:$0xff]  ;;  %v374_v28 = vld [vmem:[#allocation6 + $0x7a0] sm:$0xff]  ;;  %v376_v29 = vld [vmem:[#allocation6 + $0x7b0] sm:$0xff] }
  0xdf   :  { %1163 = vmatpush1.bf16.msra.mxu0 %v1162_v37  ;;  %v697_v37 = vld [vmem:[#allocation9 + $0x20] sm:$0xff] }
  0xe0   :  { %1165 = vmatprep.subr.bf16.mxu0 %v1164_v42  ;;  %v716_v42 = vld [vmem:[#allocation9 + $0xb8] sm:$0xff]  ;;  %1267 = vmatpush3.bf16.msra.mxu1 %v1266_v33  ;;  %v1270_v45 = vpack.c.bf16 %v698_v38, %v697_v37  ;;  %v336_v33 = vld [vmem:[#allocation6 + $0x670] sm:$0xff] }
  0xe1   :  { %1269 = vmatprep.subr.bf16.mxu1 %v1268_v36  ;;  %v1272_v48 = vpack.c.bf16 %v716_v42, %v715_v41  ;;  %v1210_v36 = vpack.c.bf16 %v336_v33, %v334_v32  ;;  %v338_v38 = vld [vmem:[#allocation6 + $0x680] sm:$0xff]  ;;  %v345_v41 = vld [vmem:[#allocation6 + $0x6b8] sm:$0xff]  ;;  %v1250_v32 = vpack.c.bf16 %v376_v29, %v374_v28 }
  0xe2   :  { %v1216_v43 = vpack.c.bf16 %v345_v41, %v343_v40  ;;  %v382_v40 = vld [vmem:[#allocation6 + $0x7e0] sm:$0xff]  ;;  %v384_v41 = vld [vmem:[#allocation6 + $0x7f0] sm:$0xff] }
  0xe3   :  { %1167 = vmatpush1.bf16.msra.mxu0 %v1166_v49  ;;  %v699_v49 = vld [vmem:[#allocation9 + $0x30] sm:$0xff] }
  0xe4   :  { %1169 = vmatprep.subr.bf16.mxu0 %v1168_v54  ;;  %v718_v54 = vld [vmem:[#allocation9 + $0xc8] sm:$0xff]  ;;  %1271 = vmatpush3.bf16.msra.mxu1 %v1270_v45  ;;  %v1274_v57 = vpack.c.bf16 %v700_v50, %v699_v49  ;;  %v346_v50 = vld [vmem:[#allocation6 + $0x6c0] sm:$0xff]  ;;  %v816_v29 = vld [vmem:[#allocation12 + $0x70] sm:$0xff] }
  0xe5   :  { %1273 = vmatprep.subr.bf16.mxu1 %v1272_v48  ;;  %v1276_v60 = vpack.c.bf16 %v718_v54, %v717_v53  ;;  %v344_v45 = vld [vmem:[#allocation6 + $0x6b0] sm:$0xff]  ;;  %v353_v53 = vld [vmem:[#allocation6 + $0x6f8] sm:$0xff] }
  0xe6   :  { %v1218_v48 = vpack.c.bf16 %v344_v45, %v342_v44  ;;  %v1224_v55 = vpack.c.bf16 %v353_v53, %v351_v52  ;;  %v721_v44 = vld [vmem:[#allocation9 + $0xe0] sm:$0xff]  ;;  %v722_v45 = vld [vmem:[#allocation9 + $0xe8] sm:$0xff]  ;;  %v707_v53 = vld [vmem:[#allocation9 + $0x70] sm:$0xff] }
  0xe7   :  { %1171 = vmatpush1.bf16.msra.mxu0 %v1170_v61  ;;  %v701_v61 = vld [vmem:[#allocation9 + $0x40] sm:$0xff] }
  0xe8   :  { %1173 = vmatprep.subr.bf16.mxu0 %v1172_v2  ;;  %v720_v2 = vld [vmem:[#allocation9 + $0xd8] sm:$0xff]  ;;  %1275 = vmatpush3.bf16.msra.mxu1 %v1274_v57  ;;  %v1278_v5 = vpack.c.bf16 %v702_v62, %v701_v61  ;;  %v352_v57 = vld [vmem:[#allocation6 + $0x6f0] sm:$0xff] }
  0xe9   :  { %1277 = vmatprep.subr.bf16.mxu1 %v1276_v60  ;;  %v1280_v7 = vpack.c.bf16 %v720_v2, %v719_v1  ;;  %v1226_v60 = vpack.c.bf16 %v352_v57, %v350_v56  ;;  %v354_v62 = vld [vmem:[#allocation6 + $0x700] sm:$0xff]  ;;  %v361_v1 = vld [vmem:[#allocation6 + $0x738] sm:$0xff]  ;;  %v1534_v56 = vmov 0.0|0.0  }
  0xea   :  { %v1232_v3 = vpack.c.bf16 %v361_v1, %v359_v0 }
  0xeb   :  { %1175 = vmatpush1.bf16.msra.mxu0 %v1174_v9  ;;  %v704_v9 = vld [vmem:[#allocation9 + $0x58] sm:$0xff] }
  0xec   :  { %1177 = vmatprep.subr.bf16.mxu0 %v1176_v14  ;;  %v329_v14 = vld [vmem:[#allocation6 + $0x638] sm:$0xff]  ;;  %1279 = vmatpush3.bf16.msra.mxu1 %v1278_v5  ;;  %v1282_v15 = vpack.c.bf16 %v704_v9, %v703_v8  ;;  %v360_v5 = vld [vmem:[#allocation6 + $0x730] sm:$0xff] }
  0xed   :  { %1281 = vmatprep.subr.bf16.mxu1 %v1280_v7  ;;  %v1200_v18 = vpack.c.bf16 %v329_v14, %v327_v13  ;;  %v365_v7 = vld [vmem:[#allocation6 + $0x758] sm:$0xff]  ;;  %v1234_v8 = vpack.c.bf16 %v360_v5, %v358_v4  ;;  %v802_v5 = vld [vmem:[#allocation12] sm:$0xff] }
  0xee   :  { %v369_v13 = vld [vmem:[#allocation6 + $0x778] sm:$0xff] }
  0xef   :  { %1179 = vmatpush1.bf16.msra.mxu0 %v1178_v22  ;;  %v331_v22 = vld [vmem:[#allocation6 + $0x648] sm:$0xff] }
  0xf0   :  { %1181 = vmatprep.subr.bf16.mxu0 %v1180_v27  ;;  %1283 = vmatpush3.bf16.msra.mxu1 %v1282_v15  ;;  %v1204_v25 = vpack.c.bf16 %v333_v23, %v331_v22  ;;  %v332_v27 = vld [vmem:[#allocation6 + $0x650] sm:$0xff]  ;;  %v1240_v15 = vpack.c.bf16 %v369_v13, %v367_v12  ;;  %v370_v22 = vld [vmem:[#allocation6 + $0x780] sm:$0xff] }
  0xf1   :  { %v1206_v30 = vpack.c.bf16 %v332_v27, %v330_v26  ;;  %v372_v23 = vld [vmem:[#allocation6 + $0x790] sm:$0xff]  ;;  %v805_v12 = vld [vmem:[#allocation12 + $0x18] sm:$0xff] }
  0xf2   :  { %v1246_v26 = vpack.c.bf16 %v372_v23, %v370_v22  ;;  %v812_v23 = vld [vmem:[#allocation12 + $0x50] sm:$0xff] }
  0xf3   :  { %1183 = vmatpush1.bf16.msra.mxu0 %v1182_v34  ;;  %v339_v34 = vld [vmem:[#allocation6 + $0x688] sm:$0xff] }
  0xf4   :  { %1185 = vmatprep.subr.bf16.mxu0 %v1184_v39  ;;  %v1212_v37 = vpack.c.bf16 %v341_v35, %v339_v34  ;;  %v340_v39 = vld [vmem:[#allocation6 + $0x690] sm:$0xff]  ;;  %v378_v34 = vld [vmem:[#allocation6 + $0x7c0] sm:$0xff] }
  0xf5   :  { %v1214_v42 = vpack.c.bf16 %v340_v39, %v338_v38  ;;  %v380_v35 = vld [vmem:[#allocation6 + $0x7d0] sm:$0xff] }
  0xf6   :  { %v1254_v38 = vpack.c.bf16 %v380_v35, %v378_v34  ;;  %v915_v34 = vld [vmem:[#allocation11] ss:$0 sm:$0xff] }
  0xf7   :  { %1187 = vmatpush1.bf16.msra.mxu0 %v1186_v46  ;;  %v347_v46 = vld [vmem:[#allocation6 + $0x6c8] sm:$0xff] }
  0xf8   :  { %1189 = vmatprep.subr.bf16.mxu0 %v1188_v51  ;;  %v1220_v49 = vpack.c.bf16 %v349_v47, %v347_v46  ;;  %v348_v51 = vld [vmem:[#allocation6 + $0x6d0] sm:$0xff]  ;;  %v1284_v46 = vpack.c.bf16 %v722_v45, %v721_v44  ;;  %v705_v47 = vld [vmem:[#allocation9 + $0x60] sm:$0xff] }
  0xf9   :  { %v1222_v54 = vpack.c.bf16 %v348_v51, %v346_v50  ;;  %v723_v50 = vld [vmem:[#allocation9 + $0xf0] sm:$0xff]  ;;  %v724_v51 = vld [vmem:[#allocation9 + $0xf8] sm:$0xff] }
  0xfa   :  { %1285 = vmatprep.subr.bf16.mxu1 %v1284_v46  ;;  %v1288_v52 = vpack.c.bf16 %v724_v51, %v723_v50 }
  0xfb   :  { %1191 = vmatpush1.bf16.msra.mxu0 %v1190_v58  ;;  %v355_v58 = vld [vmem:[#allocation6 + $0x708] sm:$0xff] }
  0xfc   :  { %1193 = vmatprep.subr.bf16.mxu0 %v1192_v63  ;;  %v1228_v61 = vpack.c.bf16 %v357_v59, %v355_v58  ;;  %v356_v63 = vld [vmem:[#allocation6 + $0x710] sm:$0xff]  ;;  %v681_v59 = vlaneseq }
  0xfd   :  { %v1230_v2 = vpack.c.bf16 %v356_v63, %v354_v62  ;;  %v679_v62 = vld [vmem:[#allocation8] sm:$0x3] }
  0xff   :  { %1195 = vmatpush1.bf16.msra.mxu0 %v1194_v6  ;;  %v363_v6 = vld [vmem:[#allocation6 + $0x748] sm:$0xff] }
 0x100   :  { %1197 = vmatprep.subr.bf16.mxu0 %v1196_v10  ;;  %v1236_v9 = vpack.c.bf16 %v365_v7, %v363_v6  ;;  %v362_v10 = vld [vmem:[#allocation6 + $0x740] sm:$0xff]  ;;  %v803_v6 = vld [vmem:[#allocation12 + $0x8] sm:$0xff] }
 0x101   :  { %v1238_v14 = vpack.c.bf16 %v364_v11, %v362_v10  ;;  %v804_v11 = vld [vmem:[#allocation12 + $0x10] sm:$0xff] }
 0x102   :  { %593 = vmatmul.mubr.f32.vlgmr.msra.gmra.mrb[0].mxu0 %v126_v16  ;;  %v366_v16 = vld [vmem:[#allocation6 + $0x760] sm:$0xff]  ;;  %v1296_v13 = vpack.c.bf16 %v805_v12, %v804_v11 }
 0x103   :  { %1199 = vmatpush1.bf16.msra.mxu0 %v1198_v17  ;;  %663 = vmatprep.mubr.f32.mxu0 %v129_v21  ;;  %v368_v17 = vld [vmem:[#allocation6 + $0x770] sm:$0xff] }
 0x104   :  { %1201 = vmatprep.subr.bf16.mxu0 %v1200_v18  ;;  %v371_v18 = vld [vmem:[#allocation6 + $0x788] sm:$0xff]  ;;  %v1242_v20 = vpack.c.bf16 %v368_v17, %v366_v16  ;;  %v808_v17 = vld [vmem:[#allocation12 + $0x30] sm:$0xff] }
 0x105   :  { %v1244_v21 = vpack.c.bf16 %v373_v19, %v371_v18  ;;  %v809_v18 = vld [vmem:[#allocation12 + $0x38] sm:$0xff] }
 0x106   :  { %v1302_v19 = vpack.c.bf16 %v809_v18, %v808_v17 }
 0x107   :  { %1203 = vmatpush1.bf16.msra.mxu0 %v1202_v24  ;;  %v375_v24 = vld [vmem:[#allocation6 + $0x7a8] sm:$0xff] }
 0x108   :  { %1205 = vmatprep.subr.bf16.mxu0 %v1204_v25  ;;  %v377_v25 = vld [vmem:[#allocation6 + $0x7b8] sm:$0xff] }
 0x109   :  { %v1248_v27 = vpack.c.bf16 %v377_v25, %v375_v24  ;;  %v813_v24 = vld [vmem:[#allocation12 + $0x58] sm:$0xff] }
 0x10a   :  { %v1308_v25 = vpack.c.bf16 %v813_v24, %v812_v23 }
 0x10b   :  { %1207 = vmatpush1.bf16.msra.mxu0 %v1206_v30  ;;  %v379_v30 = vld [vmem:[#allocation6 + $0x7c8] sm:$0xff] }
 0x10c   :  { %1209 = vmatprep.subr.bf16.mxu0 %v1208_v31  ;;  %v381_v31 = vld [vmem:[#allocation6 + $0x7d8] sm:$0xff] }
 0x10d   :  { %v1252_v33 = vpack.c.bf16 %v381_v31, %v379_v30  ;;  %v817_v30 = vld [vmem:[#allocation12 + $0x78] sm:$0xff] }
 0x10e   :  { %v1314_v31 = vpack.c.bf16 %v817_v30, %v816_v29 }
 0x10f   :  { %1211 = vmatpush1.bf16.msra.mxu0 %v1210_v36  ;;  %v383_v36 = vld [vmem:[#allocation6 + $0x7e8] sm:$0xff] }
 0x110   :  { %1213 = vmatprep.subr.bf16.mxu0 %v1212_v37  ;;  %v385_v37 = vld [vmem:[#allocation6 + $0x7f8] sm:$0xff] }
 0x111   :  { %v1256_v39 = vpack.c.bf16 %v385_v37, %v383_v36 }
 0x113   :  { %1215 = vmatpush1.bf16.msra.mxu0 %v1214_v42  ;;  %v1258_v42 = vpack.c.bf16 %v384_v41, %v382_v40 }
 0x114   :  { %1217 = vmatprep.subr.bf16.mxu0 %v1216_v43  ;;  %v128_v43 = vld [vmem:[#allocation3 + $0x30] sm:$0xff] }
 0x117   :  { %1219 = vmatpush1.bf16.msra.mxu0 %v1218_v48  ;;  %v706_v48 = vld [vmem:[#allocation9 + $0x68] sm:$0xff] }
 0x118   :  { %1221 = vmatprep.subr.bf16.mxu0 %v1220_v49  ;;  %v1286_v49 = vpack.c.bf16 %v706_v48, %v705_v47 }
 0x11a   :  { %1287 = vmatpush3.bf16.msra.mxu1 %v1286_v49 }
 0x11b   :  { %1223 = vmatpush1.bf16.msra.mxu0 %v1222_v54  ;;  %v708_v54 = vld [vmem:[#allocation9 + $0x78] sm:$0xff]  ;;  %1289 = vmatprep.subr.bf16.mxu1 %v1288_v52 }
 0x11c   :  { %1225 = vmatprep.subr.bf16.mxu0 %v1224_v55  ;;  %v1290_v55 = vpack.c.bf16 %v708_v54, %v707_v53 }
 0x11e   :  { %1291 = vmatpush3.bf16.msra.mxu1 %v1290_v55 }
 0x11f   :  { %1227 = vmatpush1.bf16.msra.mxu0 %v1226_v60  ;;  %1292 = vmatprep.subr.bf16.mxu1 %v1534_v56  ;;  %v682_v60 = vshrl.u32 %v681_v59, 7 }
 0x120   :  { %1229 = vmatprep.subr.bf16.mxu0 %v1228_v61 }
 0x121   :  { %v687_v61 = vsub.s32 1, %v682_v60  ;;  %v683_v63 = vsub.s32 0, %v682_v60 }
 0x123   :  { %1231 = vmatpush1.bf16.msra.mxu0 %v1230_v2  ;;  %v688_v1 = vrot.slane %v679_v62, %v687_v61 }
 0x124   :  { %1233 = vmatprep.subr.bf16.mxu0 %v1232_v3  ;;  %v684_v3 = vrot.slane %v679_v62, %v683_v63 }
 0x127   :  { %1235 = vmatpush1.bf16.msra.mxu0 %v1234_v8 }
 0x128   :  { %1237 = vmatprep.subr.bf16.mxu0 %v1236_v9  ;;  %v1293_v9 = vpack.c.bf16 %v803_v6, %v802_v5 }
 0x12b   :  { %1239 = vmatpush1.bf16.msra.mxu0 %v1238_v14  ;;  %v806_v14 = vld [vmem:[#allocation12 + $0x20] sm:$0xff] }
 0x12c   :  { %1241 = vmatprep.subr.bf16.mxu0 %v1240_v15  ;;  %v807_v15 = vld [vmem:[#allocation12 + $0x28] sm:$0xff] }
 0x12d   :  { %v1299_v16 = vpack.c.bf16 %v807_v15, %v806_v14 }
 0x12f   :  { %1243 = vmatpush1.bf16.msra.mxu0 %v1242_v20  ;;  %v810_v20 = vld [vmem:[#allocation12 + $0x40] sm:$0xff] }
 0x130   :  { %1245 = vmatprep.subr.bf16.mxu0 %v1244_v21  ;;  %v811_v21 = vld [vmem:[#allocation12 + $0x48] sm:$0xff] }
 0x131   :  { %v1305_v22 = vpack.c.bf16 %v811_v21, %v810_v20 }
 0x133   :  { %1247 = vmatpush1.bf16.msra.mxu0 %v1246_v26  ;;  %v814_v26 = vld [vmem:[#allocation12 + $0x60] sm:$0xff] }
 0x134   :  { %1249 = vmatprep.subr.bf16.mxu0 %v1248_v27  ;;  %v815_v27 = vld [vmem:[#allocation12 + $0x68] sm:$0xff] }
 0x135   :  { %v1311_v28 = vpack.c.bf16 %v815_v27, %v814_v26 }
 0x137   :  { %1251 = vmatpush1.bf16.msra.mxu0 %v1250_v32  ;;  %v1536_v32 = vmov 0.0  }
 0x138   :  { %1253 = vmatprep.subr.bf16.mxu0 %v1252_v33 }
 0x13b   :  { %1255 = vmatpush1.bf16.msra.mxu0 %v1254_v38  ;;  %v916_v38 = vld [vmem:[#allocation14] ss:$0 sm:$0xff] }
 0x13c   :  { %1257 = vmatprep.subr.bf16.mxu0 %v1256_v39 }
 0x13f   :  { %1259 = vmatpush1.bf16.msra.mxu0 %v1258_v42 }
 0x142   :  { %664 = vmatmul.mubr.f32.vlgmr.msra.gmra.mrb[0].mxu0 %v128_v43 }
 0x1ae   :  { %v452_v57 = vpop.f32.mrb[0].mxu1 }
 0x1af   :  { %v454_v58 = vpop.f32.mrb[1].mxu1 }
 0x215   :  { %v665_v0 = vpop.f32.mrb[0].mxu0 }
 0x216   :  { %v1316_v2 = vadd.f32 %v665_v0, %v452_v57  ;;  %v667_v4 = vpop.f32.mrb[1].mxu0 }
 0x217   :  { %v1317_v7 = vadd.f32 %v667_v4, %v454_v58 }
 0x218   :  { %v691_v10 = vadd.f32 %v1316_v2, %v684_v3 }
 0x219   :  { %v692_v8 = vadd.f32 %v1317_v7, %v688_v1 }
 0x21b   :  { %796 = vmatprep.mubr.f32.mxu1 %v692_v8 }
 0x21c   :  { %797 = vmatmul.mubr.f32.vlgmr.msra.gmra.mrb[2].mxu1 %v691_v10 }
 0x21d   :  { %1294 = vmatpush3.bf16.msra.mxu1 %v1293_v9  ;;  %1001 = vmatprep.mubr.msk.f32.mxu1 %vm1535_vm0, %v1536_v32 }
 0x21e   :  { %1295 = vmatprep.subr.bf16.mxu1 %v1534_v56 }
 0x221   :  { %1297 = vmatpush3.bf16.msra.mxu1 %v1296_v13 }
 0x222   :  { %1298 = vmatprep.subr.bf16.mxu1 %v1534_v56 }
 0x225   :  { %1300 = vmatpush3.bf16.msra.mxu1 %v1299_v16 }
 0x226   :  { %1301 = vmatprep.subr.bf16.mxu1 %v1534_v56 }
 0x229   :  { %1303 = vmatpush3.bf16.msra.mxu1 %v1302_v19 }
 0x22a   :  { %1304 = vmatprep.subr.bf16.mxu1 %v1534_v56 }
 0x22d   :  { %1306 = vmatpush3.bf16.msra.mxu1 %v1305_v22 }
 0x22e   :  { %1307 = vmatprep.subr.bf16.mxu1 %v1534_v56 }
 0x231   :  { %1309 = vmatpush3.bf16.msra.mxu1 %v1308_v25 }
 0x232   :  { %1310 = vmatprep.subr.bf16.mxu1 %v1534_v56 }
 0x235   :  { %1312 = vmatpush3.bf16.msra.mxu1 %v1311_v28 }
 0x236   :  { %1313 = vmatprep.subr.bf16.mxu1 %v1534_v56 }
 0x239   :  { %1315 = vmatpush3.bf16.msra.mxu1 %v1314_v31 }
 0x2ef   :  { %v949_v33 = vpop.f32.mrb[2].mxu1 }
 0x2f0   :  { %v950_v35 = vpop.f32.mrb[3].mxu1 }
 0x2f1   :  { %v951_v36 = vadd.f32 %v950_v35, %v949_v33 }
 0x2f3   :  { %v799_v37 = vadd.f32 %v951_v36, %v915_v34 }
 0x2f5   :  { %1002 = vmatmul.mubr.f32.vlgmr.msra.gmra.mrb[4].mxu1 %v799_v37 }
 0x3c8   :  { %v891_v39 = vpop.f32.mrb[4].mxu1 }
 0x3c9   :  { %v892_v40 = vadd.f32 %v916_v38, %v891_v39  ;;  %v1003_v41 = vpop.f32.mrb[5].mxu1 }
 0x3cb   :  { %v895_v42 = vmax.f32 %v892_v40, 0.0 }
 0x3cd   :  { %896 = vst [vmem:[#allocation15] sm:$0xff] %v895_v42 }
 0x3ce   :  { %1502 = shalt.err (!%p1499_p4)
}
 0x3cf   :  { %s1503_s15 = scalar_lea.hbm %s1681_s7, 128 }
 0x3d0   :  { %p1504_p5 = scmp.ne.s32.totalorder %s1681_s7, %s1503_s15  ;;  %p1507_p6 = scmp.lt.u32.totalorder %s1503_s15, %s1681_s7 }
 0x3d2   :  { %p1509_p7 = pnand %p1507_p6, %p1504_p5 }
 0x3d4   :  { %1512 = shalt.err (!%p1509_p7)
}
 0x3d5   :  { %906 = dma.vmem_to_hbm [thread:$0]  %s904_s13, 128, %s1681_s7, [#allocation5]  }
 0x3d6   :  { %1521 = dma.done.wait [#allocation5], 128  }
 0x3d7   :  { %1522 = vsyncadd [#allocation5], 4294967168 }
 0x3d8   :  { %910 = vsyncpa [#allocation4], 1 }
 0x3d9   :  { %911 = vsyncpa [#allocation7], 1 }
 0x3da   :  { %912 = vsyncpa [#allocation10], 1 }
 0x3db   :  { %913 = vsyncpa [#allocation13], 1 }
 0x3dc   :  { %914 = vsyncpa [#allocation5], 1 }

// kernel: image_captioner_forward.4
= control target key start
LH: loop header
LB: loop body
LE: loop exit
PB: predicated region body
PF: predicated region fallthrough
CT: control target
= control target key end

     0   :  { %15 = vsyncpa [#allocation5], 0  ;;  %s7338_s0 = inlined_call_operand.hbm [shape: f32[8,128], index: 0, kind: input, shape index: {}]   ;;  %s7339_s1 = inlined_call_operand.hbm [shape: f32[8,8,128], index: 1, kind: input, shape index: {}]   ;;  %s7340_s2 = inlined_call_operand.hbm [shape: f32[128,512], index: 2, kind: input, shape index: {}]   ;;  %s7341_s3 = inlined_call_operand.hbm [shape: f32[128,512], index: 3, kind: input, shape index: {}]   ;;  %s7342_s4 = inlined_call_operand.hbm [shape: f32[128,512], index: 4, kind: input, shape index: {}]   ;;  %s7343_s5 = inlined_call_operand.hbm [shape: f32[1,512], index: 5, kind: input, shape index: {}]   ;;  %s7344_s6 = inlined_call_operand.hbm [shape: f32[128,512], index: 6, kind: input, shape index: {}]   ;;  %s7345_s7 = inlined_call_operand.hbm [shape: f32[128,512], index: 7, kind: input, shape index: {}]   ;;  %s7346_s8 = inlined_call_operand.hbm [shape: f32[128,512], index: 8, kind: input, shape index: {}]   ;;  %s7347_s9 = inlined_call_operand.hbm [shape: f32[1,512], index: 9, kind: input, shape index: {}]   ;;  %s7348_s10 = inlined_call_operand.hbm [shape: f32[64,128], index: 10, kind: output, shape index: {}]  }
   0x1   :  { %16 = vsyncpa [#allocation8], 0 }
   0x2   :  { %17 = vsyncpa [#allocation11], 0 }
   0x3   :  { %18 = vsyncpa [#allocation14], 0 }
   0x4   :  { %19 = vsyncpa [#allocation17], 0 }
   0x5   :  { %20 = vsyncpa [#allocation20], 0 }
   0x6   :  { %21 = vsyncpa [#allocation6], 0  ;;  %s6217_s13 = smov [#allocation7]   ;;  %s5961_s17 = scalar_lea.hbm %s7339_s1, 1024 }
   0x7   :  { %s37_s14 = sshll.u32 %s6217_s13, 4  ;;  %p5962_p0 = scmp.ne.s32.totalorder %s7339_s1, %s5961_s17  ;;  %s38_s14 = int_to_ptr.vmem [resolvable:$true] %s37_s14 }
   0x8   :  { %p5965_p1 = scmp.lt.u32.totalorder %s5961_s17, %s7339_s1 }
   0xa   :  { %p5967_p2 = pnand %p5965_p1, %p5962_p0 }
   0xc   :  { %5970 = shalt.err (!%p5967_p2)
}
   0xd   :  { %s5971_s22 = scalar_lea.vmem %s38_s14, 1024  ;;  %p5976_p4 = scmp.lt.s32.totalorder %s38_s14, %s38_s14 }
   0xe   :  { %p5972_p3 = scmp.ne.s32.totalorder %s38_s14, %s5971_s22  ;;  %p5977_p5 = scmp.lt.s32.totalorder %s5971_s22, %s5971_s22 }
  0x10   :  { %p5978_p6 = por %p5977_p5, %p5976_p4 }
  0x12   :  { %p5979_p7 = pnand %p5978_p6, %p5972_p3 }
  0x14   :  { %5982 = shalt.err (!%p5979_p7)
}
  0x15   :  { %s6218_s23 = smov 128   ;;  %s6219_s24 = smov 8  }
  0x16   :  { %43 = dma.hbm_to_vmem [thread:$0]  %s7339_s1, 1024, %s38_s14, [#allocation8], %s6218_s23, %s6218_s23, %s6219_s24  }
  0x17   :  { %s6220_s27 = smov [#allocation10]   ;;  %s6221_s29 = smov [#allocation13]  }
  0x18   :  { %s61_s28 = sshll.u32 %s6220_s27, 4  ;;  %s86_s30 = sshll.u32 %s6221_s29, 4  ;;  %s62_s28 = int_to_ptr.vmem [resolvable:$true] %s61_s28  ;;  %s87_s30 = int_to_ptr.vmem [resolvable:$true] %s86_s30 }
  0x19   :  { %s5983_s13 = scalar_lea.hbm %s7341_s3, 8192 }
  0x1a   :  { %p5984_p8 = scmp.ne.s32.totalorder %s7341_s3, %s5983_s13  ;;  %p5987_p9 = scmp.lt.u32.totalorder %s5983_s13, %s7341_s3 }
  0x1c   :  { %p5989_p10 = pnand %p5987_p9, %p5984_p8 }
  0x1e   :  { %5992 = shalt.err (!%p5989_p10)
}
  0x1f   :  { %s5993_s1 = scalar_lea.vmem %s62_s28, 8192  ;;  %p5998_p12 = scmp.lt.s32.totalorder %s62_s28, %s62_s28 }
  0x20   :  { %p5994_p11 = scmp.ne.s32.totalorder %s62_s28, %s5993_s1  ;;  %p5999_p13 = scmp.lt.s32.totalorder %s5993_s1, %s5993_s1 }
  0x22   :  { %p6000_p0 = por %p5999_p13, %p5998_p12 }
  0x24   :  { %p6001_p1 = pnand %p6000_p0, %p5994_p11 }
  0x26   :  { %6004 = shalt.err (!%p6001_p1)
}
  0x27   :  { %s6222_s14 = smov 512   ;;  %s6223_s19 = smov 32  }
  0x28   :  { %67 = dma.hbm_to_vmem [thread:$0]  %s7341_s3, 8192, %s62_s28, [#allocation11], %s6222_s14, %s6222_s14, %s6223_s19  }
  0x29   :  { %s6005_s26 = scalar_lea.hbm %s7343_s5, 64 }
  0x2a   :  { %p6006_p2 = scmp.ne.s32.totalorder %s7343_s5, %s6005_s26  ;;  %p6009_p3 = scmp.lt.u32.totalorder %s6005_s26, %s7343_s5 }
  0x2c   :  { %p6011_p4 = pnand %p6009_p3, %p6006_p2 }
  0x2e   :  { %6014 = shalt.err (!%p6011_p4)
}
  0x2f   :  { %s6015_s13 = scalar_lea.vmem %s87_s30, 64  ;;  %p6020_p6 = scmp.lt.s32.totalorder %s87_s30, %s87_s30 }
  0x30   :  { %p6016_p5 = scmp.ne.s32.totalorder %s87_s30, %s6015_s13  ;;  %p6021_p7 = scmp.lt.s32.totalorder %s6015_s13, %s6015_s13 }
  0x32   :  { %p6022_p8 = por %p6021_p7, %p6020_p6 }
  0x34   :  { %p6023_p9 = pnand %p6022_p8, %p6016_p5 }
  0x36   :  { %6026 = shalt.err (!%p6023_p9)
}
  0x37   :  { %89 = dma.hbm_to_vmem [thread:$0]  %s7343_s5, 64, %s87_s30, [#allocation14]  }
  0x38   :  { %s6224_s15 = smov [#allocation16]   ;;  %s6225_s17 = smov [#allocation4]  }
  0x39   :  { %s107_s16 = sshll.u32 %s6224_s15, 4  ;;  %s28_s18 = sshll.u32 %s6225_s17, 4  ;;  %s108_s16 = int_to_ptr.vmem [resolvable:$true] %s107_s16  ;;  %s29_s18 = int_to_ptr.vmem [resolvable:$true] %s28_s18 }
  0x3a   :  { %s6027_s21 = scalar_lea.hbm %s7345_s7, 8192 }
  0x3b   :  { %p6028_p10 = scmp.ne.s32.totalorder %s7345_s7, %s6027_s21  ;;  %p6031_p11 = scmp.lt.u32.totalorder %s6027_s21, %s7345_s7 }
  0x3d   :  { %p6033_p12 = pnand %p6031_p11, %p6028_p10 }
  0x3f   :  { %6036 = shalt.err (!%p6033_p12)
}
  0x40   :  { %s6037_s5 = scalar_lea.vmem %s108_s16, 8192  ;;  %p6042_p0 = scmp.lt.s32.totalorder %s108_s16, %s108_s16 }
  0x41   :  { %p6038_p13 = scmp.ne.s32.totalorder %s108_s16, %s6037_s5  ;;  %p6043_p1 = scmp.lt.s32.totalorder %s6037_s5, %s6037_s5 }
  0x43   :  { %p6044_p2 = por %p6043_p1, %p6042_p0 }
  0x45   :  { %p6045_p3 = pnand %p6044_p2, %p6038_p13 }
  0x47   :  { %6048 = shalt.err (!%p6045_p3)
}
  0x48   :  { %113 = dma.hbm_to_vmem [thread:$0]  %s7345_s7, 8192, %s108_s16, [#allocation17], %s6222_s14, %s6222_s14, %s6223_s19  }
  0x49   :  { %s6049_s13 = scalar_lea.hbm %s7338_s0, 128 }
  0x4a   :  { %p6050_p4 = scmp.ne.s32.totalorder %s7338_s0, %s6049_s13  ;;  %p6053_p5 = scmp.lt.u32.totalorder %s6049_s13, %s7338_s0 }
  0x4c   :  { %p6055_p6 = pnand %p6053_p5, %p6050_p4 }
  0x4e   :  { %6058 = shalt.err (!%p6055_p6)
}
  0x4f   :  { %s6059_s1 = scalar_lea.vmem %s29_s18, 128  ;;  %p6064_p8 = scmp.lt.s32.totalorder %s29_s18, %s29_s18 }
  0x50   :  { %p6060_p7 = scmp.ne.s32.totalorder %s29_s18, %s6059_s1  ;;  %p6065_p9 = scmp.lt.s32.totalorder %s6059_s1, %s6059_s1 }
  0x52   :  { %p6066_p10 = por %p6065_p9, %p6064_p8 }
  0x54   :  { %p6067_p11 = pnand %p6066_p10, %p6060_p7 }
  0x56   :  { %6070 = shalt.err (!%p6067_p11)
}
  0x57   :  { %31 = dma.hbm_to_vmem [thread:$0]  %s7338_s0, 128, %s29_s18, [#allocation5]  }
  0x58   :  { %s6226_s20 = smov [#allocation9]   ;;  %s6227_s22 = smov [#allocation12]  }
  0x59   :  { %s49_s21 = sshll.u32 %s6226_s20, 4  ;;  %s73_s25 = sshll.u32 %s6227_s22, 4  ;;  %s50_s21 = int_to_ptr.vmem [resolvable:$true] %s49_s21  ;;  %s74_s25 = int_to_ptr.vmem [resolvable:$true] %s73_s25 }
  0x5a   :  { %s6071_s5 = scalar_lea.hbm %s7340_s2, 8192 }
  0x5b   :  { %p6072_p12 = scmp.ne.s32.totalorder %s7340_s2, %s6071_s5  ;;  %p6075_p13 = scmp.lt.u32.totalorder %s6071_s5, %s7340_s2 }
  0x5d   :  { %p6077_p0 = pnand %p6075_p13, %p6072_p12 }
  0x5f   :  { %6080 = shalt.err (!%p6077_p0)
}
  0x60   :  { %s6081_s0 = scalar_lea.vmem %s50_s21, 8192  ;;  %p6086_p2 = scmp.lt.s32.totalorder %s50_s21, %s50_s21 }
  0x61   :  { %p6082_p1 = scmp.ne.s32.totalorder %s50_s21, %s6081_s0  ;;  %p6087_p3 = scmp.lt.s32.totalorder %s6081_s0, %s6081_s0 }
  0x63   :  { %p6088_p4 = por %p6087_p3, %p6086_p2 }
  0x65   :  { %p6089_p5 = pnand %p6088_p4, %p6082_p1 }
  0x67   :  { %6092 = shalt.err (!%p6089_p5)
}
  0x68   :  { %55 = dma.hbm_to_vmem [thread:$0]  %s7340_s2, 8192, %s50_s21, [#allocation8], %s6222_s14, %s6222_s14, %s6223_s19  }
  0x69   :  { %s6093_s15 = scalar_lea.hbm %s7342_s4, 8192 }
  0x6a   :  { %p6094_p6 = scmp.ne.s32.totalorder %s7342_s4, %s6093_s15  ;;  %p6097_p7 = scmp.lt.u32.totalorder %s6093_s15, %s7342_s4 }
  0x6c   :  { %p6099_p8 = pnand %p6097_p7, %p6094_p6 }
  0x6e   :  { %6102 = shalt.err (!%p6099_p8)
}
  0x6f   :  { %s6103_s20 = scalar_lea.vmem %s74_s25, 8192  ;;  %p6108_p10 = scmp.lt.s32.totalorder %s74_s25, %s74_s25 }
  0x70   :  { %p6104_p9 = scmp.ne.s32.totalorder %s74_s25, %s6103_s20  ;;  %p6109_p11 = scmp.lt.s32.totalorder %s6103_s20, %s6103_s20 }
  0x72   :  { %p6110_p12 = por %p6109_p11, %p6108_p10 }
  0x74   :  { %p6111_p13 = pnand %p6110_p12, %p6104_p9 }
  0x76   :  { %6114 = shalt.err (!%p6111_p13)
}
  0x77   :  { %79 = dma.hbm_to_vmem [thread:$0]  %s7342_s4, 8192, %s74_s25, [#allocation11], %s6222_s14, %s6222_s14, %s6223_s19  }
  0x78   :  { %s6228_s22 = smov [#allocation15]   ;;  %s6229_s27 = smov [#allocation18]  }
  0x79   :  { %s95_s26 = sshll.u32 %s6228_s22, 4  ;;  %s119_s5 = sshll.u32 %s6229_s27, 4  ;;  %s96_s26 = int_to_ptr.vmem [resolvable:$true] %s95_s26  ;;  %s120_s5 = int_to_ptr.vmem [resolvable:$true] %s119_s5 }
  0x7a   :  { %s6115_s11 = scalar_lea.hbm %s7344_s6, 8192 }
  0x7b   :  { %p6116_p0 = scmp.ne.s32.totalorder %s7344_s6, %s6115_s11  ;;  %p6119_p1 = scmp.lt.u32.totalorder %s6115_s11, %s7344_s6 }
  0x7d   :  { %p6121_p2 = pnand %p6119_p1, %p6116_p0 }
  0x7f   :  { %6124 = shalt.err (!%p6121_p2)
}
  0x80   :  { %s6125_s4 = scalar_lea.vmem %s96_s26, 8192  ;;  %p6130_p4 = scmp.lt.s32.totalorder %s96_s26, %s96_s26 }
  0x81   :  { %p6126_p3 = scmp.ne.s32.totalorder %s96_s26, %s6125_s4  ;;  %p6131_p5 = scmp.lt.s32.totalorder %s6125_s4, %s6125_s4 }
  0x83   :  { %p6132_p6 = por %p6131_p5, %p6130_p4 }
  0x85   :  { %p6133_p7 = pnand %p6132_p6, %p6126_p3 }
  0x87   :  { %6136 = shalt.err (!%p6133_p7)
}
  0x88   :  { %101 = dma.hbm_to_vmem [thread:$0]  %s7344_s6, 8192, %s96_s26, [#allocation14], %s6222_s14, %s6222_s14, %s6223_s19  }
  0x89   :  { %s6137_s17 = scalar_lea.hbm %s7346_s8, 8192 }
  0x8a   :  { %p6138_p8 = scmp.ne.s32.totalorder %s7346_s8, %s6137_s17  ;;  %p6141_p9 = scmp.lt.u32.totalorder %s6137_s17, %s7346_s8 }
  0x8c   :  { %p6143_p10 = pnand %p6141_p9, %p6138_p8 }
  0x8e   :  { %6146 = shalt.err (!%p6143_p10)
}
  0x8f   :  { %s6147_s2 = scalar_lea.vmem %s120_s5, 8192  ;;  %p6152_p12 = scmp.lt.s32.totalorder %s120_s5, %s120_s5 }
  0x90   :  { %p6148_p11 = scmp.ne.s32.totalorder %s120_s5, %s6147_s2  ;;  %p6153_p13 = scmp.lt.s32.totalorder %s6147_s2, %s6147_s2 }
  0x92   :  { %p6154_p0 = por %p6153_p13, %p6152_p12 }
  0x94   :  { %p6155_p1 = pnand %p6154_p0, %p6148_p11 }
  0x96   :  { %6158 = shalt.err (!%p6155_p1)
}
  0x97   :  { %125 = dma.hbm_to_vmem [thread:$0]  %s7346_s8, 8192, %s120_s5, [#allocation17], %s6222_s14, %s6222_s14, %s6223_s19  }
  0x98   :  { %s6230_s22 = smov [#allocation19]   ;;  %s6159_s29 = scalar_lea.hbm %s7347_s9, 64 }
  0x99   :  { %s132_s26 = sshll.u32 %s6230_s22, 4  ;;  %p6160_p2 = scmp.ne.s32.totalorder %s7347_s9, %s6159_s29  ;;  %s133_s26 = int_to_ptr.vmem [resolvable:$true] %s132_s26 }
  0x9a   :  { %p6163_p3 = scmp.lt.u32.totalorder %s6159_s29, %s7347_s9 }
  0x9c   :  { %p6165_p4 = pnand %p6163_p3, %p6160_p2 }
  0x9e   :  { %6168 = shalt.err (!%p6165_p4)
}
  0x9f   :  { %s6169_s13 = scalar_lea.vmem %s133_s26, 64  ;;  %p6174_p6 = scmp.lt.s32.totalorder %s133_s26, %s133_s26 }
  0xa0   :  { %p6170_p5 = scmp.ne.s32.totalorder %s133_s26, %s6169_s13  ;;  %p6175_p7 = scmp.lt.s32.totalorder %s6169_s13, %s6169_s13 }
  0xa2   :  { %p6176_p8 = por %p6175_p7, %p6174_p6 }
  0xa4   :  { %p6177_p9 = pnand %p6176_p8, %p6170_p5 }
  0xa6   :  { %6180 = shalt.err (!%p6177_p9)
}
  0xa7   :  { %135 = dma.hbm_to_vmem [thread:$0]  %s7347_s9, 64, %s133_s26, [#allocation20]  }
  0xa8   :  { %6203 = dma.done.wait [#allocation5], 128  }
  0xa9   :  { %6204 = vsyncadd [#allocation5], 4294967168 }
  0xaa   :  { %6205 = dma.done.wait [#allocation8], 9216  }
  0xab   :  { %6206 = vsyncadd [#allocation8], 4294958080 }
  0xac   :  { %6207 = dma.done.wait [#allocation11], 16384  }
  0xad   :  { %6208 = vsyncadd [#allocation11], 4294950912 }
  0xae   :  { %6209 = dma.done.wait [#allocation14], 8256  }
  0xaf   :  { %6210 = vsyncadd [#allocation14], 4294959040 }
  0xb0   :  { %6211 = dma.done.wait [#allocation17], 16384  }
  0xb1   :  { %6212 = vsyncadd [#allocation17], 4294950912 }
  0xb2   :  { %6213 = dma.done.wait [#allocation20], 64  }
  0xb3   :  { %6214 = vsyncadd [#allocation20], 4294967232  ;;  %v6231_v0 = vmov 0.0   ;;  %v168_v1 = vld [vmem:[#allocation9 + $0x8] sm:$0xff]  ;;  %v170_v3 = vld [vmem:[#allocation9 + $0x18] sm:$0xff]  ;;  %s6232_s9 = smov [#allocation21]  }
  0xb4   :  { %317 = vmatprep.mubr.f32.mxu0 %v6231_v0  ;;  %388 = vmatprep.mubr.f32.mxu1 %v6231_v0  ;;  %v172_v2 = vld [vmem:[#allocation9 + $0x28] sm:$0xff]  ;;  %v174_v5 = vld [vmem:[#allocation9 + $0x38] sm:$0xff]  ;;  %v167_v6 = vld [vmem:[#allocation9] sm:$0xff]  ;;  %s4216_s19 = sshll.u32 %s6232_s9, 4  ;;  %s4217_s19 = int_to_ptr.vmem [resolvable:$true] %s4216_s19 }
  0xb5   :  { %v4281_v4 = vpack.c.bf16 %v172_v2, %v168_v1  ;;  %v171_v7 = vld [vmem:[#allocation9 + $0x20] sm:$0xff]  ;;  %v4313_v8 = vpack.c.bf16 %v174_v5, %v170_v3  ;;  %v169_v10 = vld [vmem:[#allocation9 + $0x10] sm:$0xff]  ;;  %v176_v12 = vld [vmem:[#allocation9 + $0x48] sm:$0xff]  ;;  %s6181_s5 = scalar_lea.vmem %s4217_s19, 1024  ;;  %p6186_p11 = scmp.lt.s32.totalorder %s4217_s19, %s4217_s19 }
  0xb6   :  { %v4283_v9 = vpack.c.bf16 %v171_v7, %v167_v6  ;;  %v173_v11 = vld [vmem:[#allocation9 + $0x30] sm:$0xff]  ;;  %v180_v14 = vld [vmem:[#allocation9 + $0x68] sm:$0xff]  ;;  %v178_v15 = vld [vmem:[#allocation9 + $0x58] sm:$0xff]  ;;  %p6182_p10 = scmp.ne.s32.totalorder %s4217_s19, %s6181_s5  ;;  %p6187_p12 = scmp.lt.s32.totalorder %s6181_s5, %s6181_s5 }
  0xb7   :  { %4282 = vmatprep.subr.bf16.mxu0 %v4281_v4  ;;  %v4315_v13 = vpack.c.bf16 %v173_v11, %v169_v10  ;;  %v182_v16 = vld [vmem:[#allocation9 + $0x78] sm:$0xff]  ;;  %4314 = vmatprep.subr.bf16.mxu1 %v4313_v8  ;;  %v4285_v17 = vpack.c.bf16 %v180_v14, %v176_v12  ;;  %v175_v19 = vld [vmem:[#allocation9 + $0x40] sm:$0xff]  ;;  %v177_v21 = vld [vmem:[#allocation9 + $0x50] sm:$0xff] }
  0xb8   :  { %4284 = vmatpush1.bf16.msra.mxu0 %v4283_v9  ;;  %v4317_v18 = vpack.c.bf16 %v182_v16, %v178_v15  ;;  %v179_v20 = vld [vmem:[#allocation9 + $0x60] sm:$0xff]  ;;  %v181_v23 = vld [vmem:[#allocation9 + $0x70] sm:$0xff]  ;;  %v184_v24 = vld [vmem:[#allocation9 + $0x88] sm:$0xff]  ;;  %p6188_p13 = por %p6187_p12, %p6186_p11 }
  0xb9   :  { %4316 = vmatpush1.bf16.msra.mxu1 %v4315_v13  ;;  %v4287_v22 = vpack.c.bf16 %v179_v20, %v175_v19  ;;  %v188_v25 = vld [vmem:[#allocation9 + $0xa8] sm:$0xff]  ;;  %4286 = vmatprep.subr.bf16.mxu0 %v4285_v17  ;;  %v4319_v26 = vpack.c.bf16 %v181_v23, %v177_v21  ;;  %v186_v28 = vld [vmem:[#allocation9 + $0x98] sm:$0xff]  ;;  %v183_v30 = vld [vmem:[#allocation9 + $0x80] sm:$0xff] }
  0xba   :  { %4318 = vmatprep.subr.bf16.mxu1 %v4317_v18  ;;  %v4289_v27 = vpack.c.bf16 %v188_v25, %v184_v24  ;;  %v190_v29 = vld [vmem:[#allocation9 + $0xb8] sm:$0xff]  ;;  %v187_v32 = vld [vmem:[#allocation9 + $0xa0] sm:$0xff]  ;;  %v185_v33 = vld [vmem:[#allocation9 + $0x90] sm:$0xff]  ;;  %p6189_p0 = pnand %p6188_p13, %p6182_p10 }
  0xbb   :  { %v4321_v31 = vpack.c.bf16 %v190_v29, %v186_v28  ;;  %v189_v34 = vld [vmem:[#allocation9 + $0xb0] sm:$0xff]  ;;  %v4291_v35 = vpack.c.bf16 %v187_v32, %v183_v30  ;;  %v192_v36 = vld [vmem:[#allocation9 + $0xc8] sm:$0xff]  ;;  %v194_v38 = vld [vmem:[#allocation9 + $0xd8] sm:$0xff] }
  0xbc   :  { %4288 = vmatpush1.bf16.msra.mxu0 %v4287_v22  ;;  %v196_v37 = vld [vmem:[#allocation9 + $0xe8] sm:$0xff]  ;;  %v4323_v39 = vpack.c.bf16 %v189_v34, %v185_v33  ;;  %v198_v41 = vld [vmem:[#allocation9 + $0xf8] sm:$0xff]  ;;  %v191_v42 = vld [vmem:[#allocation9 + $0xc0] sm:$0xff] }
  0xbd   :  { %4320 = vmatpush1.bf16.msra.mxu1 %v4319_v26  ;;  %4290 = vmatprep.subr.bf16.mxu0 %v4289_v27  ;;  %v4293_v40 = vpack.c.bf16 %v196_v37, %v192_v36  ;;  %v195_v43 = vld [vmem:[#allocation9 + $0xe0] sm:$0xff]  ;;  %v4325_v44 = vpack.c.bf16 %v198_v41, %v194_v38  ;;  %v193_v45 = vld [vmem:[#allocation9 + $0xd0] sm:$0xff]  ;;  %v200_v47 = vld [vmem:[#allocation9 + $0x108] sm:$0xff] }
  0xbe   :  { %4322 = vmatprep.subr.bf16.mxu1 %v4321_v31  ;;  %v197_v46 = vld [vmem:[#allocation9 + $0xf0] sm:$0xff]  ;;  %v204_v48 = vld [vmem:[#allocation9 + $0x128] sm:$0xff]  ;;  %v202_v49 = vld [vmem:[#allocation9 + $0x118] sm:$0xff]  ;;  %v4295_v51 = vpack.c.bf16 %v195_v43, %v191_v42 }
  0xbf   :  { %v206_v50 = vld [vmem:[#allocation9 + $0x138] sm:$0xff]  ;;  %v4327_v52 = vpack.c.bf16 %v197_v46, %v193_v45  ;;  %v4297_v53 = vpack.c.bf16 %v204_v48, %v200_v47  ;;  %v199_v54 = vld [vmem:[#allocation9 + $0x100] sm:$0xff]  ;;  %v201_v56 = vld [vmem:[#allocation9 + $0x110] sm:$0xff] }
  0xc0   :  { %4292 = vmatpush1.bf16.msra.mxu0 %v4291_v35  ;;  %v203_v55 = vld [vmem:[#allocation9 + $0x120] sm:$0xff]  ;;  %v4329_v57 = vpack.c.bf16 %v206_v50, %v202_v49  ;;  %v205_v58 = vld [vmem:[#allocation9 + $0x130] sm:$0xff]  ;;  %v208_v59 = vld [vmem:[#allocation9 + $0x148] sm:$0xff] }
  0xc1   :  { %4324 = vmatpush1.bf16.msra.mxu1 %v4323_v39  ;;  %4294 = vmatprep.subr.bf16.mxu0 %v4293_v40  ;;  %v212_v60 = vld [vmem:[#allocation9 + $0x168] sm:$0xff]  ;;  %v210_v61 = vld [vmem:[#allocation9 + $0x158] sm:$0xff]  ;;  %v4299_v63 = vpack.c.bf16 %v203_v55, %v199_v54  ;;  %v4331_v1 = vpack.c.bf16 %v205_v58, %v201_v56  ;;  %v207_v3 = vld [vmem:[#allocation9 + $0x140] sm:$0xff] }
  0xc2   :  { %4326 = vmatprep.subr.bf16.mxu1 %v4325_v44  ;;  %v214_v62 = vld [vmem:[#allocation9 + $0x178] sm:$0xff]  ;;  %v4301_v2 = vpack.c.bf16 %v212_v60, %v208_v59  ;;  %v211_v4 = vld [vmem:[#allocation9 + $0x160] sm:$0xff]  ;;  %v209_v5 = vld [vmem:[#allocation9 + $0x150] sm:$0xff] }
  0xc3   :  { %v4333_v6 = vpack.c.bf16 %v214_v62, %v210_v61  ;;  %v213_v7 = vld [vmem:[#allocation9 + $0x170] sm:$0xff]  ;;  %v216_v8 = vld [vmem:[#allocation9 + $0x188] sm:$0xff]  ;;  %v218_v10 = vld [vmem:[#allocation9 + $0x198] sm:$0xff]  ;;  %v4303_v12 = vpack.c.bf16 %v211_v4, %v207_v3 }
  0xc4   :  { %4296 = vmatpush1.bf16.msra.mxu0 %v4295_v51  ;;  %v220_v9 = vld [vmem:[#allocation9 + $0x1a8] sm:$0xff]  ;;  %v222_v11 = vld [vmem:[#allocation9 + $0x1b8] sm:$0xff]  ;;  %v4335_v13 = vpack.c.bf16 %v213_v7, %v209_v5  ;;  %v215_v15 = vld [vmem:[#allocation9 + $0x180] sm:$0xff] }
  0xc5   :  { %4328 = vmatpush1.bf16.msra.mxu1 %v4327_v52  ;;  %4298 = vmatprep.subr.bf16.mxu0 %v4297_v53  ;;  %v4305_v14 = vpack.c.bf16 %v220_v9, %v216_v8  ;;  %v219_v16 = vld [vmem:[#allocation9 + $0x1a0] sm:$0xff]  ;;  %v217_v17 = vld [vmem:[#allocation9 + $0x190] sm:$0xff]  ;;  %v4337_v18 = vpack.c.bf16 %v222_v11, %v218_v10  ;;  %v224_v20 = vld [vmem:[#allocation9 + $0x1c8] sm:$0xff] }
  0xc6   :  { %4330 = vmatprep.subr.bf16.mxu1 %v4329_v57  ;;  %v221_v19 = vld [vmem:[#allocation9 + $0x1b0] sm:$0xff]  ;;  %v228_v21 = vld [vmem:[#allocation9 + $0x1e8] sm:$0xff]  ;;  %v226_v22 = vld [vmem:[#allocation9 + $0x1d8] sm:$0xff]  ;;  %v4307_v24 = vpack.c.bf16 %v219_v16, %v215_v15 }
  0xc7   :  { %v230_v23 = vld [vmem:[#allocation9 + $0x1f8] sm:$0xff]  ;;  %v4339_v25 = vpack.c.bf16 %v221_v19, %v217_v17  ;;  %v4309_v26 = vpack.c.bf16 %v228_v21, %v224_v20  ;;  %v223_v27 = vld [vmem:[#allocation9 + $0x1c0] sm:$0xff]  ;;  %v225_v29 = vld [vmem:[#allocation9 + $0x1d0] sm:$0xff] }
  0xc8   :  { %4300 = vmatpush1.bf16.msra.mxu0 %v4299_v63  ;;  %v227_v28 = vld [vmem:[#allocation9 + $0x1e0] sm:$0xff]  ;;  %v4341_v30 = vpack.c.bf16 %v230_v23, %v226_v22  ;;  %v229_v31 = vld [vmem:[#allocation9 + $0x1f0] sm:$0xff]  ;;  %v6431_v48 = vld [vmem:[#allocation4] sm:$0xff] }
  0xc9   :  { %4332 = vmatpush1.bf16.msra.mxu1 %v4331_v1  ;;  %4302 = vmatprep.subr.bf16.mxu0 %v4301_v2  ;;  %v396_v32 = vld [vmem:[#allocation15 + $0x8] sm:$0xff]  ;;  %v398_v34 = vld [vmem:[#allocation15 + $0x18] sm:$0xff]  ;;  %v4311_v36 = vpack.c.bf16 %v227_v28, %v223_v27  ;;  %v4343_v37 = vpack.c.bf16 %v229_v31, %v225_v29  ;;  %v395_v39 = vld [vmem:[#allocation15] sm:$0xff] }
  0xca   :  { %4334 = vmatprep.subr.bf16.mxu1 %v4333_v6  ;;  %v400_v33 = vld [vmem:[#allocation15 + $0x28] sm:$0xff]  ;;  %v402_v35 = vld [vmem:[#allocation15 + $0x38] sm:$0xff]  ;;  %v399_v40 = vld [vmem:[#allocation15 + $0x20] sm:$0xff] }
  0xcb   :  { %v4345_v38 = vpack.c.bf16 %v400_v33, %v396_v32  ;;  %v397_v41 = vld [vmem:[#allocation15 + $0x10] sm:$0xff]  ;;  %v4377_v42 = vpack.c.bf16 %v402_v35, %v398_v34  ;;  %v404_v44 = vld [vmem:[#allocation15 + $0x48] sm:$0xff]  ;;  %v406_v46 = vld [vmem:[#allocation15 + $0x58] sm:$0xff]  ;;  %v4347_v49 = vpack.c.bf16 %v399_v40, %v395_v39 }
  0xcc   :  { %4304 = vmatpush1.bf16.msra.mxu0 %v4303_v12  ;;  %v401_v43 = vld [vmem:[#allocation15 + $0x30] sm:$0xff]  ;;  %v408_v45 = vld [vmem:[#allocation15 + $0x68] sm:$0xff]  ;;  %v410_v47 = vld [vmem:[#allocation15 + $0x78] sm:$0xff] }
  0xcd   :  { %4336 = vmatpush1.bf16.msra.mxu1 %v4335_v13  ;;  %4306 = vmatprep.subr.bf16.mxu0 %v4305_v14  ;;  %v4379_v50 = vpack.c.bf16 %v401_v43, %v397_v41  ;;  %v4349_v51 = vpack.c.bf16 %v408_v45, %v404_v44  ;;  %v403_v52 = vld [vmem:[#allocation15 + $0x40] sm:$0xff]  ;;  %v405_v54 = vld [vmem:[#allocation15 + $0x50] sm:$0xff]  ;;  %v4381_v55 = vpack.c.bf16 %v410_v47, %v406_v46  ;;  %v412_v57 = vld [vmem:[#allocation15 + $0x88] sm:$0xff] }
  0xce   :  { %4338 = vmatprep.subr.bf16.mxu1 %v4337_v18  ;;  %v407_v53 = vld [vmem:[#allocation15 + $0x60] sm:$0xff]  ;;  %v409_v56 = vld [vmem:[#allocation15 + $0x70] sm:$0xff]  ;;  %v416_v58 = vld [vmem:[#allocation15 + $0xa8] sm:$0xff] }
  0xcf   :  { %v414_v59 = vld [vmem:[#allocation15 + $0x98] sm:$0xff]  ;;  %v4351_v61 = vpack.c.bf16 %v407_v53, %v403_v52  ;;  %v4383_v62 = vpack.c.bf16 %v409_v56, %v405_v54  ;;  %v4353_v63 = vpack.c.bf16 %v416_v58, %v412_v57  ;;  %v411_v1 = vld [vmem:[#allocation15 + $0x80] sm:$0xff]  ;;  %v413_v3 = vld [vmem:[#allocation15 + $0x90] sm:$0xff] }
  0xd0   :  { %4308 = vmatpush1.bf16.msra.mxu0 %v4307_v24  ;;  %v418_v60 = vld [vmem:[#allocation15 + $0xb8] sm:$0xff]  ;;  %v415_v2 = vld [vmem:[#allocation15 + $0xa0] sm:$0xff]  ;;  %v417_v5 = vld [vmem:[#allocation15 + $0xb0] sm:$0xff] }
  0xd1   :  { %4340 = vmatpush1.bf16.msra.mxu1 %v4339_v25  ;;  %4310 = vmatprep.subr.bf16.mxu0 %v4309_v26  ;;  %v4385_v4 = vpack.c.bf16 %v418_v60, %v414_v59  ;;  %v420_v6 = vld [vmem:[#allocation15 + $0xc8] sm:$0xff]  ;;  %v422_v8 = vld [vmem:[#allocation15 + $0xd8] sm:$0xff]  ;;  %v4355_v10 = vpack.c.bf16 %v415_v2, %v411_v1  ;;  %v4387_v11 = vpack.c.bf16 %v417_v5, %v413_v3  ;;  %v419_v13 = vld [vmem:[#allocation15 + $0xc0] sm:$0xff] }
  0xd2   :  { %4342 = vmatprep.subr.bf16.mxu1 %v4341_v30  ;;  %v424_v7 = vld [vmem:[#allocation15 + $0xe8] sm:$0xff]  ;;  %v426_v9 = vld [vmem:[#allocation15 + $0xf8] sm:$0xff]  ;;  %v423_v14 = vld [vmem:[#allocation15 + $0xe0] sm:$0xff] }
  0xd3   :  { %v4357_v12 = vpack.c.bf16 %v424_v7, %v420_v6  ;;  %v421_v15 = vld [vmem:[#allocation15 + $0xd0] sm:$0xff]  ;;  %v4389_v16 = vpack.c.bf16 %v426_v9, %v422_v8  ;;  %v428_v18 = vld [vmem:[#allocation15 + $0x108] sm:$0xff]  ;;  %v430_v20 = vld [vmem:[#allocation15 + $0x118] sm:$0xff]  ;;  %v4359_v22 = vpack.c.bf16 %v423_v14, %v419_v13 }
  0xd4   :  { %4312 = vmatpush1.bf16.msra.mxu0 %v4311_v36  ;;  %v425_v17 = vld [vmem:[#allocation15 + $0xf0] sm:$0xff]  ;;  %v432_v19 = vld [vmem:[#allocation15 + $0x128] sm:$0xff]  ;;  %v434_v21 = vld [vmem:[#allocation15 + $0x138] sm:$0xff] }
  0xd5   :  { %4344 = vmatpush1.bf16.msra.mxu1 %v4343_v37  ;;  %4346 = vmatprep.subr.bf16.mxu0 %v4345_v38  ;;  %v4391_v23 = vpack.c.bf16 %v425_v17, %v421_v15  ;;  %v4361_v24 = vpack.c.bf16 %v432_v19, %v428_v18  ;;  %v427_v25 = vld [vmem:[#allocation15 + $0x100] sm:$0xff]  ;;  %v429_v27 = vld [vmem:[#allocation15 + $0x110] sm:$0xff]  ;;  %v4393_v28 = vpack.c.bf16 %v434_v21, %v430_v20  ;;  %v436_v30 = vld [vmem:[#allocation15 + $0x148] sm:$0xff] }
  0xd6   :  { %4378 = vmatprep.subr.bf16.mxu1 %v4377_v42  ;;  %v431_v26 = vld [vmem:[#allocation15 + $0x120] sm:$0xff]  ;;  %v433_v29 = vld [vmem:[#allocation15 + $0x130] sm:$0xff]  ;;  %v440_v31 = vld [vmem:[#allocation15 + $0x168] sm:$0xff] }
  0xd7   :  { %318 = vmatmul.mubr.f32.vlgmr.msra.gmra.mrb[0].mxu0 %v6431_v48  ;;  %v438_v32 = vld [vmem:[#allocation15 + $0x158] sm:$0xff]  ;;  %v4363_v34 = vpack.c.bf16 %v431_v26, %v427_v25  ;;  %v4395_v35 = vpack.c.bf16 %v433_v29, %v429_v27  ;;  %v4365_v36 = vpack.c.bf16 %v440_v31, %v436_v30  ;;  %v435_v37 = vld [vmem:[#allocation15 + $0x140] sm:$0xff]  ;;  %v437_v39 = vld [vmem:[#allocation15 + $0x150] sm:$0xff] }
  0xd8   :  { %389 = vmatmul.mubr.f32.vlgmr.msra.gmra.mrb[0].mxu1 %v6431_v48  ;;  %4348 = vmatpush1.bf16.msra.mxu0 %v4347_v49  ;;  %v442_v33 = vld [vmem:[#allocation15 + $0x178] sm:$0xff]  ;;  %v439_v38 = vld [vmem:[#allocation15 + $0x160] sm:$0xff]  ;;  %v441_v41 = vld [vmem:[#allocation15 + $0x170] sm:$0xff] }
  0xd9   :  { %4380 = vmatpush1.bf16.msra.mxu1 %v4379_v50  ;;  %4350 = vmatprep.subr.bf16.mxu0 %v4349_v51  ;;  %v4397_v40 = vpack.c.bf16 %v442_v33, %v438_v32  ;;  %v444_v42 = vld [vmem:[#allocation15 + $0x188] sm:$0xff]  ;;  %v446_v44 = vld [vmem:[#allocation15 + $0x198] sm:$0xff]  ;;  %v4367_v46 = vpack.c.bf16 %v439_v38, %v435_v37  ;;  %v4399_v47 = vpack.c.bf16 %v441_v41, %v437_v39  ;;  %v443_v50 = vld [vmem:[#allocation15 + $0x180] sm:$0xff] }
  0xda   :  { %4382 = vmatprep.subr.bf16.mxu1 %v4381_v55  ;;  %545 = vmatprep.mubr.f32.mxu0 %v6231_v0  ;;  %v448_v43 = vld [vmem:[#allocation15 + $0x1a8] sm:$0xff]  ;;  %v450_v45 = vld [vmem:[#allocation15 + $0x1b8] sm:$0xff]  ;;  %v447_v51 = vld [vmem:[#allocation15 + $0x1a0] sm:$0xff] }
  0xdb   :  { %616 = vmatprep.mubr.f32.mxu1 %v6231_v0  ;;  %v4369_v49 = vpack.c.bf16 %v448_v43, %v444_v42  ;;  %v445_v52 = vld [vmem:[#allocation15 + $0x190] sm:$0xff]  ;;  %v4401_v53 = vpack.c.bf16 %v450_v45, %v446_v44  ;;  %v452_v55 = vld [vmem:[#allocation15 + $0x1c8] sm:$0xff]  ;;  %v454_v57 = vld [vmem:[#allocation15 + $0x1d8] sm:$0xff]  ;;  %v4371_v59 = vpack.c.bf16 %v447_v51, %v443_v50 }
  0xdc   :  { %4352 = vmatpush1.bf16.msra.mxu0 %v4351_v61  ;;  %v449_v54 = vld [vmem:[#allocation15 + $0x1b0] sm:$0xff]  ;;  %v456_v56 = vld [vmem:[#allocation15 + $0x1e8] sm:$0xff]  ;;  %v458_v58 = vld [vmem:[#allocation15 + $0x1f8] sm:$0xff] }
  0xdd   :  { %4384 = vmatpush1.bf16.msra.mxu1 %v4383_v62  ;;  %4354 = vmatprep.subr.bf16.mxu0 %v4353_v63  ;;  %v4403_v60 = vpack.c.bf16 %v449_v54, %v445_v52  ;;  %v4373_v61 = vpack.c.bf16 %v456_v56, %v452_v55  ;;  %v451_v62 = vld [vmem:[#allocation15 + $0x1c0] sm:$0xff]  ;;  %v453_v1 = vld [vmem:[#allocation15 + $0x1d0] sm:$0xff]  ;;  %v4405_v2 = vpack.c.bf16 %v458_v58, %v454_v57 }
  0xde   :  { %4386 = vmatprep.subr.bf16.mxu1 %v4385_v4  ;;  %v455_v63 = vld [vmem:[#allocation15 + $0x1e0] sm:$0xff]  ;;  %v457_v3 = vld [vmem:[#allocation15 + $0x1f0] sm:$0xff] }
  0xdf   :  { %v632_v4 = vld [vmem:[#allocation10 + $0x8] sm:$0xff]  ;;  %v634_v6 = vld [vmem:[#allocation10 + $0x18] sm:$0xff]  ;;  %v4375_v8 = vpack.c.bf16 %v455_v63, %v451_v62  ;;  %v4407_v9 = vpack.c.bf16 %v457_v3, %v453_v1  ;;  %v633_v13 = vld [vmem:[#allocation10 + $0x10] sm:$0xff] }
  0xe0   :  { %4356 = vmatpush1.bf16.msra.mxu0 %v4355_v10  ;;  %v636_v5 = vld [vmem:[#allocation10 + $0x28] sm:$0xff]  ;;  %v638_v7 = vld [vmem:[#allocation10 + $0x38] sm:$0xff]  ;;  %v637_v15 = vld [vmem:[#allocation10 + $0x30] sm:$0xff] }
  0xe1   :  { %4388 = vmatpush1.bf16.msra.mxu1 %v4387_v11  ;;  %4358 = vmatprep.subr.bf16.mxu0 %v4357_v12  ;;  %v4409_v10 = vpack.c.bf16 %v636_v5, %v632_v4  ;;  %v631_v11 = vld [vmem:[#allocation10] sm:$0xff]  ;;  %v4441_v14 = vpack.c.bf16 %v638_v7, %v634_v6  ;;  %v644_v17 = vld [vmem:[#allocation10 + $0x68] sm:$0xff]  ;;  %v642_v18 = vld [vmem:[#allocation10 + $0x58] sm:$0xff]  ;;  %v4443_v21 = vpack.c.bf16 %v637_v15, %v633_v13 }
  0xe2   :  { %4390 = vmatprep.subr.bf16.mxu1 %v4389_v16  ;;  %v635_v12 = vld [vmem:[#allocation10 + $0x20] sm:$0xff]  ;;  %v640_v16 = vld [vmem:[#allocation10 + $0x48] sm:$0xff]  ;;  %v646_v19 = vld [vmem:[#allocation10 + $0x78] sm:$0xff] }
  0xe3   :  { %v4411_v20 = vpack.c.bf16 %v635_v12, %v631_v11  ;;  %v641_v25 = vld [vmem:[#allocation10 + $0x50] sm:$0xff]  ;;  %v4445_v26 = vpack.c.bf16 %v646_v19, %v642_v18  ;;  %v652_v29 = vld [vmem:[#allocation10 + $0xa8] sm:$0xff]  ;;  %v650_v30 = vld [vmem:[#allocation10 + $0x98] sm:$0xff] }
  0xe4   :  { %4360 = vmatpush1.bf16.msra.mxu0 %v4359_v22  ;;  %v4413_v22 = vpack.c.bf16 %v644_v17, %v640_v16  ;;  %v645_v27 = vld [vmem:[#allocation10 + $0x70] sm:$0xff]  ;;  %v654_v31 = vld [vmem:[#allocation10 + $0xb8] sm:$0xff]  ;;  %v660_v41 = vld [vmem:[#allocation10 + $0xe8] sm:$0xff] }
  0xe5   :  { %4392 = vmatpush1.bf16.msra.mxu1 %v4391_v23  ;;  %4362 = vmatprep.subr.bf16.mxu0 %v4361_v24  ;;  %v639_v23 = vld [vmem:[#allocation10 + $0x40] sm:$0xff]  ;;  %v4447_v33 = vpack.c.bf16 %v645_v27, %v641_v25  ;;  %v649_v37 = vld [vmem:[#allocation10 + $0x90] sm:$0xff]  ;;  %v4449_v38 = vpack.c.bf16 %v654_v31, %v650_v30  ;;  %v658_v42 = vld [vmem:[#allocation10 + $0xd8] sm:$0xff] }
  0xe6   :  { %4394 = vmatprep.subr.bf16.mxu1 %v4393_v28  ;;  %v643_v24 = vld [vmem:[#allocation10 + $0x60] sm:$0xff]  ;;  %v648_v28 = vld [vmem:[#allocation10 + $0x88] sm:$0xff]  ;;  %v653_v39 = vld [vmem:[#allocation10 + $0xb0] sm:$0xff] }
  0xe7   :  { %v4415_v32 = vpack.c.bf16 %v643_v24, %v639_v23  ;;  %v662_v43 = vld [vmem:[#allocation10 + $0xf8] sm:$0xff]  ;;  %v4451_v44 = vpack.c.bf16 %v653_v39, %v649_v37  ;;  %v661_v51 = vld [vmem:[#allocation10 + $0xf0] sm:$0xff]  ;;  %v664_v52 = vld [vmem:[#allocation10 + $0x108] sm:$0xff] }
  0xe8   :  { %4364 = vmatpush1.bf16.msra.mxu0 %v4363_v34  ;;  %v4417_v34 = vpack.c.bf16 %v652_v29, %v648_v28  ;;  %v4453_v50 = vpack.c.bf16 %v662_v43, %v658_v42  ;;  %v666_v54 = vld [vmem:[#allocation10 + $0x118] sm:$0xff]  ;;  %v669_v63 = vld [vmem:[#allocation10 + $0x130] sm:$0xff]  ;;  %v672_v1 = vld [vmem:[#allocation10 + $0x148] sm:$0xff] }
  0xe9   :  { %4396 = vmatpush1.bf16.msra.mxu1 %v4395_v35  ;;  %4366 = vmatprep.subr.bf16.mxu0 %v4365_v36  ;;  %v647_v35 = vld [vmem:[#allocation10 + $0x80] sm:$0xff]  ;;  %v670_v55 = vld [vmem:[#allocation10 + $0x138] sm:$0xff]  ;;  %v677_v12 = vld [vmem:[#allocation10 + $0x170] sm:$0xff] }
  0xea   :  { %4398 = vmatprep.subr.bf16.mxu1 %v4397_v40  ;;  %v651_v36 = vld [vmem:[#allocation10 + $0xa0] sm:$0xff]  ;;  %v656_v40 = vld [vmem:[#allocation10 + $0xc8] sm:$0xff]  ;;  %v4457_v62 = vpack.c.bf16 %v670_v55, %v666_v54  ;;  %v674_v3 = vld [vmem:[#allocation10 + $0x158] sm:$0xff] }
  0xeb   :  { %v4421_v45 = vpack.c.bf16 %v660_v41, %v656_v40  ;;  %v678_v4 = vld [vmem:[#allocation10 + $0x178] sm:$0xff]  ;;  %v680_v13 = vld [vmem:[#allocation10 + $0x188] sm:$0xff]  ;;  %v685_v24 = vld [vmem:[#allocation10 + $0x1b0] sm:$0xff] }
  0xec   :  { %4368 = vmatpush1.bf16.msra.mxu0 %v4367_v46  ;;  %v655_v46 = vld [vmem:[#allocation10 + $0xc0] sm:$0xff]  ;;  %v4461_v11 = vpack.c.bf16 %v678_v4, %v674_v3  ;;  %v682_v15 = vld [vmem:[#allocation10 + $0x198] sm:$0xff]  ;;  %v688_v25 = vld [vmem:[#allocation10 + $0x1c8] sm:$0xff] }
  0xed   :  { %4400 = vmatpush1.bf16.msra.mxu1 %v4399_v47  ;;  %4370 = vmatprep.subr.bf16.mxu0 %v4369_v49  ;;  %v659_v47 = vld [vmem:[#allocation10 + $0xe0] sm:$0xff]  ;;  %v657_v49 = vld [vmem:[#allocation10 + $0xd0] sm:$0xff]  ;;  %v686_v16 = vld [vmem:[#allocation10 + $0x1b8] sm:$0xff] }
  0xee   :  { %4402 = vmatprep.subr.bf16.mxu1 %v4401_v53  ;;  %v668_v53 = vld [vmem:[#allocation10 + $0x128] sm:$0xff]  ;;  %v4423_v56 = vpack.c.bf16 %v659_v47, %v655_v46  ;;  %v4455_v57 = vpack.c.bf16 %v661_v51, %v657_v49  ;;  %v4465_v23 = vpack.c.bf16 %v686_v16, %v682_v15  ;;  %v690_v27 = vld [vmem:[#allocation10 + $0x1d8] sm:$0xff]  ;;  %v955_v46 = vld [vmem:[#allocation12 + $0x10] sm:$0xff] }
  0xef   :  { %v4425_v58 = vpack.c.bf16 %v668_v53, %v664_v52  ;;  %v694_v28 = vld [vmem:[#allocation10 + $0x1f8] sm:$0xff]  ;;  %v954_v37 = vld [vmem:[#allocation12 + $0x8] sm:$0xff]  ;;  %v959_v47 = vld [vmem:[#allocation12 + $0x30] sm:$0xff] }
  0xf0   :  { %4372 = vmatpush1.bf16.msra.mxu0 %v4371_v59  ;;  %v663_v59 = vld [vmem:[#allocation10 + $0x100] sm:$0xff]  ;;  %v956_v39 = vld [vmem:[#allocation12 + $0x18] sm:$0xff]  ;;  %v962_v49 = vld [vmem:[#allocation12 + $0x48] sm:$0xff]  ;;  %v6448_v55 = vpack.c.bf16 %v959_v47, %v955_v46 }
  0xf1   :  { %4404 = vmatpush1.bf16.msra.mxu1 %v4403_v60  ;;  %4374 = vmatprep.subr.bf16.mxu0 %v4373_v61  ;;  %v667_v60 = vld [vmem:[#allocation10 + $0x120] sm:$0xff]  ;;  %v665_v61 = vld [vmem:[#allocation10 + $0x110] sm:$0xff]  ;;  %v960_v40 = vld [vmem:[#allocation12 + $0x38] sm:$0xff] }
  0xf2   :  { %4406 = vmatprep.subr.bf16.mxu1 %v4405_v2  ;;  %v676_v2 = vld [vmem:[#allocation10 + $0x168] sm:$0xff]  ;;  %v4427_v5 = vpack.c.bf16 %v667_v60, %v663_v59  ;;  %v4459_v6 = vpack.c.bf16 %v669_v63, %v665_v61  ;;  %v623_v51 = vld [vmem:[#allocation7] sm:$0xff]  ;;  %v964_v53 = vld [vmem:[#allocation12 + $0x58] sm:$0xff] }
  0xf3   :  { %v4429_v7 = vpack.c.bf16 %v676_v2, %v672_v1  ;;  %v968_v54 = vld [vmem:[#allocation12 + $0x78] sm:$0xff]  ;;  %v963_v59 = vld [vmem:[#allocation12 + $0x50] sm:$0xff]  ;;  %v974_v63 = vld [vmem:[#allocation12 + $0xa8] sm:$0xff] }
  0xf4   :  { %4376 = vmatpush1.bf16.msra.mxu0 %v4375_v8  ;;  %v671_v8 = vld [vmem:[#allocation10 + $0x140] sm:$0xff]  ;;  %v967_v60 = vld [vmem:[#allocation12 + $0x70] sm:$0xff]  ;;  %v6453_v61 = vpack.c.bf16 %v968_v54, %v964_v53  ;;  %v624_v1 = vld [vmem:[#allocation7 + $0x8] sm:$0xff] }
  0xf5   :  { %4408 = vmatpush1.bf16.msra.mxu1 %v4407_v9  ;;  %4410 = vmatprep.subr.bf16.mxu0 %v4409_v10  ;;  %v675_v9 = vld [vmem:[#allocation10 + $0x160] sm:$0xff]  ;;  %v673_v10 = vld [vmem:[#allocation10 + $0x150] sm:$0xff]  ;;  %v972_v3 = vld [vmem:[#allocation12 + $0x98] sm:$0xff] }
  0xf6   :  { %4442 = vmatprep.subr.bf16.mxu1 %v4441_v14  ;;  %v684_v14 = vld [vmem:[#allocation10 + $0x1a8] sm:$0xff]  ;;  %v4431_v17 = vpack.c.bf16 %v675_v9, %v671_v8  ;;  %v4463_v18 = vpack.c.bf16 %v677_v12, %v673_v10  ;;  %v976_v4 = vld [vmem:[#allocation12 + $0xb8] sm:$0xff]  ;;  %v971_v9 = vld [vmem:[#allocation12 + $0x90] sm:$0xff] }
  0xf7   :  { %546 = vmatmul.mubr.f32.vlgmr.msra.gmra.mrb[2].mxu0 %v6431_v48  ;;  %v4433_v19 = vpack.c.bf16 %v684_v14, %v680_v13  ;;  %v975_v10 = vld [vmem:[#allocation12 + $0xb0] sm:$0xff]  ;;  %v978_v12 = vld [vmem:[#allocation12 + $0xc8] sm:$0xff]  ;;  %v980_v16 = vld [vmem:[#allocation12 + $0xd8] sm:$0xff] }
  0xf8   :  { %617 = vmatmul.mubr.f32.vlgmr.msra.gmra.mrb[2].mxu1 %v6431_v48  ;;  %4412 = vmatpush1.bf16.msra.mxu0 %v4411_v20  ;;  %v4419_v48 = vpack.c.bf16 %v651_v36, %v647_v35  ;;  %v679_v20 = vld [vmem:[#allocation10 + $0x180] sm:$0xff]  ;;  %v4469_v35 = vpack.c.bf16 %v694_v28, %v690_v27  ;;  %v693_v36 = vld [vmem:[#allocation10 + $0x1f0] sm:$0xff]  ;;  %v982_v13 = vld [vmem:[#allocation12 + $0xe8] sm:$0xff] }
  0xf9   :  { %4444 = vmatpush1.bf16.msra.mxu1 %v4443_v21  ;;  %4414 = vmatprep.subr.bf16.mxu0 %v4413_v22  ;;  %v683_v21 = vld [vmem:[#allocation10 + $0x1a0] sm:$0xff]  ;;  %v681_v22 = vld [vmem:[#allocation10 + $0x190] sm:$0xff]  ;;  %v626_v27 = vld [vmem:[#allocation7 + $0x18] sm:$0xff] }
  0xfa   :  { %4446 = vmatprep.subr.bf16.mxu1 %v4445_v26  ;;  %759 = vmatprep.mubr.f32.mxu0 %v6231_v0  ;;  %v692_v26 = vld [vmem:[#allocation10 + $0x1e8] sm:$0xff]  ;;  %v4435_v29 = vpack.c.bf16 %v683_v21, %v679_v20  ;;  %v4467_v30 = vpack.c.bf16 %v685_v24, %v681_v22  ;;  %v625_v14 = vld [vmem:[#allocation7 + $0x10] sm:$0xff]  ;;  %v981_v20 = vld [vmem:[#allocation12 + $0xe0] sm:$0xff]  ;;  %v6478_v21 = vpack.c.bf16 %v982_v13, %v978_v12 }
  0xfb   :  { %872 = vmatprep.mubr.f32.mxu1 %v6231_v0  ;;  %v4437_v31 = vpack.c.bf16 %v692_v26, %v688_v25  ;;  %v979_v22 = vld [vmem:[#allocation12 + $0xd0] sm:$0xff]  ;;  %v986_v25 = vld [vmem:[#allocation12 + $0x108] sm:$0xff]  ;;  %v993_v46 = vld [vmem:[#allocation12 + $0x140] sm:$0xff] }
  0xfc   :  { %4416 = vmatpush1.bf16.msra.mxu0 %v4415_v32  ;;  %v687_v32 = vld [vmem:[#allocation10 + $0x1c0] sm:$0xff]  ;;  %v990_v26 = vld [vmem:[#allocation12 + $0x128] sm:$0xff]  ;;  %v629_v13 = vld [vmem:[#allocation7 + $0x30] sm:$0xff] }
  0xfd   :  { %4448 = vmatpush1.bf16.msra.mxu1 %v4447_v33  ;;  %4418 = vmatprep.subr.bf16.mxu0 %v4417_v34  ;;  %v691_v33 = vld [vmem:[#allocation10 + $0x1e0] sm:$0xff]  ;;  %v689_v34 = vld [vmem:[#allocation10 + $0x1d0] sm:$0xff]  ;;  %v1002_v54 = vld [vmem:[#allocation12 + $0x188] sm:$0xff] }
  0xfe   :  { %4450 = vmatprep.subr.bf16.mxu1 %v4449_v38  ;;  %v958_v38 = vld [vmem:[#allocation12 + $0x28] sm:$0xff]  ;;  %v4439_v41 = vpack.c.bf16 %v691_v33, %v687_v32  ;;  %v4471_v42 = vpack.c.bf16 %v693_v36, %v689_v34  ;;  %v985_v32 = vld [vmem:[#allocation12 + $0x100] sm:$0xff]  ;;  %v6492_v34 = vpack.c.bf16 %v990_v26, %v986_v25  ;;  %v991_v36 = vld [vmem:[#allocation12 + $0x130] sm:$0xff] }
  0xff   :  { %v6441_v43 = vpack.c.bf16 %v958_v38, %v954_v37  ;;  %v989_v33 = vld [vmem:[#allocation12 + $0x120] sm:$0xff]  ;;  %v994_v38 = vld [vmem:[#allocation12 + $0x148] sm:$0xff]  ;;  %v1011_v25 = vld [vmem:[#allocation12 + $0x1d0] sm:$0xff] }
 0x100   :  { %4420 = vmatpush1.bf16.msra.mxu0 %v4419_v48  ;;  %v953_v48 = vld [vmem:[#allocation12] sm:$0xff]  ;;  %v1014_v12 = vld [vmem:[#allocation12 + $0x1e8] sm:$0xff]  ;;  %v1015_v26 = vld [vmem:[#allocation12 + $0x1f0] sm:$0xff] }
 0x101   :  { %4452 = vmatpush1.bf16.msra.mxu1 %v4451_v44  ;;  %4422 = vmatprep.subr.bf16.mxu0 %v4421_v45  ;;  %v957_v44 = vld [vmem:[#allocation12 + $0x20] sm:$0xff]  ;;  %v6443_v45 = vpack.c.bf16 %v960_v40, %v956_v39  ;;  %v998_v39 = vld [vmem:[#allocation12 + $0x168] sm:$0xff] }
 0x102   :  { %4454 = vmatprep.subr.bf16.mxu1 %v4453_v50  ;;  %v966_v50 = vld [vmem:[#allocation12 + $0x68] sm:$0xff]  ;;  %v6445_v52 = vpack.c.bf16 %v957_v44, %v953_v48  ;;  %v627_v40 = vld [vmem:[#allocation7 + $0x20] sm:$0xff]  ;;  %v1000_v48 = vld [vmem:[#allocation12 + $0x178] sm:$0xff] }
 0x103   :  { %v997_v47 = vld [vmem:[#allocation12 + $0x160] sm:$0xff] }
 0x104   :  { %4424 = vmatpush1.bf16.msra.mxu0 %v4423_v56  ;;  %v961_v56 = vld [vmem:[#allocation12 + $0x40] sm:$0xff] }
 0x105   :  { %4456 = vmatpush1.bf16.msra.mxu1 %v4455_v57  ;;  %4426 = vmatprep.subr.bf16.mxu0 %v4425_v58  ;;  %v965_v57 = vld [vmem:[#allocation12 + $0x60] sm:$0xff]  ;;  %v6451_v58 = vpack.c.bf16 %v966_v50, %v962_v49  ;;  %v6506_v49 = vpack.c.bf16 %v998_v39, %v994_v38  ;;  %v995_v50 = vld [vmem:[#allocation12 + $0x150] sm:$0xff]  ;;  %v233_v39 = vlaneseq }
 0x106   :  { %4458 = vmatprep.subr.bf16.mxu1 %v4457_v62  ;;  %v970_v62 = vld [vmem:[#allocation12 + $0x88] sm:$0xff]  ;;  %v6456_v2 = vpack.c.bf16 %v965_v57, %v961_v56 }
 0x107   :  { %v6464_v8 = vpack.c.bf16 %v974_v63, %v970_v62  ;;  %v1006_v56 = vld [vmem:[#allocation12 + $0x1a8] sm:$0xff]  ;;  %v1008_v62 = vld [vmem:[#allocation12 + $0x1b8] sm:$0xff] }
 0x108   :  { %4428 = vmatpush1.bf16.msra.mxu0 %v4427_v5  ;;  %v6460_v5 = vpack.c.bf16 %v967_v60, %v963_v59  ;;  %v628_v57 = vld [vmem:[#allocation7 + $0x28] sm:$0xff]  ;;  %v6512_v59 = vpack.c.bf16 %v997_v47, %v993_v46  ;;  %v1004_v60 = vld [vmem:[#allocation12 + $0x198] sm:$0xff] }
 0x109   :  { %4460 = vmatpush1.bf16.msra.mxu1 %v4459_v6  ;;  %4430 = vmatprep.subr.bf16.mxu0 %v4429_v7  ;;  %v969_v6 = vld [vmem:[#allocation12 + $0x80] sm:$0xff] }
 0x10a   :  { %4462 = vmatprep.subr.bf16.mxu1 %v4461_v11  ;;  %v973_v7 = vld [vmem:[#allocation12 + $0xa0] sm:$0xff]  ;;  %v6467_v11 = vpack.c.bf16 %v976_v4, %v972_v3  ;;  %v6520_v4 = vpack.c.bf16 %v1006_v56, %v1002_v54 }
 0x10b   :  { %v6470_v15 = vpack.c.bf16 %v973_v7, %v969_v6  ;;  %v1005_v3 = vld [vmem:[#allocation12 + $0x1a0] sm:$0xff]  ;;  %v1003_v6 = vld [vmem:[#allocation12 + $0x190] sm:$0xff] }
 0x10c   :  { %4432 = vmatpush1.bf16.msra.mxu0 %v4431_v17  ;;  %v984_v17 = vld [vmem:[#allocation12 + $0xf8] sm:$0xff]  ;;  %v1007_v7 = vld [vmem:[#allocation12 + $0x1b0] sm:$0xff] }
 0x10d   :  { %4464 = vmatpush1.bf16.msra.mxu1 %v4463_v18  ;;  %4434 = vmatprep.subr.bf16.mxu0 %v4433_v19  ;;  %v6474_v18 = vpack.c.bf16 %v975_v10, %v971_v9  ;;  %v977_v19 = vld [vmem:[#allocation12 + $0xc0] sm:$0xff]  ;;  %v6481_v24 = vpack.c.bf16 %v984_v17, %v980_v16  ;;  %v6523_v9 = vpack.c.bf16 %v1008_v62, %v1004_v60  ;;  %v1010_v10 = vld [vmem:[#allocation12 + $0x1c8] sm:$0xff]  ;;  %v1012_v16 = vld [vmem:[#allocation12 + $0x1d8] sm:$0xff] }
 0x10e   :  { %4466 = vmatprep.subr.bf16.mxu1 %v4465_v23  ;;  %v983_v23 = vld [vmem:[#allocation12 + $0xf0] sm:$0xff]  ;;  %v6484_v28 = vpack.c.bf16 %v981_v20, %v977_v19  ;;  %v1016_v17 = vld [vmem:[#allocation12 + $0x1f8] sm:$0xff]  ;;  %v6530_v19 = vpack.c.bf16 %v1007_v7, %v1003_v6  ;;  %v1009_v20 = vld [vmem:[#allocation12 + $0x1c0] sm:$0xff] }
 0x110   :  { %4436 = vmatpush1.bf16.msra.mxu0 %v4435_v29  ;;  %v988_v29 = vld [vmem:[#allocation12 + $0x118] sm:$0xff] }
 0x111   :  { %4468 = vmatpush1.bf16.msra.mxu1 %v4467_v30  ;;  %4438 = vmatprep.subr.bf16.mxu0 %v4437_v31  ;;  %v992_v30 = vld [vmem:[#allocation12 + $0x138] sm:$0xff]  ;;  %v6488_v31 = vpack.c.bf16 %v983_v23, %v979_v22  ;;  %v1013_v22 = vld [vmem:[#allocation12 + $0x1e0] sm:$0xff]  ;;  %v6534_v23 = vpack.c.bf16 %v1014_v12, %v1010_v10 }
 0x112   :  { %4470 = vmatprep.subr.bf16.mxu1 %v4469_v35  ;;  %v987_v35 = vld [vmem:[#allocation12 + $0x110] sm:$0xff]  ;;  %v6495_v37 = vpack.c.bf16 %v992_v30, %v988_v29  ;;  %v630_v29 = vld [vmem:[#allocation7 + $0x38] sm:$0xff]  ;;  %v6540_v30 = vpack.c.bf16 %v1013_v22, %v1009_v20 }
 0x113   :  { %v6502_v44 = vpack.c.bf16 %v991_v36, %v987_v35 }
 0x114   :  { %4440 = vmatpush1.bf16.msra.mxu0 %v4439_v41  ;;  %v6498_v41 = vpack.c.bf16 %v989_v33, %v985_v32  ;;  %v6544_v32 = vpack.c.bf16 %v1015_v26, %v1011_v25 }
 0x115   :  { %4472 = vmatpush1.bf16.msra.mxu1 %v4471_v42  ;;  %4474 = vmatprep.subr.bf16.mxu0 %v6441_v43  ;;  %v996_v42 = vld [vmem:[#allocation12 + $0x158] sm:$0xff] }
 0x116   :  { %4506 = vmatprep.subr.bf16.mxu1 %v6443_v45  ;;  %v6509_v53 = vpack.c.bf16 %v1000_v48, %v996_v42  ;;  %v459_v42 = vld [vmem:[#allocation19] sm:$0xf] }
 0x117   :  { %760 = vmatmul.mubr.f32.vlgmr.msra.gmra.mrb[4].mxu0 %v623_v51 }
 0x118   :  { %873 = vmatmul.mubr.f32.vlgmr.msra.gmra.mrb[4].mxu1 %v623_v51  ;;  %4476 = vmatpush1.bf16.msra.mxu0 %v6445_v52  ;;  %v999_v51 = vld [vmem:[#allocation12 + $0x170] sm:$0xff] }
 0x119   :  { %4508 = vmatpush1.bf16.msra.mxu1 %v6448_v55  ;;  %765 = vmatprep.mubr.f32.mxu0 %v6231_v0  ;;  %v6516_v63 = vpack.c.bf16 %v999_v51, %v995_v50 }
 0x11a   :  { %878 = vmatprep.mubr.f32.mxu1 %v6231_v0  ;;  %4478 = vmatprep.subr.bf16.mxu0 %v6451_v58 }
 0x11b   :  { %766 = vmatmul.mubr.f32.gmra.mrb[6].mxu0 %v624_v1  ;;  %4510 = vmatprep.subr.bf16.mxu1 %v6453_v61 }
 0x11c   :  { %879 = vmatmul.mubr.f32.gmra.mrb[6].mxu1 %v624_v1  ;;  %4480 = vmatpush1.bf16.msra.mxu0 %v6456_v2  ;;  %v1001_v1 = vld [vmem:[#allocation12 + $0x180] sm:$0xff] }
 0x11d   :  { %4512 = vmatpush1.bf16.msra.mxu1 %v6460_v5  ;;  %771 = vmatprep.mubr.f32.mxu0 %v6231_v0 }
 0x11e   :  { %884 = vmatprep.mubr.f32.mxu1 %v6231_v0  ;;  %4482 = vmatprep.subr.bf16.mxu0 %v6464_v8 }
 0x11f   :  { %772 = vmatmul.mubr.f32.gmra.mrb[8].mxu0 %v625_v14  ;;  %4514 = vmatprep.subr.bf16.mxu1 %v6467_v11 }
 0x120   :  { %885 = vmatmul.mubr.f32.gmra.mrb[8].mxu1 %v625_v14  ;;  %4484 = vmatpush1.bf16.msra.mxu0 %v6470_v15  ;;  %v6526_v14 = vpack.c.bf16 %v1005_v3, %v1001_v1 }
 0x121   :  { %4516 = vmatpush1.bf16.msra.mxu1 %v6474_v18  ;;  %777 = vmatprep.mubr.f32.mxu0 %v6231_v0 }
 0x122   :  { %890 = vmatprep.mubr.f32.mxu1 %v6231_v0  ;;  %4486 = vmatprep.subr.bf16.mxu0 %v6478_v21 }
 0x123   :  { %778 = vmatmul.mubr.f32.gmra.mrb[10].mxu0 %v626_v27  ;;  %4518 = vmatprep.subr.bf16.mxu1 %v6481_v24 }
 0x124   :  { %891 = vmatmul.mubr.f32.gmra.mrb[10].mxu1 %v626_v27  ;;  %4488 = vmatpush1.bf16.msra.mxu0 %v6484_v28  ;;  %v6537_v27 = vpack.c.bf16 %v1016_v17, %v1012_v16 }
 0x125   :  { %4520 = vmatpush1.bf16.msra.mxu1 %v6488_v31  ;;  %783 = vmatprep.mubr.f32.mxu0 %v6231_v0 }
 0x126   :  { %896 = vmatprep.mubr.f32.mxu1 %v6231_v0  ;;  %4490 = vmatprep.subr.bf16.mxu0 %v6492_v34 }
 0x127   :  { %784 = vmatmul.mubr.f32.gmra.mrb[12].mxu0 %v627_v40  ;;  %4522 = vmatprep.subr.bf16.mxu1 %v6495_v37 }
 0x128   :  { %897 = vmatmul.mubr.f32.gmra.mrb[12].mxu1 %v627_v40  ;;  %4492 = vmatpush1.bf16.msra.mxu0 %v6498_v41  ;;  %v234_v40 = vshrl.u32 %v233_v39, 7 }
 0x129   :  { %4524 = vmatpush1.bf16.msra.mxu1 %v6502_v44  ;;  %789 = vmatprep.mubr.f32.mxu0 %v6231_v0 }
 0x12a   :  { %902 = vmatprep.mubr.f32.mxu1 %v6231_v0  ;;  %4494 = vmatprep.subr.bf16.mxu0 %v6506_v49  ;;  %v235_v48 = vsub.s32 0, %v234_v40  ;;  %v239_v46 = vsub.s32 1, %v234_v40  ;;  %v243_v47 = vsub.s32 2, %v234_v40  ;;  %v247_v50 = vsub.s32 3, %v234_v40 }
 0x12b   :  { %790 = vmatmul.mubr.f32.gmra.mrb[14].mxu0 %v628_v57  ;;  %4526 = vmatprep.subr.bf16.mxu1 %v6509_v53 }
 0x12c   :  { %903 = vmatmul.mubr.f32.gmra.mrb[14].mxu1 %v628_v57  ;;  %4496 = vmatpush1.bf16.msra.mxu0 %v6512_v59  ;;  %v464_v51 = vrot.slane %v459_v42, %v235_v48  ;;  %v468_v54 = vrot.slane %v459_v42, %v239_v46  ;;  %v472_v56 = vrot.slane %v459_v42, %v243_v47 }
 0x12d   :  { %4528 = vmatpush1.bf16.msra.mxu1 %v6516_v63  ;;  %795 = vmatprep.mubr.f32.mxu0 %v6231_v0  ;;  %v476_v57 = vrot.slane %v459_v42, %v247_v50 }
 0x12e   :  { %908 = vmatprep.mubr.f32.mxu1 %v6231_v0  ;;  %4498 = vmatprep.subr.bf16.mxu0 %v6520_v4 }
 0x12f   :  { %796 = vmatmul.mubr.f32.gmra.mrb[16].mxu0 %v629_v13  ;;  %4530 = vmatprep.subr.bf16.mxu1 %v6523_v9 }
 0x130   :  { %909 = vmatmul.mubr.f32.gmra.mrb[16].mxu1 %v629_v13  ;;  %4500 = vmatpush1.bf16.msra.mxu0 %v6526_v14  ;;  %v231_v13 = vld [vmem:[#allocation13] sm:$0xf] }
 0x131   :  { %4532 = vmatpush1.bf16.msra.mxu1 %v6530_v19  ;;  %801 = vmatprep.mubr.f32.mxu0 %v6231_v0  ;;  %v236_v16 = vrot.slane %v231_v13, %v235_v48  ;;  %v240_v17 = vrot.slane %v231_v13, %v239_v46  ;;  %v248_v40 = vrot.slane %v231_v13, %v247_v50 }
 0x132   :  { %914 = vmatprep.mubr.f32.mxu1 %v6231_v0  ;;  %4502 = vmatprep.subr.bf16.mxu0 %v6534_v23  ;;  %v244_v48 = vrot.slane %v231_v13, %v243_v47 }
 0x133   :  { %802 = vmatmul.mubr.f32.gmra.mrb[18].mxu0 %v630_v29  ;;  %4534 = vmatprep.subr.bf16.mxu1 %v6537_v27 }
 0x134   :  { %915 = vmatmul.mubr.f32.gmra.mrb[18].mxu1 %v630_v29  ;;  %4504 = vmatpush1.bf16.msra.mxu0 %v6540_v30 }
 0x135   :  { %4536 = vmatpush1.bf16.msra.mxu1 %v6544_v32  ;;  %1085 = vmatprep.mubr.f32.mxu0 %v6231_v0 }
 0x136   :  { %1156 = vmatprep.mubr.f32.mxu1 %v6231_v0  ;;  %4538 = vmatprep.subr.bf16.mxu0 %v6441_v43 }
 0x137   :  { %1086 = vmatmul.mubr.f32.vlgmr.msra.gmra.mrb[4].mxu0 %v6231_v0  ;;  %4570 = vmatprep.subr.bf16.mxu1 %v6443_v45 }
 0x138   :  { %1157 = vmatmul.mubr.f32.vlgmr.msra.gmra.mrb[4].mxu1 %v6231_v0  ;;  %4540 = vmatpush1.bf16.msra.mxu0 %v6445_v52 }
 0x139   :  { %4572 = vmatpush1.bf16.msra.mxu1 %v6448_v55  ;;  %4542 = vmatprep.subr.bf16.mxu0 %v6451_v58 }
 0x13a   :  { %4574 = vmatprep.subr.bf16.mxu1 %v6453_v61  ;;  %1260 = vmatprep.mubr.f32.mxu0 %v6231_v0 }
 0x13b   :  { %1331 = vmatprep.mubr.f32.mxu1 %v6231_v0 }
 0x13c   :  { %4544 = vmatpush1.bf16.msra.mxu0 %v6456_v2 }
 0x13d   :  { %4576 = vmatpush1.bf16.msra.mxu1 %v6460_v5  ;;  %4546 = vmatprep.subr.bf16.mxu0 %v6464_v8 }
 0x13e   :  { %4578 = vmatprep.subr.bf16.mxu1 %v6467_v11 }
 0x140   :  { %4548 = vmatpush1.bf16.msra.mxu0 %v6470_v15 }
 0x141   :  { %4580 = vmatpush1.bf16.msra.mxu1 %v6474_v18  ;;  %4550 = vmatprep.subr.bf16.mxu0 %v6478_v21 }
 0x142   :  { %4582 = vmatprep.subr.bf16.mxu1 %v6481_v24 }
 0x144   :  { %4552 = vmatpush1.bf16.msra.mxu0 %v6484_v28 }
 0x145   :  { %4584 = vmatpush1.bf16.msra.mxu1 %v6488_v31  ;;  %4554 = vmatprep.subr.bf16.mxu0 %v6492_v34 }
 0x146   :  { %4586 = vmatprep.subr.bf16.mxu1 %v6495_v37 }
 0x148   :  { %4556 = vmatpush1.bf16.msra.mxu0 %v6498_v41 }
 0x149   :  { %4588 = vmatpush1.bf16.msra.mxu1 %v6502_v44  ;;  %4558 = vmatprep.subr.bf16.mxu0 %v6506_v49 }
 0x14a   :  { %4590 = vmatprep.subr.bf16.mxu1 %v6509_v53 }
 0x14c   :  { %4560 = vmatpush1.bf16.msra.mxu0 %v6512_v59 }
 0x14d   :  { %4592 = vmatpush1.bf16.msra.mxu1 %v6516_v63  ;;  %4562 = vmatprep.subr.bf16.mxu0 %v6520_v4 }
 0x14e   :  { %4594 = vmatprep.subr.bf16.mxu1 %v6523_v9 }
 0x150   :  { %4564 = vmatpush1.bf16.msra.mxu0 %v6526_v14 }
 0x151   :  { %4596 = vmatpush1.bf16.msra.mxu1 %v6530_v19  ;;  %4566 = vmatprep.subr.bf16.mxu0 %v6534_v23 }
 0x152   :  { %4598 = vmatprep.subr.bf16.mxu1 %v6537_v27 }
 0x154   :  { %4568 = vmatpush1.bf16.msra.mxu0 %v6540_v30 }
 0x155   :  { %4600 = vmatpush1.bf16.msra.mxu1 %v6544_v32  ;;  %4602 = vmatprep.subr.bf16.mxu0 %v6441_v43 }
 0x156   :  { %4634 = vmatprep.subr.bf16.mxu1 %v6443_v45 }
 0x1aa   :  { %v319_v33 = vpop.f32.mrb[0].mxu0 }
 0x1ab   :  { %v321_v35 = vpop.f32.mrb[1].mxu0  ;;  %v390_v36 = vpop.f32.mrb[0].mxu1  ;;  %v6599_v20 = vadd.f32 %v319_v33, %v236_v16 }
 0x1ac   :  { %v392_v38 = vpop.f32.mrb[1].mxu1  ;;  %v6601_v22 = vadd.f32 %v321_v35, %v240_v17  ;;  %v6608_v35 = vadd.f32 %v390_v36, %v244_v48 }
 0x1ca   :  { %v547_v60 = vpop.f32.mrb[2].mxu0 }
 0x1cb   :  { %v6591_v62 = vadd.f32 %v547_v60, %v464_v51  ;;  %v549_v1 = vpop.f32.mrb[3].mxu0  ;;  %v618_v3 = vpop.f32.mrb[2].mxu1 }
 0x1cc   :  { %v6593_v6 = vadd.f32 %v549_v1, %v468_v54  ;;  %v6595_v7 = vadd.f32 %v618_v3, %v472_v56  ;;  %v620_v10 = vpop.f32.mrb[3].mxu1 }
 0x1cd   :  { %v6597_v12 = vadd.f32 %v620_v10, %v476_v57  ;;  %v6605_v57 = vadd.f32 %v392_v38, %v248_v40 }
 0x20a   :  { %v1087_v25 = vpop.f32.mrb[4].mxu0 }
 0x20b   :  { %v5561_v26 = vadd.f32 %v1087_v25, %v6599_v20  ;;  %v1158_v29 = vpop.f32.mrb[4].mxu1  ;;  %v1089_v39 = vpop.f32.mrb[5].mxu0 }
 0x20c   :  { %v5562_v42 = vadd.f32 %v1089_v39, %v6601_v22  ;;  %v1160_v51 = vpop.f32.mrb[5].mxu1  ;;  %v5577_v60 = vadd.f32 %v1158_v29, %v6608_v35 }
 0x20d   :  { %v4233_v54 = vmul.f32 -1.442695, %v5561_v26  ;;  %v5578_v33 = vadd.f32 %v1160_v51, %v6605_v57 }
 0x20e   :  { %v4234_v56 = vmul.f32 -1.442695, %v5562_v42 }
 0x20f   :  { %5705 = vpow2.f32 %v4233_v54  ;;  %v4235_v46 = vmul.f32 -1.442695, %v5578_v33 }
 0x210   :  { %5707 = vpow2.f32 %v4234_v56 }
 0x211   :  { %5709 = vpow2.f32 %v4235_v46 }
 0x212   :  { %5711 = vtanh.f32 %v5577_v60 }
 0x219   :  { %v5706_v1 = vpop.eup %5705 }
 0x21a   :  { %v5708_v3 = vpop.eup %5707  ;;  %v1170_v50 = vadd.f32 1.0, %v5706_v1 }
 0x21b   :  { %v1176_v10 = vadd.f32 1.0, %v5708_v3  ;;  %v5710_v16 = vpop.eup %5709 }
 0x21c   :  { %5713 = vrcp.f32 %v1170_v50  ;;  %v5712_v38 = vpop.eup %5711  ;;  %v1183_v13 = vadd.f32 1.0, %v5710_v16 }
 0x21d   :  { %5715 = vrcp.f32 %v1176_v10 }
 0x21e   :  { %5717 = vrcp.f32 %v1183_v13 }
 0x226   :  { %v5714_v17 = vpop.eup %5713 }
 0x227   :  { %v5716_v25 = vpop.eup %5715  ;;  %v1187_v47 = vmul.f32 %v5714_v17, %v5712_v38 }
 0x228   :  { %v1186_v26 = vmul.f32 0.0, %v5716_v25  ;;  %v5718_v29 = vpop.eup %5717 }
 0x22a   :  { %v6611_v36 = vadd.f32 %v1187_v47, %v1186_v26 }
 0x22c   :  { %5719 = vtanh.f32 %v6611_v36 }
 0x236   :  { %v5720_v39 = vpop.eup %5719 }
 0x237   :  { %v6614_v40 = vmul.f32 %v5720_v39, %v5718_v29 }
 0x239   :  { %1261 = vmatmul.mubr.f32.vlgmr.msra.gmra.mrb[6].mxu0 %v6614_v40  ;;  %1332 = vmatmul.mubr.f32.vlgmr.msra.gmra.mrb[6].mxu1 %v6614_v40 }
 0x23a   :  { %4604 = vmatpush1.bf16.msra.mxu0 %v6445_v52  ;;  %4636 = vmatpush1.bf16.msra.mxu1 %v6448_v55 }
 0x23b   :  { %4606 = vmatprep.subr.bf16.mxu0 %v6451_v58  ;;  %4638 = vmatprep.subr.bf16.mxu1 %v6453_v61 }
 0x23c   :  { %1435 = vmatprep.mubr.f32.mxu0 %v6231_v0  ;;  %1506 = vmatprep.mubr.f32.mxu1 %v6231_v0 }
 0x23e   :  { %4608 = vmatpush1.bf16.msra.mxu0 %v6456_v2  ;;  %4640 = vmatpush1.bf16.msra.mxu1 %v6460_v5 }
 0x23f   :  { %4610 = vmatprep.subr.bf16.mxu0 %v6464_v8  ;;  %4642 = vmatprep.subr.bf16.mxu1 %v6467_v11 }
 0x242   :  { %4612 = vmatpush1.bf16.msra.mxu0 %v6470_v15  ;;  %4644 = vmatpush1.bf16.msra.mxu1 %v6474_v18 }
 0x243   :  { %4614 = vmatprep.subr.bf16.mxu0 %v6478_v21  ;;  %4646 = vmatprep.subr.bf16.mxu1 %v6481_v24 }
 0x246   :  { %4616 = vmatpush1.bf16.msra.mxu0 %v6484_v28  ;;  %4648 = vmatpush1.bf16.msra.mxu1 %v6488_v31 }
 0x247   :  { %4618 = vmatprep.subr.bf16.mxu0 %v6492_v34  ;;  %4650 = vmatprep.subr.bf16.mxu1 %v6495_v37 }
 0x24a   :  { %4620 = vmatpush1.bf16.msra.mxu0 %v6498_v41  ;;  %4652 = vmatpush1.bf16.msra.mxu1 %v6502_v44 }
 0x24b   :  { %4622 = vmatprep.subr.bf16.mxu0 %v6506_v49  ;;  %4654 = vmatprep.subr.bf16.mxu1 %v6509_v53 }
 0x24e   :  { %4624 = vmatpush1.bf16.msra.mxu0 %v6512_v59  ;;  %4656 = vmatpush1.bf16.msra.mxu1 %v6516_v63 }
 0x24f   :  { %4626 = vmatprep.subr.bf16.mxu0 %v6520_v4  ;;  %4658 = vmatprep.subr.bf16.mxu1 %v6523_v9 }
 0x252   :  { %4628 = vmatpush1.bf16.msra.mxu0 %v6526_v14  ;;  %4660 = vmatpush1.bf16.msra.mxu1 %v6530_v19 }
 0x253   :  { %4630 = vmatprep.subr.bf16.mxu0 %v6534_v23  ;;  %4662 = vmatprep.subr.bf16.mxu1 %v6537_v27 }
 0x256   :  { %4632 = vmatpush1.bf16.msra.mxu0 %v6540_v30  ;;  %4664 = vmatpush1.bf16.msra.mxu1 %v6544_v32 }
 0x257   :  { %4666 = vmatprep.subr.bf16.mxu0 %v6441_v43  ;;  %4698 = vmatprep.subr.bf16.mxu1 %v6443_v45 }
 0x30c   :  { %v1262_v42 = vpop.f32.mrb[6].mxu0  ;;  %v1333_v51 = vpop.f32.mrb[6].mxu1 }
 0x30d   :  { %v5563_v54 = vadd.f32 %v1262_v42, %v6599_v20  ;;  %v1264_v56 = vpop.f32.mrb[7].mxu0  ;;  %v1335_v48 = vpop.f32.mrb[7].mxu1  ;;  %v5579_v50 = vadd.f32 %v1333_v51, %v6608_v35 }
 0x30e   :  { %v5564_v33 = vadd.f32 %v1264_v56, %v6601_v22  ;;  %v5580_v1 = vadd.f32 %v1335_v48, %v6605_v57 }
 0x30f   :  { %v4236_v46 = vmul.f32 -1.442695, %v5563_v54 }
 0x310   :  { %v4237_v60 = vmul.f32 -1.442695, %v5564_v33  ;;  %v4238_v3 = vmul.f32 -1.442695, %v5580_v1 }
 0x311   :  { %5721 = vpow2.f32 %v4236_v46 }
 0x312   :  { %5723 = vpow2.f32 %v4237_v60 }
 0x313   :  { %5725 = vpow2.f32 %v4238_v3 }
 0x314   :  { %5727 = vtanh.f32 %v5579_v50 }
 0x31b   :  { %v5722_v10 = vpop.eup %5721 }
 0x31c   :  { %v5724_v16 = vpop.eup %5723  ;;  %v1345_v38 = vadd.f32 1.0, %v5722_v10 }
 0x31d   :  { %v1351_v17 = vadd.f32 1.0, %v5724_v16  ;;  %v5726_v25 = vpop.eup %5725 }
 0x31e   :  { %5729 = vrcp.f32 %v1345_v38  ;;  %v5728_v47 = vpop.eup %5727  ;;  %v1358_v39 = vadd.f32 1.0, %v5726_v25 }
 0x31f   :  { %5731 = vrcp.f32 %v1351_v17 }
 0x320   :  { %5733 = vrcp.f32 %v1358_v39 }
 0x328   :  { %v5730_v13 = vpop.eup %5729 }
 0x329   :  { %v5732_v26 = vpop.eup %5731  ;;  %v1362_v29 = vmul.f32 %v5730_v13, %v5728_v47 }
 0x32a   :  { %v1361_v42 = vmul.f32 %v5732_v26, %v6611_v36  ;;  %v5734_v51 = vpop.eup %5733 }
 0x32c   :  { %v6657_v54 = vadd.f32 %v1362_v29, %v1361_v42 }
 0x32e   :  { %5735 = vtanh.f32 %v6657_v54 }
 0x338   :  { %v5736_v56 = vpop.eup %5735 }
 0x339   :  { %v6660_v48 = vmul.f32 %v5736_v56, %v5734_v51 }
 0x33b   :  { %1436 = vmatmul.mubr.f32.vlgmr.msra.gmra.mrb[8].mxu0 %v6660_v48  ;;  %1507 = vmatmul.mubr.f32.vlgmr.msra.gmra.mrb[8].mxu1 %v6660_v48 }
 0x33c   :  { %4668 = vmatpush1.bf16.msra.mxu0 %v6445_v52  ;;  %4700 = vmatpush1.bf16.msra.mxu1 %v6448_v55 }
 0x33d   :  { %4670 = vmatprep.subr.bf16.mxu0 %v6451_v58  ;;  %4702 = vmatprep.subr.bf16.mxu1 %v6453_v61 }
 0x33e   :  { %1610 = vmatprep.mubr.f32.mxu0 %v6231_v0  ;;  %1681 = vmatprep.mubr.f32.mxu1 %v6231_v0 }
 0x340   :  { %4672 = vmatpush1.bf16.msra.mxu0 %v6456_v2  ;;  %4704 = vmatpush1.bf16.msra.mxu1 %v6460_v5 }
 0x341   :  { %4674 = vmatprep.subr.bf16.mxu0 %v6464_v8  ;;  %4706 = vmatprep.subr.bf16.mxu1 %v6467_v11 }
 0x344   :  { %4676 = vmatpush1.bf16.msra.mxu0 %v6470_v15  ;;  %4708 = vmatpush1.bf16.msra.mxu1 %v6474_v18 }
 0x345   :  { %4678 = vmatprep.subr.bf16.mxu0 %v6478_v21  ;;  %4710 = vmatprep.subr.bf16.mxu1 %v6481_v24 }
 0x348   :  { %4680 = vmatpush1.bf16.msra.mxu0 %v6484_v28  ;;  %4712 = vmatpush1.bf16.msra.mxu1 %v6488_v31 }
 0x349   :  { %4682 = vmatprep.subr.bf16.mxu0 %v6492_v34  ;;  %4714 = vmatprep.subr.bf16.mxu1 %v6495_v37 }
 0x34c   :  { %4684 = vmatpush1.bf16.msra.mxu0 %v6498_v41  ;;  %4716 = vmatpush1.bf16.msra.mxu1 %v6502_v44 }
 0x34d   :  { %4686 = vmatprep.subr.bf16.mxu0 %v6506_v49  ;;  %4718 = vmatprep.subr.bf16.mxu1 %v6509_v53 }
 0x350   :  { %4688 = vmatpush1.bf16.msra.mxu0 %v6512_v59  ;;  %4720 = vmatpush1.bf16.msra.mxu1 %v6516_v63 }
 0x351   :  { %4690 = vmatprep.subr.bf16.mxu0 %v6520_v4  ;;  %4722 = vmatprep.subr.bf16.mxu1 %v6523_v9 }
 0x354   :  { %4692 = vmatpush1.bf16.msra.mxu0 %v6526_v14  ;;  %4724 = vmatpush1.bf16.msra.mxu1 %v6530_v19 }
 0x355   :  { %4694 = vmatprep.subr.bf16.mxu0 %v6534_v23  ;;  %4726 = vmatprep.subr.bf16.mxu1 %v6537_v27 }
 0x358   :  { %4696 = vmatpush1.bf16.msra.mxu0 %v6540_v30  ;;  %4728 = vmatpush1.bf16.msra.mxu1 %v6544_v32 }
 0x359   :  { %4730 = vmatprep.subr.bf16.mxu0 %v6441_v43  ;;  %4762 = vmatprep.subr.bf16.mxu1 %v6443_v45 }
 0x40e   :  { %v1437_v36 = vpop.f32.mrb[8].mxu0  ;;  %v1508_v33 = vpop.f32.mrb[8].mxu1 }
 0x40f   :  { %v5565_v46 = vadd.f32 %v1437_v36, %v6599_v20  ;;  %v1439_v60 = vpop.f32.mrb[9].mxu0  ;;  %v1510_v1 = vpop.f32.mrb[9].mxu1  ;;  %v5581_v17 = vadd.f32 %v1508_v33, %v6608_v35 }
 0x410   :  { %v5566_v3 = vadd.f32 %v1439_v60, %v6601_v22  ;;  %v5582_v16 = vadd.f32 %v1510_v1, %v6605_v57 }
 0x411   :  { %v4239_v50 = vmul.f32 -1.442695, %v5565_v46 }
 0x412   :  { %v4240_v10 = vmul.f32 -1.442695, %v5566_v3  ;;  %v4241_v38 = vmul.f32 -1.442695, %v5582_v16 }
 0x413   :  { %5737 = vpow2.f32 %v4239_v50 }
 0x414   :  { %5739 = vpow2.f32 %v4240_v10 }
 0x415   :  { %5741 = vpow2.f32 %v4241_v38 }
 0x416   :  { %5743 = vtanh.f32 %v5581_v17 }
 0x41d   :  { %v5738_v25 = vpop.eup %5737 }
 0x41e   :  { %v5740_v47 = vpop.eup %5739  ;;  %v1520_v13 = vadd.f32 1.0, %v5738_v25 }
 0x41f   :  { %v1526_v26 = vadd.f32 1.0, %v5740_v47  ;;  %v5742_v29 = vpop.eup %5741 }
 0x420   :  { %5745 = vrcp.f32 %v1520_v13  ;;  %v5744_v39 = vpop.eup %5743  ;;  %v1533_v36 = vadd.f32 1.0, %v5742_v29 }
 0x421   :  { %5747 = vrcp.f32 %v1526_v26 }
 0x422   :  { %5749 = vrcp.f32 %v1533_v36 }
 0x42a   :  { %v5746_v42 = vpop.eup %5745 }
 0x42b   :  { %v5748_v51 = vpop.eup %5747  ;;  %v1537_v56 = vmul.f32 %v5746_v42, %v5744_v39 }
 0x42c   :  { %v1536_v46 = vmul.f32 %v5748_v51, %v6657_v54  ;;  %v5750_v33 = vpop.eup %5749 }
 0x42e   :  { %v6703_v60 = vadd.f32 %v1537_v56, %v1536_v46 }
 0x430   :  { %5751 = vtanh.f32 %v6703_v60 }
 0x43a   :  { %v5752_v1 = vpop.eup %5751 }
 0x43b   :  { %v6706_v3 = vmul.f32 %v5752_v1, %v5750_v33 }
 0x43d   :  { %1611 = vmatmul.mubr.f32.vlgmr.msra.gmra.mrb[10].mxu0 %v6706_v3  ;;  %1682 = vmatmul.mubr.f32.vlgmr.msra.gmra.mrb[10].mxu1 %v6706_v3 }
 0x43e   :  { %4732 = vmatpush1.bf16.msra.mxu0 %v6445_v52  ;;  %4764 = vmatpush1.bf16.msra.mxu1 %v6448_v55 }
 0x43f   :  { %4734 = vmatprep.subr.bf16.mxu0 %v6451_v58  ;;  %4766 = vmatprep.subr.bf16.mxu1 %v6453_v61 }
 0x440   :  { %1785 = vmatprep.mubr.f32.mxu0 %v6231_v0  ;;  %1856 = vmatprep.mubr.f32.mxu1 %v6231_v0 }
 0x442   :  { %4736 = vmatpush1.bf16.msra.mxu0 %v6456_v2  ;;  %4768 = vmatpush1.bf16.msra.mxu1 %v6460_v5 }
 0x443   :  { %4738 = vmatprep.subr.bf16.mxu0 %v6464_v8  ;;  %4770 = vmatprep.subr.bf16.mxu1 %v6467_v11 }
 0x446   :  { %4740 = vmatpush1.bf16.msra.mxu0 %v6470_v15  ;;  %4772 = vmatpush1.bf16.msra.mxu1 %v6474_v18 }
 0x447   :  { %4742 = vmatprep.subr.bf16.mxu0 %v6478_v21  ;;  %4774 = vmatprep.subr.bf16.mxu1 %v6481_v24 }
 0x44a   :  { %4744 = vmatpush1.bf16.msra.mxu0 %v6484_v28  ;;  %4776 = vmatpush1.bf16.msra.mxu1 %v6488_v31 }
 0x44b   :  { %4746 = vmatprep.subr.bf16.mxu0 %v6492_v34  ;;  %4778 = vmatprep.subr.bf16.mxu1 %v6495_v37 }
 0x44e   :  { %4748 = vmatpush1.bf16.msra.mxu0 %v6498_v41  ;;  %4780 = vmatpush1.bf16.msra.mxu1 %v6502_v44 }
 0x44f   :  { %4750 = vmatprep.subr.bf16.mxu0 %v6506_v49  ;;  %4782 = vmatprep.subr.bf16.mxu1 %v6509_v53 }
 0x452   :  { %4752 = vmatpush1.bf16.msra.mxu0 %v6512_v59  ;;  %4784 = vmatpush1.bf16.msra.mxu1 %v6516_v63 }
 0x453   :  { %4754 = vmatprep.subr.bf16.mxu0 %v6520_v4  ;;  %4786 = vmatprep.subr.bf16.mxu1 %v6523_v9 }
 0x456   :  { %4756 = vmatpush1.bf16.msra.mxu0 %v6526_v14  ;;  %4788 = vmatpush1.bf16.msra.mxu1 %v6530_v19 }
 0x457   :  { %4758 = vmatprep.subr.bf16.mxu0 %v6534_v23  ;;  %4790 = vmatprep.subr.bf16.mxu1 %v6537_v27 }
 0x45a   :  { %4760 = vmatpush1.bf16.msra.mxu0 %v6540_v30  ;;  %4792 = vmatpush1.bf16.msra.mxu1 %v6544_v32 }
 0x45b   :  { %4794 = vmatprep.subr.bf16.mxu0 %v6441_v43  ;;  %4826 = vmatprep.subr.bf16.mxu1 %v6443_v45 }
 0x510   :  { %v1612_v54 = vpop.f32.mrb[10].mxu0  ;;  %v1683_v50 = vpop.f32.mrb[10].mxu1 }
 0x511   :  { %v5567_v10 = vadd.f32 %v1612_v54, %v6599_v20  ;;  %v1614_v16 = vpop.f32.mrb[11].mxu0  ;;  %v1685_v38 = vpop.f32.mrb[11].mxu1  ;;  %v5583_v29 = vadd.f32 %v1683_v50, %v6608_v35 }
 0x512   :  { %v5568_v17 = vadd.f32 %v1614_v16, %v6601_v22  ;;  %v5584_v13 = vadd.f32 %v1685_v38, %v6605_v57 }
 0x513   :  { %v4242_v25 = vmul.f32 -1.442695, %v5567_v10 }
 0x514   :  { %v4243_v47 = vmul.f32 -1.442695, %v5568_v17  ;;  %v4244_v26 = vmul.f32 -1.442695, %v5584_v13 }
 0x515   :  { %5753 = vpow2.f32 %v4242_v25 }
 0x516   :  { %5755 = vpow2.f32 %v4243_v47 }
 0x517   :  { %5757 = vpow2.f32 %v4244_v26 }
 0x518   :  { %5759 = vtanh.f32 %v5583_v29 }
 0x51f   :  { %v5754_v39 = vpop.eup %5753 }
 0x520   :  { %v5756_v42 = vpop.eup %5755  ;;  %v1695_v51 = vadd.f32 1.0, %v5754_v39 }
 0x521   :  { %v1701_v56 = vadd.f32 1.0, %v5756_v42  ;;  %v5758_v36 = vpop.eup %5757 }
 0x522   :  { %5761 = vrcp.f32 %v1695_v51  ;;  %v5760_v46 = vpop.eup %5759  ;;  %v1708_v10 = vadd.f32 1.0, %v5758_v36 }
 0x523   :  { %5763 = vrcp.f32 %v1701_v56 }
 0x524   :  { %5765 = vrcp.f32 %v1708_v10 }
 0x52c   :  { %v5762_v33 = vpop.eup %5761 }
 0x52d   :  { %v5764_v1 = vpop.eup %5763  ;;  %v1712_v54 = vmul.f32 %v5762_v33, %v5760_v46 }
 0x52e   :  { %v1711_v16 = vmul.f32 %v5764_v1, %v6703_v60  ;;  %v5766_v50 = vpop.eup %5765 }
 0x530   :  { %v6749_v38 = vadd.f32 %v1712_v54, %v1711_v16 }
 0x532   :  { %5767 = vtanh.f32 %v6749_v38 }
 0x53c   :  { %v5768_v17 = vpop.eup %5767 }
 0x53d   :  { %v6752_v25 = vmul.f32 %v5768_v17, %v5766_v50 }
 0x53f   :  { %1786 = vmatmul.mubr.f32.vlgmr.msra.gmra.mrb[12].mxu0 %v6752_v25  ;;  %1857 = vmatmul.mubr.f32.vlgmr.msra.gmra.mrb[12].mxu1 %v6752_v25 }
 0x540   :  { %4796 = vmatpush1.bf16.msra.mxu0 %v6445_v52  ;;  %4828 = vmatpush1.bf16.msra.mxu1 %v6448_v55 }
 0x541   :  { %4798 = vmatprep.subr.bf16.mxu0 %v6451_v58  ;;  %4830 = vmatprep.subr.bf16.mxu1 %v6453_v61 }
 0x542   :  { %1960 = vmatprep.mubr.f32.mxu0 %v6231_v0  ;;  %2031 = vmatprep.mubr.f32.mxu1 %v6231_v0 }
 0x544   :  { %4800 = vmatpush1.bf16.msra.mxu0 %v6456_v2  ;;  %4832 = vmatpush1.bf16.msra.mxu1 %v6460_v5 }
 0x545   :  { %4802 = vmatprep.subr.bf16.mxu0 %v6464_v8  ;;  %4834 = vmatprep.subr.bf16.mxu1 %v6467_v11 }
 0x548   :  { %4804 = vmatpush1.bf16.msra.mxu0 %v6470_v15  ;;  %4836 = vmatpush1.bf16.msra.mxu1 %v6474_v18 }
 0x549   :  { %4806 = vmatprep.subr.bf16.mxu0 %v6478_v21  ;;  %4838 = vmatprep.subr.bf16.mxu1 %v6481_v24 }
 0x54c   :  { %4808 = vmatpush1.bf16.msra.mxu0 %v6484_v28  ;;  %4840 = vmatpush1.bf16.msra.mxu1 %v6488_v31 }
 0x54d   :  { %4810 = vmatprep.subr.bf16.mxu0 %v6492_v34  ;;  %4842 = vmatprep.subr.bf16.mxu1 %v6495_v37 }
 0x550   :  { %4812 = vmatpush1.bf16.msra.mxu0 %v6498_v41  ;;  %4844 = vmatpush1.bf16.msra.mxu1 %v6502_v44 }
 0x551   :  { %4814 = vmatprep.subr.bf16.mxu0 %v6506_v49  ;;  %4846 = vmatprep.subr.bf16.mxu1 %v6509_v53 }
 0x554   :  { %4816 = vmatpush1.bf16.msra.mxu0 %v6512_v59  ;;  %4848 = vmatpush1.bf16.msra.mxu1 %v6516_v63 }
 0x555   :  { %4818 = vmatprep.subr.bf16.mxu0 %v6520_v4  ;;  %4850 = vmatprep.subr.bf16.mxu1 %v6523_v9 }
 0x558   :  { %4820 = vmatpush1.bf16.msra.mxu0 %v6526_v14  ;;  %4852 = vmatpush1.bf16.msra.mxu1 %v6530_v19 }
 0x559   :  { %4822 = vmatprep.subr.bf16.mxu0 %v6534_v23  ;;  %4854 = vmatprep.subr.bf16.mxu1 %v6537_v27 }
 0x55c   :  { %4824 = vmatpush1.bf16.msra.mxu0 %v6540_v30  ;;  %4856 = vmatpush1.bf16.msra.mxu1 %v6544_v32 }
 0x55d   :  { %4858 = vmatprep.subr.bf16.mxu0 %v6441_v43  ;;  %4890 = vmatprep.subr.bf16.mxu1 %v6443_v45 }
 0x612   :  { %v1787_v60 = vpop.f32.mrb[12].mxu0  ;;  %v1858_v47 = vpop.f32.mrb[12].mxu1 }
 0x613   :  { %v5569_v13 = vadd.f32 %v1787_v60, %v6599_v20  ;;  %v1789_v26 = vpop.f32.mrb[13].mxu0  ;;  %v1860_v29 = vpop.f32.mrb[13].mxu1  ;;  %v5585_v46 = vadd.f32 %v1858_v47, %v6608_v35 }
 0x614   :  { %v5570_v39 = vadd.f32 %v1789_v26, %v6601_v22  ;;  %v5586_v56 = vadd.f32 %v1860_v29, %v6605_v57 }
 0x615   :  { %v4245_v42 = vmul.f32 -1.442695, %v5569_v13 }
 0x616   :  { %v4246_v51 = vmul.f32 -1.442695, %v5570_v39  ;;  %v4247_v36 = vmul.f32 -1.442695, %v5586_v56 }
 0x617   :  { %5769 = vpow2.f32 %v4245_v42 }
 0x618   :  { %5771 = vpow2.f32 %v4246_v51 }
 0x619   :  { %5773 = vpow2.f32 %v4247_v36 }
 0x61a   :  { %5775 = vtanh.f32 %v5585_v46 }
 0x621   :  { %v5770_v33 = vpop.eup %5769 }
 0x622   :  { %v5772_v1 = vpop.eup %5771  ;;  %v1870_v54 = vadd.f32 1.0, %v5770_v33 }
 0x623   :  { %v1876_v10 = vadd.f32 1.0, %v5772_v1  ;;  %v5774_v16 = vpop.eup %5773 }
 0x624   :  { %5777 = vrcp.f32 %v1870_v54  ;;  %v5776_v50 = vpop.eup %5775  ;;  %v1883_v26 = vadd.f32 1.0, %v5774_v16 }
 0x625   :  { %5779 = vrcp.f32 %v1876_v10 }
 0x626   :  { %5781 = vrcp.f32 %v1883_v26 }
 0x62e   :  { %v5778_v17 = vpop.eup %5777 }
 0x62f   :  { %v5780_v60 = vpop.eup %5779  ;;  %v1887_v13 = vmul.f32 %v5778_v17, %v5776_v50 }
 0x630   :  { %v1886_v39 = vmul.f32 %v5780_v60, %v6749_v38  ;;  %v5782_v47 = vpop.eup %5781 }
 0x632   :  { %v6795_v29 = vadd.f32 %v1887_v13, %v1886_v39 }
 0x634   :  { %5783 = vtanh.f32 %v6795_v29 }
 0x63e   :  { %v5784_v42 = vpop.eup %5783 }
 0x63f   :  { %v6798_v51 = vmul.f32 %v5784_v42, %v5782_v47 }
 0x641   :  { %1961 = vmatmul.mubr.f32.vlgmr.msra.gmra.mrb[14].mxu0 %v6798_v51  ;;  %2032 = vmatmul.mubr.f32.vlgmr.msra.gmra.mrb[14].mxu1 %v6798_v51 }
 0x642   :  { %4860 = vmatpush1.bf16.msra.mxu0 %v6445_v52  ;;  %4892 = vmatpush1.bf16.msra.mxu1 %v6448_v55 }
 0x643   :  { %4862 = vmatprep.subr.bf16.mxu0 %v6451_v58  ;;  %4894 = vmatprep.subr.bf16.mxu1 %v6453_v61 }
 0x644   :  { %2135 = vmatprep.mubr.f32.mxu0 %v6231_v0  ;;  %2206 = vmatprep.mubr.f32.mxu1 %v6231_v0 }
 0x646   :  { %4864 = vmatpush1.bf16.msra.mxu0 %v6456_v2  ;;  %4896 = vmatpush1.bf16.msra.mxu1 %v6460_v5 }
 0x647   :  { %4866 = vmatprep.subr.bf16.mxu0 %v6464_v8  ;;  %4898 = vmatprep.subr.bf16.mxu1 %v6467_v11 }
 0x64a   :  { %4868 = vmatpush1.bf16.msra.mxu0 %v6470_v15  ;;  %4900 = vmatpush1.bf16.msra.mxu1 %v6474_v18 }
 0x64b   :  { %4870 = vmatprep.subr.bf16.mxu0 %v6478_v21  ;;  %4902 = vmatprep.subr.bf16.mxu1 %v6481_v24 }
 0x64e   :  { %4872 = vmatpush1.bf16.msra.mxu0 %v6484_v28  ;;  %4904 = vmatpush1.bf16.msra.mxu1 %v6488_v31 }
 0x64f   :  { %4874 = vmatprep.subr.bf16.mxu0 %v6492_v34  ;;  %4906 = vmatprep.subr.bf16.mxu1 %v6495_v37 }
 0x652   :  { %4876 = vmatpush1.bf16.msra.mxu0 %v6498_v41  ;;  %4908 = vmatpush1.bf16.msra.mxu1 %v6502_v44 }
 0x653   :  { %4878 = vmatprep.subr.bf16.mxu0 %v6506_v49  ;;  %4910 = vmatprep.subr.bf16.mxu1 %v6509_v53 }
 0x656   :  { %4880 = vmatpush1.bf16.msra.mxu0 %v6512_v59  ;;  %4912 = vmatpush1.bf16.msra.mxu1 %v6516_v63 }
 0x657   :  { %4882 = vmatprep.subr.bf16.mxu0 %v6520_v4  ;;  %4914 = vmatprep.subr.bf16.mxu1 %v6523_v9 }
 0x65a   :  { %4884 = vmatpush1.bf16.msra.mxu0 %v6526_v14  ;;  %4916 = vmatpush1.bf16.msra.mxu1 %v6530_v19 }
 0x65b   :  { %4886 = vmatprep.subr.bf16.mxu0 %v6534_v23  ;;  %4918 = vmatprep.subr.bf16.mxu1 %v6537_v27 }
 0x65e   :  { %4888 = vmatpush1.bf16.msra.mxu0 %v6540_v30  ;;  %4920 = vmatpush1.bf16.msra.mxu1 %v6544_v32 }
 0x65f   :  { %4922 = vmatprep.subr.bf16.mxu0 %v6441_v43  ;;  %4954 = vmatprep.subr.bf16.mxu1 %v6443_v45 }
 0x714   :  { %v1962_v38 = vpop.f32.mrb[14].mxu0  ;;  %v2033_v56 = vpop.f32.mrb[14].mxu1 }
 0x715   :  { %v5571_v36 = vadd.f32 %v1962_v38, %v6599_v20  ;;  %v1964_v46 = vpop.f32.mrb[15].mxu0  ;;  %v2035_v33 = vpop.f32.mrb[15].mxu1  ;;  %v5587_v17 = vadd.f32 %v2033_v56, %v6608_v35 }
 0x716   :  { %v5572_v1 = vadd.f32 %v1964_v46, %v6601_v22  ;;  %v5588_v16 = vadd.f32 %v2035_v33, %v6605_v57 }
 0x717   :  { %v4248_v54 = vmul.f32 -1.442695, %v5571_v36 }
 0x718   :  { %v4249_v10 = vmul.f32 -1.442695, %v5572_v1  ;;  %v4250_v50 = vmul.f32 -1.442695, %v5588_v16  ;;  %v2431_v16 = vld [vmem:[#allocation16 + $0x30] sm:$0xff] }
 0x719   :  { %5785 = vpow2.f32 %v4248_v54 }
 0x71a   :  { %5787 = vpow2.f32 %v4249_v10  ;;  %v2427_v10 = vld [vmem:[#allocation16 + $0x10] sm:$0xff] }
 0x71b   :  { %5789 = vpow2.f32 %v4250_v50  ;;  %v2434_v50 = vld [vmem:[#allocation16 + $0x48] sm:$0xff] }
 0x71c   :  { %5791 = vtanh.f32 %v5587_v17  ;;  %v2438_v17 = vld [vmem:[#allocation16 + $0x68] sm:$0xff] }
 0x723   :  { %v5786_v43 = vpop.eup %5785 }
 0x724   :  { %v5788_v60 = vpop.eup %5787  ;;  %v2045_v45 = vadd.f32 1.0, %v5786_v43  ;;  %v2436_v43 = vld [vmem:[#allocation16 + $0x58] sm:$0xff] }
 0x725   :  { %v2051_v13 = vadd.f32 1.0, %v5788_v60  ;;  %v5790_v26 = vpop.eup %5789  ;;  %v2440_v60 = vld [vmem:[#allocation16 + $0x78] sm:$0xff] }
 0x726   :  { %5793 = vrcp.f32 %v2045_v45  ;;  %v5792_v39 = vpop.eup %5791  ;;  %v2058_v36 = vadd.f32 1.0, %v5790_v26 }
 0x727   :  { %5795 = vrcp.f32 %v2051_v13 }
 0x728   :  { %5797 = vrcp.f32 %v2058_v36  ;;  %v4989_v36 = vpack.c.bf16 %v2438_v17, %v2434_v50  ;;  %v2459_v17 = vld [vmem:[#allocation16 + $0x110] sm:$0xff] }
 0x730   :  { %v5794_v47 = vpop.eup %5793 }
 0x731   :  { %v5796_v42 = vpop.eup %5795  ;;  %v2062_v38 = vmul.f32 %v5794_v47, %v5792_v39  ;;  %v5019_v39 = vpack.c.bf16 %v2431_v16, %v2427_v10  ;;  %v2433_v47 = vld [vmem:[#allocation16 + $0x40] sm:$0xff] }
 0x732   :  { %v2061_v46 = vmul.f32 %v5796_v42, %v6795_v29  ;;  %v5798_v56 = vpop.eup %5797  ;;  %v2429_v29 = vld [vmem:[#allocation16 + $0x20] sm:$0xff] }
 0x733   :  { %v2437_v42 = vld [vmem:[#allocation16 + $0x60] sm:$0xff] }
 0x734   :  { %v6841_v33 = vadd.f32 %v2062_v38, %v2061_v46  ;;  %v5021_v46 = vpack.c.bf16 %v2440_v60, %v2436_v43  ;;  %v2461_v10 = vld [vmem:[#allocation16 + $0x120] sm:$0xff]  ;;  %v2463_v43 = vld [vmem:[#allocation16 + $0x130] sm:$0xff]  ;;  %v2466_v60 = vld [vmem:[#allocation16 + $0x148] sm:$0xff] }
 0x736   :  { %5799 = vtanh.f32 %v6841_v33 }
 0x740   :  { %v5800_v1 = vpop.eup %5799 }
 0x741   :  { %v6844_v54 = vmul.f32 %v5800_v1, %v5798_v56  ;;  %v2439_v56 = vld [vmem:[#allocation16 + $0x70] sm:$0xff]  ;;  %v2442_v1 = vld [vmem:[#allocation16 + $0x88] sm:$0xff] }
 0x743   :  { %2136 = vmatmul.mubr.f32.vlgmr.msra.gmra.mrb[16].mxu0 %v6844_v54  ;;  %2207 = vmatmul.mubr.f32.vlgmr.msra.gmra.mrb[16].mxu1 %v6844_v54 }
 0x744   :  { %4924 = vmatpush1.bf16.msra.mxu0 %v6445_v52  ;;  %4956 = vmatpush1.bf16.msra.mxu1 %v6448_v55  ;;  %v2426_v52 = vld [vmem:[#allocation16 + $0x8] sm:$0xff] }
 0x745   :  { %4926 = vmatprep.subr.bf16.mxu0 %v6451_v58  ;;  %4958 = vmatprep.subr.bf16.mxu1 %v6453_v61  ;;  %v2430_v55 = vld [vmem:[#allocation16 + $0x28] sm:$0xff]  ;;  %v2428_v58 = vld [vmem:[#allocation16 + $0x18] sm:$0xff] }
 0x746   :  { %2310 = vmatprep.mubr.f32.mxu0 %v6231_v0  ;;  %2381 = vmatprep.mubr.f32.mxu1 %v6231_v0  ;;  %v4985_v61 = vpack.c.bf16 %v2430_v55, %v2426_v52  ;;  %v2446_v52 = vld [vmem:[#allocation16 + $0xa8] sm:$0xff]  ;;  %v2444_v55 = vld [vmem:[#allocation16 + $0x98] sm:$0xff] }
 0x748   :  { %4928 = vmatpush1.bf16.msra.mxu0 %v6456_v2  ;;  %4960 = vmatpush1.bf16.msra.mxu1 %v6460_v5  ;;  %v2432_v2 = vld [vmem:[#allocation16 + $0x38] sm:$0xff] }
 0x749   :  { %4930 = vmatprep.subr.bf16.mxu0 %v6464_v8  ;;  %4962 = vmatprep.subr.bf16.mxu1 %v6467_v11  ;;  %v5017_v5 = vpack.c.bf16 %v2432_v2, %v2428_v58  ;;  %v2448_v58 = vld [vmem:[#allocation16 + $0xb8] sm:$0xff] }
 0x74c   :  { %4932 = vmatpush1.bf16.msra.mxu0 %v6470_v15  ;;  %4964 = vmatpush1.bf16.msra.mxu1 %v6474_v18 }
 0x74d   :  { %4934 = vmatprep.subr.bf16.mxu0 %v6478_v21  ;;  %4966 = vmatprep.subr.bf16.mxu1 %v6481_v24 }
 0x750   :  { %4936 = vmatpush1.bf16.msra.mxu0 %v6484_v28  ;;  %4968 = vmatpush1.bf16.msra.mxu1 %v6488_v31 }
 0x751   :  { %4938 = vmatprep.subr.bf16.mxu0 %v6492_v34  ;;  %4970 = vmatprep.subr.bf16.mxu1 %v6495_v37 }
 0x754   :  { %4940 = vmatpush1.bf16.msra.mxu0 %v6498_v41  ;;  %4972 = vmatpush1.bf16.msra.mxu1 %v6502_v44 }
 0x755   :  { %4942 = vmatprep.subr.bf16.mxu0 %v6506_v49  ;;  %4974 = vmatprep.subr.bf16.mxu1 %v6509_v53 }
 0x758   :  { %4944 = vmatpush1.bf16.msra.mxu0 %v6512_v59  ;;  %4976 = vmatpush1.bf16.msra.mxu1 %v6516_v63 }
 0x759   :  { %4946 = vmatprep.subr.bf16.mxu0 %v6520_v4  ;;  %4978 = vmatprep.subr.bf16.mxu1 %v6523_v9 }
 0x75c   :  { %4948 = vmatpush1.bf16.msra.mxu0 %v6526_v14  ;;  %4980 = vmatpush1.bf16.msra.mxu1 %v6530_v19 }
 0x75d   :  { %4950 = vmatprep.subr.bf16.mxu0 %v6534_v23  ;;  %4982 = vmatprep.subr.bf16.mxu1 %v6537_v27 }
 0x760   :  { %4952 = vmatpush1.bf16.msra.mxu0 %v6540_v30  ;;  %4984 = vmatpush1.bf16.msra.mxu1 %v6544_v32  ;;  %v2425_v32 = vld [vmem:[#allocation16] sm:$0xff] }
 0x761   :  { %4986 = vmatprep.subr.bf16.mxu0 %v4985_v61  ;;  %5018 = vmatprep.subr.bf16.mxu1 %v5017_v5  ;;  %v4987_v26 = vpack.c.bf16 %v2429_v29, %v2425_v32  ;;  %v4991_v61 = vpack.c.bf16 %v2437_v42, %v2433_v47  ;;  %v2441_v5 = vld [vmem:[#allocation16 + $0x80] sm:$0xff]  ;;  %v5035_v47 = vpack.c.bf16 %v2463_v43, %v2459_v17  ;;  %v2758_v17 = vld [vmem:[#allocation18 + $0x58] sm:$0xff] }
 0x762   :  { %v2457_v29 = vld [vmem:[#allocation16 + $0x100] sm:$0xff] }
 0x763   :  { %v2465_v42 = vld [vmem:[#allocation16 + $0x140] sm:$0xff] }
 0x816   :  { %v2137_v8 = vpop.f32.mrb[16].mxu0  ;;  %v2208_v11 = vpop.f32.mrb[16].mxu1 }
 0x817   :  { %v5573_v15 = vadd.f32 %v2137_v8, %v6599_v20  ;;  %v2139_v18 = vpop.f32.mrb[17].mxu0  ;;  %v2210_v21 = vpop.f32.mrb[17].mxu1  ;;  %v5589_v41 = vadd.f32 %v2208_v11, %v6608_v35  ;;  %v2445_v8 = vld [vmem:[#allocation16 + $0xa0] sm:$0xff]  ;;  %v4993_v11 = vpack.c.bf16 %v2446_v52, %v2442_v1  ;;  %v2471_v1 = vld [vmem:[#allocation16 + $0x170] sm:$0xff]  ;;  %v2474_v52 = vld [vmem:[#allocation16 + $0x188] sm:$0xff] }
 0x818   :  { %v5574_v24 = vadd.f32 %v2139_v18, %v6601_v22  ;;  %v5590_v34 = vadd.f32 %v2210_v21, %v6605_v57  ;;  %v2443_v18 = vld [vmem:[#allocation16 + $0x90] sm:$0xff] }
 0x819   :  { %v4251_v28 = vmul.f32 -1.442695, %v5573_v15  ;;  %v5025_v15 = vpack.c.bf16 %v2448_v58, %v2444_v55  ;;  %v2447_v21 = vld [vmem:[#allocation16 + $0xb0] sm:$0xff]  ;;  %v2478_v55 = vld [vmem:[#allocation16 + $0x1a8] sm:$0xff]  ;;  %v2476_v58 = vld [vmem:[#allocation16 + $0x198] sm:$0xff] }
 0x81a   :  { %v4252_v31 = vmul.f32 -1.442695, %v5574_v24  ;;  %v4253_v37 = vmul.f32 -1.442695, %v5590_v34  ;;  %v2450_v24 = vld [vmem:[#allocation16 + $0xc8] sm:$0xff]  ;;  %v2456_v34 = vld [vmem:[#allocation16 + $0xf8] sm:$0xff] }
 0x81b   :  { %5801 = vpow2.f32 %v4251_v28  ;;  %v2454_v28 = vld [vmem:[#allocation16 + $0xe8] sm:$0xff] }
 0x81c   :  { %5803 = vpow2.f32 %v4252_v31  ;;  %v2452_v31 = vld [vmem:[#allocation16 + $0xd8] sm:$0xff] }
 0x81d   :  { %5805 = vpow2.f32 %v4253_v37  ;;  %v4995_v37 = vpack.c.bf16 %v2445_v8, %v2441_v5  ;;  %v2473_v8 = vld [vmem:[#allocation16 + $0x180] sm:$0xff] }
 0x81e   :  { %5807 = vtanh.f32 %v5589_v41  ;;  %v5027_v41 = vpack.c.bf16 %v2447_v21, %v2443_v18  ;;  %v2475_v21 = vld [vmem:[#allocation16 + $0x190] sm:$0xff] }
 0x825   :  { %v5802_v44 = vpop.eup %5801 }
 0x826   :  { %v5804_v49 = vpop.eup %5803  ;;  %v2220_v53 = vadd.f32 1.0, %v5802_v44  ;;  %v2449_v44 = vld [vmem:[#allocation16 + $0xc0] sm:$0xff] }
 0x827   :  { %v2226_v59 = vadd.f32 1.0, %v5804_v49  ;;  %v5806_v63 = vpop.eup %5805  ;;  %v2453_v49 = vld [vmem:[#allocation16 + $0xe0] sm:$0xff] }
 0x828   :  { %5809 = vrcp.f32 %v2220_v53  ;;  %v5808_v4 = vpop.eup %5807  ;;  %v2233_v23 = vadd.f32 1.0, %v5806_v63  ;;  %v4997_v53 = vpack.c.bf16 %v2454_v28, %v2450_v24  ;;  %v2451_v63 = vld [vmem:[#allocation16 + $0xd0] sm:$0xff]  ;;  %v2482_v28 = vld [vmem:[#allocation16 + $0x1c8] sm:$0xff] }
 0x829   :  { %5811 = vrcp.f32 %v2226_v59  ;;  %v5029_v59 = vpack.c.bf16 %v2456_v34, %v2452_v31  ;;  %v2479_v24 = vld [vmem:[#allocation16 + $0x1b0] sm:$0xff]  ;;  %v2486_v31 = vld [vmem:[#allocation16 + $0x1e8] sm:$0xff]  ;;  %v2484_v34 = vld [vmem:[#allocation16 + $0x1d8] sm:$0xff] }
 0x82a   :  { %5813 = vrcp.f32 %v2233_v23  ;;  %v2464_v23 = vld [vmem:[#allocation16 + $0x138] sm:$0xff] }
 0x832   :  { %v5810_v9 = vpop.eup %5809 }
 0x833   :  { %v5812_v14 = vpop.eup %5811  ;;  %v2237_v19 = vmul.f32 %v5810_v9, %v5808_v4  ;;  %v2455_v4 = vld [vmem:[#allocation16 + $0xf0] sm:$0xff]  ;;  %v2458_v9 = vld [vmem:[#allocation16 + $0x108] sm:$0xff] }
 0x834   :  { %v2236_v27 = vmul.f32 %v5812_v14, %v6841_v33  ;;  %v5814_v45 = vpop.eup %5813  ;;  %v2435_v33 = vld [vmem:[#allocation16 + $0x50] sm:$0xff]  ;;  %v2462_v14 = vld [vmem:[#allocation16 + $0x128] sm:$0xff]  ;;  %v5031_v32 = vpack.c.bf16 %v2455_v4, %v2451_v63  ;;  %v2485_v63 = vld [vmem:[#allocation16 + $0x1e0] sm:$0xff] }
 0x835   :  { %v5023_v2 = vpack.c.bf16 %v2439_v56, %v2435_v33  ;;  %v5001_v16 = vpack.c.bf16 %v2462_v14, %v2458_v9  ;;  %v2467_v56 = vld [vmem:[#allocation16 + $0x150] sm:$0xff] }
 0x836   :  { %v6885_v30 = vadd.f32 %v2237_v19, %v2236_v27  ;;  %v2460_v19 = vld [vmem:[#allocation16 + $0x118] sm:$0xff]  ;;  %v4999_v27 = vpack.c.bf16 %v2453_v49, %v2449_v44  ;;  %v5039_v5 = vpack.c.bf16 %v2471_v1, %v2467_v56  ;;  %v5043_v44 = vpack.c.bf16 %v2479_v24, %v2475_v21  ;;  %v2481_v49 = vld [vmem:[#allocation16 + $0x1c0] sm:$0xff]  ;;  %v2483_v4 = vld [vmem:[#allocation16 + $0x1d0] sm:$0xff] }
 0x837   :  { %v5033_v50 = vpack.c.bf16 %v2464_v23, %v2460_v19  ;;  %v2487_v9 = vld [vmem:[#allocation16 + $0x1f0] sm:$0xff]  ;;  %v5015_v14 = vpack.c.bf16 %v2485_v63, %v2481_v49  ;;  %v2747_v23 = vld [vmem:[#allocation18] sm:$0xff]  ;;  %v2766_v56 = vld [vmem:[#allocation18 + $0x98] sm:$0xff] }
 0x838   :  { %5815 = vtanh.f32 %v6885_v30  ;;  %v5047_v19 = vpack.c.bf16 %v2487_v9, %v2483_v4  ;;  %v2774_v21 = vld [vmem:[#allocation18 + $0xd8] sm:$0xff]  ;;  %v2777_v49 = vld [vmem:[#allocation18 + $0xf0] sm:$0xff]  ;;  %v2784_v63 = vld [vmem:[#allocation18 + $0x128] sm:$0xff] }
 0x839   :  { %v2782_v4 = vld [vmem:[#allocation18 + $0x118] sm:$0xff] }
 0x842   :  { %v5816_v13 = vpop.eup %5815 }
 0x843   :  { %v6888_v38 = vmul.f32 %v5816_v13, %v5814_v45  ;;  %v2470_v45 = vld [vmem:[#allocation16 + $0x168] sm:$0xff]  ;;  %v2468_v13 = vld [vmem:[#allocation16 + $0x158] sm:$0xff] }
 0x845   :  { %2311 = vmatmul.mubr.f32.vlgmr.msra.gmra.mrb[18].mxu0 %v6888_v38  ;;  %2382 = vmatmul.mubr.f32.vlgmr.msra.gmra.mrb[18].mxu1 %v6888_v38 }
 0x846   :  { %4988 = vmatpush1.bf16.msra.mxu0 %v4987_v26  ;;  %5020 = vmatpush1.bf16.msra.mxu1 %v5019_v39  ;;  %v2472_v26 = vld [vmem:[#allocation16 + $0x178] sm:$0xff]  ;;  %v5003_v39 = vpack.c.bf16 %v2461_v10, %v2457_v29  ;;  %v2749_v29 = vld [vmem:[#allocation18 + $0x10] sm:$0xff] }
 0x847   :  { %4990 = vmatprep.subr.bf16.mxu0 %v4989_v36  ;;  %5022 = vmatprep.subr.bf16.mxu1 %v5021_v46  ;;  %v2469_v36 = vld [vmem:[#allocation16 + $0x160] sm:$0xff]  ;;  %v5005_v46 = vpack.c.bf16 %v2470_v45, %v2466_v60  ;;  %v5037_v33 = vpack.c.bf16 %v2472_v26, %v2468_v13  ;;  %v2753_v10 = vld [vmem:[#allocation18 + $0x30] sm:$0xff]  ;;  %v2762_v60 = vld [vmem:[#allocation18 + $0x78] sm:$0xff] }
 0x848   :  { %2553 = vmatprep.mubr.f32.mxu0 %v6231_v0  ;;  %2666 = vmatprep.mubr.f32.mxu1 %v6231_v0  ;;  %v2755_v45 = vld [vmem:[#allocation18 + $0x40] sm:$0xff]  ;;  %v6936_v26 = vpack.c.bf16 %v2762_v60, %v2758_v17 }
 0x849   :  { %v2759_v13 = vld [vmem:[#allocation18 + $0x60] sm:$0xff] }
 0x84a   :  { %4992 = vmatpush1.bf16.msra.mxu0 %v4991_v61  ;;  %5024 = vmatpush1.bf16.msra.mxu1 %v5023_v2  ;;  %v2480_v61 = vld [vmem:[#allocation16 + $0x1b8] sm:$0xff]  ;;  %v5007_v2 = vpack.c.bf16 %v2469_v36, %v2465_v42  ;;  %v2761_v42 = vld [vmem:[#allocation18 + $0x70] sm:$0xff] }
 0x84b   :  { %4994 = vmatprep.subr.bf16.mxu0 %v4993_v11  ;;  %5026 = vmatprep.subr.bf16.mxu1 %v5025_v15  ;;  %v2477_v11 = vld [vmem:[#allocation16 + $0x1a0] sm:$0xff]  ;;  %v5009_v15 = vpack.c.bf16 %v2478_v55, %v2474_v52  ;;  %v5041_v18 = vpack.c.bf16 %v2480_v61, %v2476_v58  ;;  %v2770_v52 = vld [vmem:[#allocation18 + $0xb8] sm:$0xff] }
 0x84c   :  { %v2763_v55 = vld [vmem:[#allocation18 + $0x80] sm:$0xff]  ;;  %v6948_v61 = vpack.c.bf16 %v2770_v52, %v2766_v56  ;;  %v2800_v56 = vld [vmem:[#allocation18 + $0x1a8] sm:$0xff] }
 0x84d   :  { %v2767_v58 = vld [vmem:[#allocation18 + $0xa0] sm:$0xff] }
 0x84e   :  { %4996 = vmatpush1.bf16.msra.mxu0 %v4995_v37  ;;  %5028 = vmatpush1.bf16.msra.mxu1 %v5027_v41  ;;  %v2488_v37 = vld [vmem:[#allocation16 + $0x1f8] sm:$0xff]  ;;  %v5011_v41 = vpack.c.bf16 %v2477_v11, %v2473_v8  ;;  %v2769_v8 = vld [vmem:[#allocation18 + $0xb0] sm:$0xff] }
 0x84f   :  { %4998 = vmatprep.subr.bf16.mxu0 %v4997_v53  ;;  %5030 = vmatprep.subr.bf16.mxu1 %v5029_v59  ;;  %v5013_v53 = vpack.c.bf16 %v2486_v31, %v2482_v28  ;;  %v5045_v59 = vpack.c.bf16 %v2488_v37, %v2484_v34  ;;  %v2778_v28 = vld [vmem:[#allocation18 + $0xf8] sm:$0xff]  ;;  %v2771_v31 = vld [vmem:[#allocation18 + $0xc0] sm:$0xff] }
 0x850   :  { %v2775_v34 = vld [vmem:[#allocation18 + $0xe0] sm:$0xff]  ;;  %v6960_v37 = vpack.c.bf16 %v2778_v28, %v2774_v21  ;;  %v2797_v21 = vld [vmem:[#allocation18 + $0x190] sm:$0xff] }
 0x851   :  { %v2801_v28 = vld [vmem:[#allocation18 + $0x1b0] sm:$0xff] }
 0x852   :  { %5000 = vmatpush1.bf16.msra.mxu0 %v4999_v27  ;;  %5032 = vmatpush1.bf16.msra.mxu1 %v5031_v32 }
 0x853   :  { %5002 = vmatprep.subr.bf16.mxu0 %v5001_v16  ;;  %5034 = vmatprep.subr.bf16.mxu1 %v5033_v50  ;;  %v2756_v16 = vld [vmem:[#allocation18 + $0x48] sm:$0xff] }
 0x854   :  { %v2760_v50 = vld [vmem:[#allocation18 + $0x68] sm:$0xff] }
 0x855   :  { %v6934_v43 = vpack.c.bf16 %v2760_v50, %v2756_v16  ;;  %v2790_v16 = vld [vmem:[#allocation18 + $0x158] sm:$0xff] }
 0x856   :  { %5004 = vmatpush1.bf16.msra.mxu0 %v5003_v39  ;;  %5036 = vmatpush1.bf16.msra.mxu1 %v5035_v47  ;;  %v6938_v39 = vpack.c.bf16 %v2759_v13, %v2755_v45  ;;  %v2757_v47 = vld [vmem:[#allocation18 + $0x50] sm:$0xff]  ;;  %v2794_v50 = vld [vmem:[#allocation18 + $0x178] sm:$0xff]  ;;  %v2787_v45 = vld [vmem:[#allocation18 + $0x140] sm:$0xff] }
 0x857   :  { %5006 = vmatprep.subr.bf16.mxu0 %v5005_v46  ;;  %5038 = vmatprep.subr.bf16.mxu1 %v5037_v33  ;;  %v6941_v36 = vpack.c.bf16 %v2761_v42, %v2757_v47  ;;  %v2764_v46 = vld [vmem:[#allocation18 + $0x88] sm:$0xff]  ;;  %v6982_v60 = vpack.c.bf16 %v2794_v50, %v2790_v16  ;;  %v2791_v13 = vld [vmem:[#allocation18 + $0x160] sm:$0xff]  ;;  %v2789_v47 = vld [vmem:[#allocation18 + $0x150] sm:$0xff] }
 0x858   :  { %v2768_v33 = vld [vmem:[#allocation18 + $0xa8] sm:$0xff]  ;;  %v6985_v42 = vpack.c.bf16 %v2791_v13, %v2787_v45 }
 0x859   :  { %v6946_v1 = vpack.c.bf16 %v2768_v33, %v2764_v46  ;;  %v2793_v46 = vld [vmem:[#allocation18 + $0x170] sm:$0xff]  ;;  %v2796_v33 = vld [vmem:[#allocation18 + $0x188] sm:$0xff] }
 0x85a   :  { %5008 = vmatpush1.bf16.msra.mxu0 %v5007_v2  ;;  %5040 = vmatpush1.bf16.msra.mxu1 %v5039_v5  ;;  %v6950_v2 = vpack.c.bf16 %v2767_v58, %v2763_v55  ;;  %v2765_v5 = vld [vmem:[#allocation18 + $0x90] sm:$0xff]  ;;  %v6989_v52 = vpack.c.bf16 %v2793_v46, %v2789_v47  ;;  %v6991_v55 = vpack.c.bf16 %v2800_v56, %v2796_v33  ;;  %v2798_v58 = vld [vmem:[#allocation18 + $0x198] sm:$0xff] }
 0x85b   :  { %5010 = vmatprep.subr.bf16.mxu0 %v5009_v15  ;;  %5042 = vmatprep.subr.bf16.mxu1 %v5041_v18  ;;  %v6953_v11 = vpack.c.bf16 %v2769_v8, %v2765_v5  ;;  %v2772_v15 = vld [vmem:[#allocation18 + $0xc8] sm:$0xff]  ;;  %v2802_v5 = vld [vmem:[#allocation18 + $0x1b8] sm:$0xff]  ;;  %v2795_v8 = vld [vmem:[#allocation18 + $0x180] sm:$0xff] }
 0x85c   :  { %v2776_v18 = vld [vmem:[#allocation18 + $0xe8] sm:$0xff] }
 0x85d   :  { %v6958_v24 = vpack.c.bf16 %v2776_v18, %v2772_v15  ;;  %v6994_v15 = vpack.c.bf16 %v2802_v5, %v2798_v58  ;;  %v2799_v18 = vld [vmem:[#allocation18 + $0x1a0] sm:$0xff] }
 0x85e   :  { %5012 = vmatpush1.bf16.msra.mxu0 %v5011_v41  ;;  %5044 = vmatpush1.bf16.msra.mxu1 %v5043_v44  ;;  %v6962_v41 = vpack.c.bf16 %v2775_v34, %v2771_v31  ;;  %v2773_v44 = vld [vmem:[#allocation18 + $0xd0] sm:$0xff]  ;;  %v6997_v31 = vpack.c.bf16 %v2799_v18, %v2795_v8  ;;  %v7001_v34 = vpack.c.bf16 %v2801_v28, %v2797_v21 }
 0x85f   :  { %5014 = vmatprep.subr.bf16.mxu0 %v5013_v53  ;;  %5046 = vmatprep.subr.bf16.mxu1 %v5045_v59  ;;  %v6965_v53 = vpack.c.bf16 %v2777_v49, %v2773_v44  ;;  %v2780_v59 = vld [vmem:[#allocation18 + $0x108] sm:$0xff] }
 0x860   :  { %v6969_v9 = vpack.c.bf16 %v2784_v63, %v2780_v59  ;;  %v2804_v44 = vld [vmem:[#allocation18 + $0x1c8] sm:$0xff]  ;;  %v2806_v59 = vld [vmem:[#allocation18 + $0x1d8] sm:$0xff] }
 0x861   :  { %v2808_v49 = vld [vmem:[#allocation18 + $0x1e8] sm:$0xff] }
 0x862   :  { %5016 = vmatpush1.bf16.msra.mxu0 %v5015_v14  ;;  %5048 = vmatpush1.bf16.msra.mxu1 %v5047_v19  ;;  %v2786_v14 = vld [vmem:[#allocation18 + $0x138] sm:$0xff]  ;;  %v2779_v19 = vld [vmem:[#allocation18 + $0x100] sm:$0xff]  ;;  %v7006_v63 = vpack.c.bf16 %v2808_v49, %v2804_v44 }
 0x865   :  { %2554 = vmatmul.mubr.f32.vlgmr.msra.gmra.mrb[20].mxu0 %v6614_v40  ;;  %2667 = vmatmul.mubr.f32.vlgmr.msra.gmra.mrb[20].mxu1 %v6614_v40  ;;  %v2748_v40 = vld [vmem:[#allocation18 + $0x8] sm:$0xff] }
 0x866   :  { %2559 = vmatprep.mubr.f32.mxu0 %v6231_v0  ;;  %2672 = vmatprep.mubr.f32.mxu1 %v6231_v0 }
 0x869   :  { %2560 = vmatmul.mubr.f32.gmra.mrb[22].mxu0 %v6660_v48  ;;  %2673 = vmatmul.mubr.f32.gmra.mrb[22].mxu1 %v6660_v48  ;;  %v2752_v48 = vld [vmem:[#allocation18 + $0x28] sm:$0xff] }
 0x86a   :  { %2565 = vmatprep.mubr.f32.mxu0 %v6231_v0  ;;  %2678 = vmatprep.mubr.f32.mxu1 %v6231_v0 }
 0x86d   :  { %2566 = vmatmul.mubr.f32.gmra.mrb[24].mxu0 %v6706_v3  ;;  %2679 = vmatmul.mubr.f32.gmra.mrb[24].mxu1 %v6706_v3  ;;  %v2750_v3 = vld [vmem:[#allocation18 + $0x18] sm:$0xff] }
 0x86e   :  { %2571 = vmatprep.mubr.f32.mxu0 %v6231_v0  ;;  %2684 = vmatprep.mubr.f32.mxu1 %v6231_v0 }
 0x871   :  { %2572 = vmatmul.mubr.f32.gmra.mrb[26].mxu0 %v6752_v25  ;;  %2685 = vmatmul.mubr.f32.gmra.mrb[26].mxu1 %v6752_v25  ;;  %v6922_v25 = vpack.c.bf16 %v2752_v48, %v2748_v40  ;;  %v2783_v40 = vld [vmem:[#allocation18 + $0x120] sm:$0xff]  ;;  %v6972_v48 = vpack.c.bf16 %v2786_v14, %v2782_v4  ;;  %v2810_v4 = vld [vmem:[#allocation18 + $0x1f8] sm:$0xff] }
 0x872   :  { %2577 = vmatprep.mubr.f32.mxu0 %v6231_v0  ;;  %2690 = vmatprep.mubr.f32.mxu1 %v6231_v0  ;;  %v2803_v14 = vld [vmem:[#allocation18 + $0x1c0] sm:$0xff] }
 0x873   :  { %5050 = vmatprep.subr.bf16.mxu0 %v6922_v25 }
 0x875   :  { %2578 = vmatmul.mubr.f32.gmra.mrb[28].mxu0 %v6798_v51  ;;  %2691 = vmatmul.mubr.f32.gmra.mrb[28].mxu1 %v6798_v51  ;;  %v2754_v51 = vld [vmem:[#allocation18 + $0x38] sm:$0xff] }
 0x876   :  { %2583 = vmatprep.mubr.f32.mxu0 %v6231_v0  ;;  %2696 = vmatprep.mubr.f32.mxu1 %v6231_v0  ;;  %v6924_v27 = vpack.c.bf16 %v2754_v51, %v2750_v3  ;;  %v6974_v3 = vpack.c.bf16 %v2783_v40, %v2779_v19  ;;  %v2781_v51 = vld [vmem:[#allocation18 + $0x110] sm:$0xff]  ;;  %v2807_v19 = vld [vmem:[#allocation18 + $0x1e0] sm:$0xff]  ;;  %v7008_v40 = vpack.c.bf16 %v2810_v4, %v2806_v59 }
 0x878   :  { %5082 = vmatprep.subr.bf16.mxu1 %v6924_v27 }
 0x879   :  { %2584 = vmatmul.mubr.f32.gmra.mrb[30].mxu0 %v6844_v54  ;;  %2697 = vmatmul.mubr.f32.gmra.mrb[30].mxu1 %v6844_v54  ;;  %v2751_v54 = vld [vmem:[#allocation18 + $0x20] sm:$0xff] }
 0x87a   :  { %2589 = vmatprep.mubr.f32.mxu0 %v6231_v0  ;;  %2702 = vmatprep.mubr.f32.mxu1 %v6231_v0  ;;  %v6926_v32 = vpack.c.bf16 %v2751_v54, %v2747_v23  ;;  %v2785_v23 = vld [vmem:[#allocation18 + $0x130] sm:$0xff]  ;;  %v2788_v54 = vld [vmem:[#allocation18 + $0x148] sm:$0xff] }
 0x87c   :  { %5052 = vmatpush1.bf16.msra.mxu0 %v6926_v32 }
 0x87d   :  { %2590 = vmatmul.mubr.f32.gmra.mrb[32].mxu0 %v6888_v38  ;;  %2703 = vmatmul.mubr.f32.gmra.mrb[32].mxu1 %v6888_v38  ;;  %v6929_v38 = vpack.c.bf16 %v2753_v10, %v2749_v29  ;;  %v6977_v29 = vpack.c.bf16 %v2785_v23, %v2781_v51  ;;  %v2792_v10 = vld [vmem:[#allocation18 + $0x168] sm:$0xff]  ;;  %v7010_v51 = vpack.c.bf16 %v2807_v19, %v2803_v14  ;;  %v2805_v23 = vld [vmem:[#allocation18 + $0x1d0] sm:$0xff] }
 0x87e   :  { %2595 = vmatprep.mubr.f32.mxu0 %v6231_v0  ;;  %2708 = vmatprep.mubr.f32.mxu1 %v6231_v0  ;;  %v6980_v17 = vpack.c.bf16 %v2792_v10, %v2788_v54  ;;  %v2809_v54 = vld [vmem:[#allocation18 + $0x1f0] sm:$0xff] }
 0x87f   :  { %5084 = vmatpush1.bf16.msra.mxu1 %v6929_v38  ;;  %5054 = vmatprep.subr.bf16.mxu0 %v6934_v43  ;;  %v7013_v10 = vpack.c.bf16 %v2809_v54, %v2805_v23 }
 0x880   :  { %5086 = vmatprep.subr.bf16.mxu1 %v6936_v26  ;;  %5056 = vmatpush1.bf16.msra.mxu0 %v6938_v39 }
 0x881   :  { %5058 = vmatprep.subr.bf16.mxu0 %v6946_v1 }
 0x883   :  { %5088 = vmatpush1.bf16.msra.mxu1 %v6941_v36 }
 0x884   :  { %5090 = vmatprep.subr.bf16.mxu1 %v6948_v61  ;;  %5060 = vmatpush1.bf16.msra.mxu0 %v6950_v2 }
 0x885   :  { %5062 = vmatprep.subr.bf16.mxu0 %v6958_v24 }
 0x887   :  { %5092 = vmatpush1.bf16.msra.mxu1 %v6953_v11 }
 0x888   :  { %5094 = vmatprep.subr.bf16.mxu1 %v6960_v37  ;;  %5064 = vmatpush1.bf16.msra.mxu0 %v6962_v41 }
 0x889   :  { %5066 = vmatprep.subr.bf16.mxu0 %v6969_v9 }
 0x88b   :  { %5096 = vmatpush1.bf16.msra.mxu1 %v6965_v53 }
 0x88c   :  { %5098 = vmatprep.subr.bf16.mxu1 %v6972_v48  ;;  %5068 = vmatpush1.bf16.msra.mxu0 %v6974_v3 }
 0x88d   :  { %5070 = vmatprep.subr.bf16.mxu0 %v6980_v17 }
 0x88f   :  { %5100 = vmatpush1.bf16.msra.mxu1 %v6977_v29 }
 0x890   :  { %5102 = vmatprep.subr.bf16.mxu1 %v6982_v60  ;;  %5072 = vmatpush1.bf16.msra.mxu0 %v6985_v42 }
 0x891   :  { %5074 = vmatprep.subr.bf16.mxu0 %v6991_v55 }
 0x893   :  { %5104 = vmatpush1.bf16.msra.mxu1 %v6989_v52 }
 0x894   :  { %5106 = vmatprep.subr.bf16.mxu1 %v6994_v15  ;;  %5076 = vmatpush1.bf16.msra.mxu0 %v6997_v31 }
 0x895   :  { %5078 = vmatprep.subr.bf16.mxu0 %v7006_v63 }
 0x897   :  { %5108 = vmatpush1.bf16.msra.mxu1 %v7001_v34 }
 0x898   :  { %5110 = vmatprep.subr.bf16.mxu1 %v7008_v40  ;;  %5080 = vmatpush1.bf16.msra.mxu0 %v7010_v51 }
 0x899   :  { %5114 = vmatprep.subr.bf16.mxu0 %v6922_v25 }
 0x89b   :  { %5112 = vmatpush1.bf16.msra.mxu1 %v7013_v10 }
 0x89c   :  { %5146 = vmatprep.subr.bf16.mxu1 %v6924_v27 }
 0x918   :  { %v2312_v16 = vpop.f32.mrb[18].mxu0  ;;  %v2383_v50 = vpop.f32.mrb[18].mxu1 }
 0x919   :  { %v5575_v45 = vadd.f32 %v2312_v16, %v6599_v20  ;;  %v2314_v13 = vpop.f32.mrb[19].mxu0  ;;  %v2385_v47 = vpop.f32.mrb[19].mxu1  ;;  %v5591_v8 = vadd.f32 %v2383_v50, %v6608_v35 }
 0x91a   :  { %v5576_v46 = vadd.f32 %v2314_v13, %v6601_v22  ;;  %v5592_v58 = vadd.f32 %v2385_v47, %v6605_v57 }
 0x91b   :  { %v4254_v33 = vmul.f32 -1.442695, %v5575_v45 }
 0x91c   :  { %v4255_v56 = vmul.f32 -1.442695, %v5576_v46  ;;  %v4256_v5 = vmul.f32 -1.442695, %v5592_v58 }
 0x91d   :  { %5817 = vpow2.f32 %v4254_v33 }
 0x91e   :  { %5819 = vpow2.f32 %v4255_v56 }
 0x91f   :  { %5821 = vpow2.f32 %v4256_v5 }
 0x920   :  { %5823 = vtanh.f32 %v5591_v8 }
 0x927   :  { %v5818_v18 = vpop.eup %5817 }
 0x928   :  { %v5820_v21 = vpop.eup %5819  ;;  %v2395_v28 = vadd.f32 1.0, %v5818_v18 }
 0x929   :  { %v2401_v44 = vadd.f32 1.0, %v5820_v21  ;;  %v5822_v20 = vpop.eup %5821 }
 0x92a   :  { %5825 = vrcp.f32 %v2395_v28  ;;  %v5824_v49 = vpop.eup %5823  ;;  %v2408_v14 = vadd.f32 1.0, %v5822_v20 }
 0x92b   :  { %5827 = vrcp.f32 %v2401_v44 }
 0x92c   :  { %5829 = vrcp.f32 %v2408_v14 }
 0x934   :  { %v5826_v22 = vpop.eup %5825 }
 0x935   :  { %v5828_v59 = vpop.eup %5827  ;;  %v2412_v4 = vmul.f32 %v5826_v22, %v5824_v49 }
 0x936   :  { %v2411_v19 = vmul.f32 %v5828_v59, %v6885_v30  ;;  %v5830_v35 = vpop.eup %5829 }
 0x938   :  { %v7025_v57 = vadd.f32 %v2412_v4, %v2411_v19 }
 0x93a   :  { %5831 = vtanh.f32 %v7025_v57 }
 0x944   :  { %v5832_v23 = vpop.eup %5831 }
 0x945   :  { %v2415_v54 = vmul.f32 %v5832_v23, %v5830_v35 }
 0x947   :  { %2596 = vmatmul.mubr.f32.gmra.mrb[34].mxu0 %v2415_v54  ;;  %2709 = vmatmul.mubr.f32.gmra.mrb[34].mxu1 %v2415_v54 }
 0x948   :  { %2879 = vmatprep.mubr.f32.mxu0 %v6231_v0  ;;  %2950 = vmatprep.mubr.f32.mxu1 %v6231_v0 }
 0x94b   :  { %2880 = vmatmul.mubr.f32.vlgmr.msra.gmra.mrb[20].mxu0 %v2415_v54  ;;  %2951 = vmatmul.mubr.f32.vlgmr.msra.gmra.mrb[20].mxu1 %v2415_v54 }
 0x94c   :  { %5116 = vmatpush1.bf16.msra.mxu0 %v6926_v32  ;;  %5148 = vmatpush1.bf16.msra.mxu1 %v6929_v38 }
 0x94d   :  { %5118 = vmatprep.subr.bf16.mxu0 %v6934_v43  ;;  %5150 = vmatprep.subr.bf16.mxu1 %v6936_v26 }
 0x94e   :  { %3054 = vmatprep.mubr.f32.mxu0 %v6231_v0  ;;  %3125 = vmatprep.mubr.f32.mxu1 %v6231_v0 }
 0x950   :  { %5120 = vmatpush1.bf16.msra.mxu0 %v6938_v39  ;;  %5152 = vmatpush1.bf16.msra.mxu1 %v6941_v36 }
 0x951   :  { %5122 = vmatprep.subr.bf16.mxu0 %v6946_v1  ;;  %5154 = vmatprep.subr.bf16.mxu1 %v6948_v61 }
 0x954   :  { %5124 = vmatpush1.bf16.msra.mxu0 %v6950_v2  ;;  %5156 = vmatpush1.bf16.msra.mxu1 %v6953_v11 }
 0x955   :  { %5126 = vmatprep.subr.bf16.mxu0 %v6958_v24  ;;  %5158 = vmatprep.subr.bf16.mxu1 %v6960_v37 }
 0x958   :  { %5128 = vmatpush1.bf16.msra.mxu0 %v6962_v41  ;;  %5160 = vmatpush1.bf16.msra.mxu1 %v6965_v53 }
 0x959   :  { %5130 = vmatprep.subr.bf16.mxu0 %v6969_v9  ;;  %5162 = vmatprep.subr.bf16.mxu1 %v6972_v48 }
 0x95c   :  { %5132 = vmatpush1.bf16.msra.mxu0 %v6974_v3  ;;  %5164 = vmatpush1.bf16.msra.mxu1 %v6977_v29 }
 0x95d   :  { %5134 = vmatprep.subr.bf16.mxu0 %v6980_v17  ;;  %5166 = vmatprep.subr.bf16.mxu1 %v6982_v60 }
 0x960   :  { %5136 = vmatpush1.bf16.msra.mxu0 %v6985_v42  ;;  %5168 = vmatpush1.bf16.msra.mxu1 %v6989_v52 }
 0x961   :  { %5138 = vmatprep.subr.bf16.mxu0 %v6991_v55  ;;  %5170 = vmatprep.subr.bf16.mxu1 %v6994_v15 }
 0x964   :  { %5140 = vmatpush1.bf16.msra.mxu0 %v6997_v31  ;;  %5172 = vmatpush1.bf16.msra.mxu1 %v7001_v34 }
 0x965   :  { %5142 = vmatprep.subr.bf16.mxu0 %v7006_v63  ;;  %5174 = vmatprep.subr.bf16.mxu1 %v7008_v40 }
 0x968   :  { %5144 = vmatpush1.bf16.msra.mxu0 %v7010_v51  ;;  %5176 = vmatpush1.bf16.msra.mxu1 %v7013_v10 }
 0x969   :  { %5178 = vmatprep.subr.bf16.mxu0 %v6922_v25  ;;  %5210 = vmatprep.subr.bf16.mxu1 %v6924_v27 }
 0xa1e   :  { %v2881_v30 = vpop.f32.mrb[20].mxu0  ;;  %v2952_v16 = vpop.f32.mrb[20].mxu1 }
 0xa1f   :  { %v5593_v50 = vadd.f32 %v2881_v30, %v6591_v62  ;;  %v2883_v45 = vpop.f32.mrb[21].mxu0  ;;  %v2954_v13 = vpop.f32.mrb[21].mxu1  ;;  %v5609_v5 = vadd.f32 %v2952_v16, %v6595_v7 }
 0xa20   :  { %v5594_v47 = vadd.f32 %v2883_v45, %v6593_v6  ;;  %v5610_v56 = vadd.f32 %v2954_v13, %v6597_v12 }
 0xa21   :  { %v4257_v46 = vmul.f32 -1.442695, %v5593_v50 }
 0xa22   :  { %v4258_v33 = vmul.f32 -1.442695, %v5594_v47  ;;  %v4259_v58 = vmul.f32 -1.442695, %v5610_v56 }
 0xa23   :  { %5833 = vpow2.f32 %v4257_v46 }
 0xa24   :  { %5835 = vpow2.f32 %v4258_v33 }
 0xa25   :  { %5837 = vpow2.f32 %v4259_v58 }
 0xa26   :  { %5839 = vtanh.f32 %v5609_v5 }
 0xa2d   :  { %v5834_v8 = vpop.eup %5833 }
 0xa2e   :  { %v5836_v18 = vpop.eup %5835  ;;  %v2964_v21 = vadd.f32 1.0, %v5834_v8 }
 0xa2f   :  { %v2970_v28 = vadd.f32 1.0, %v5836_v18  ;;  %v5838_v44 = vpop.eup %5837 }
 0xa30   :  { %5841 = vrcp.f32 %v2964_v21  ;;  %v5840_v20 = vpop.eup %5839  ;;  %v2977_v4 = vadd.f32 1.0, %v5838_v44 }
 0xa31   :  { %5843 = vrcp.f32 %v2970_v28 }
 0xa32   :  { %5845 = vrcp.f32 %v2977_v4 }
 0xa3a   :  { %v5842_v49 = vpop.eup %5841 }
 0xa3b   :  { %v5844_v22 = vpop.eup %5843  ;;  %v2981_v59 = vmul.f32 %v5842_v49, %v5840_v20 }
 0xa3c   :  { %v2980_v14 = vmul.f32 %v5844_v22, %v7025_v57  ;;  %v5846_v35 = vpop.eup %5845 }
 0xa3e   :  { %v7069_v19 = vadd.f32 %v2981_v59, %v2980_v14 }
 0xa40   :  { %5847 = vtanh.f32 %v7069_v19 }
 0xa4a   :  { %v5848_v23 = vpop.eup %5847 }
 0xa4b   :  { %v2984_v54 = vmul.f32 %v5848_v23, %v5846_v35 }
 0xa4d   :  { %2985 = vst [vmem:[#allocation21] sm:$0xff] %v2984_v54  ;;  %3055 = vmatmul.mubr.f32.vlgmr.msra.gmra.mrb[22].mxu0 %v2984_v54  ;;  %3126 = vmatmul.mubr.f32.vlgmr.msra.gmra.mrb[22].mxu1 %v2984_v54 }
 0xa4e   :  { %5180 = vmatpush1.bf16.msra.mxu0 %v6926_v32  ;;  %5212 = vmatpush1.bf16.msra.mxu1 %v6929_v38 }
 0xa4f   :  { %5182 = vmatprep.subr.bf16.mxu0 %v6934_v43  ;;  %5214 = vmatprep.subr.bf16.mxu1 %v6936_v26 }
 0xa50   :  { %3229 = vmatprep.mubr.f32.mxu0 %v6231_v0  ;;  %3300 = vmatprep.mubr.f32.mxu1 %v6231_v0 }
 0xa52   :  { %5184 = vmatpush1.bf16.msra.mxu0 %v6938_v39  ;;  %5216 = vmatpush1.bf16.msra.mxu1 %v6941_v36 }
 0xa53   :  { %5186 = vmatprep.subr.bf16.mxu0 %v6946_v1  ;;  %5218 = vmatprep.subr.bf16.mxu1 %v6948_v61 }
 0xa56   :  { %5188 = vmatpush1.bf16.msra.mxu0 %v6950_v2  ;;  %5220 = vmatpush1.bf16.msra.mxu1 %v6953_v11 }
 0xa57   :  { %5190 = vmatprep.subr.bf16.mxu0 %v6958_v24  ;;  %5222 = vmatprep.subr.bf16.mxu1 %v6960_v37 }
 0xa5a   :  { %5192 = vmatpush1.bf16.msra.mxu0 %v6962_v41  ;;  %5224 = vmatpush1.bf16.msra.mxu1 %v6965_v53 }
 0xa5b   :  { %5194 = vmatprep.subr.bf16.mxu0 %v6969_v9  ;;  %5226 = vmatprep.subr.bf16.mxu1 %v6972_v48 }
 0xa5e   :  { %5196 = vmatpush1.bf16.msra.mxu0 %v6974_v3  ;;  %5228 = vmatpush1.bf16.msra.mxu1 %v6977_v29 }
 0xa5f   :  { %5198 = vmatprep.subr.bf16.mxu0 %v6980_v17  ;;  %5230 = vmatprep.subr.bf16.mxu1 %v6982_v60 }
 0xa62   :  { %5200 = vmatpush1.bf16.msra.mxu0 %v6985_v42  ;;  %5232 = vmatpush1.bf16.msra.mxu1 %v6989_v52 }
 0xa63   :  { %5202 = vmatprep.subr.bf16.mxu0 %v6991_v55  ;;  %5234 = vmatprep.subr.bf16.mxu1 %v6994_v15 }
 0xa66   :  { %5204 = vmatpush1.bf16.msra.mxu0 %v6997_v31  ;;  %5236 = vmatpush1.bf16.msra.mxu1 %v7001_v34 }
 0xa67   :  { %5206 = vmatprep.subr.bf16.mxu0 %v7006_v63  ;;  %5238 = vmatprep.subr.bf16.mxu1 %v7008_v40 }
 0xa6a   :  { %5208 = vmatpush1.bf16.msra.mxu0 %v7010_v51  ;;  %5240 = vmatpush1.bf16.msra.mxu1 %v7013_v10 }
 0xa6b   :  { %5242 = vmatprep.subr.bf16.mxu0 %v6922_v25  ;;  %5274 = vmatprep.subr.bf16.mxu1 %v6924_v27 }
 0xb20   :  { %v3056_v57 = vpop.f32.mrb[22].mxu0  ;;  %v3127_v30 = vpop.f32.mrb[22].mxu1 }
 0xb21   :  { %v5595_v16 = vadd.f32 %v3056_v57, %v6591_v62  ;;  %v3058_v50 = vpop.f32.mrb[23].mxu0  ;;  %v3129_v45 = vpop.f32.mrb[23].mxu1  ;;  %v5611_v58 = vadd.f32 %v3127_v30, %v6595_v7 }
 0xb22   :  { %v5596_v13 = vadd.f32 %v3058_v50, %v6593_v6  ;;  %v5612_v33 = vadd.f32 %v3129_v45, %v6597_v12 }
 0xb23   :  { %v4260_v47 = vmul.f32 -1.442695, %v5595_v16 }
 0xb24   :  { %v4261_v46 = vmul.f32 -1.442695, %v5596_v13  ;;  %v4262_v56 = vmul.f32 -1.442695, %v5612_v33 }
 0xb25   :  { %5849 = vpow2.f32 %v4260_v47 }
 0xb26   :  { %5851 = vpow2.f32 %v4261_v46 }
 0xb27   :  { %5853 = vpow2.f32 %v4262_v56 }
 0xb28   :  { %5855 = vtanh.f32 %v5611_v58 }
 0xb2f   :  { %v5850_v5 = vpop.eup %5849 }
 0xb30   :  { %v5852_v8 = vpop.eup %5851  ;;  %v3139_v18 = vadd.f32 1.0, %v5850_v5 }
 0xb31   :  { %v3145_v21 = vadd.f32 1.0, %v5852_v8  ;;  %v5854_v28 = vpop.eup %5853 }
 0xb32   :  { %5857 = vrcp.f32 %v3139_v18  ;;  %v5856_v44 = vpop.eup %5855  ;;  %v3152_v59 = vadd.f32 1.0, %v5854_v28 }
 0xb33   :  { %5859 = vrcp.f32 %v3145_v21 }
 0xb34   :  { %5861 = vrcp.f32 %v3152_v59 }
 0xb3c   :  { %v5858_v20 = vpop.eup %5857 }
 0xb3d   :  { %v5860_v49 = vpop.eup %5859  ;;  %v3156_v22 = vmul.f32 %v5858_v20, %v5856_v44 }
 0xb3e   :  { %v3155_v4 = vmul.f32 %v5860_v49, %v7069_v19  ;;  %v5862_v35 = vpop.eup %5861 }
 0xb40   :  { %v7111_v14 = vadd.f32 %v3156_v22, %v3155_v4 }
 0xb42   :  { %5863 = vtanh.f32 %v7111_v14 }
 0xb4c   :  { %v5864_v23 = vpop.eup %5863 }
 0xb4d   :  { %v3159_v54 = vmul.f32 %v5864_v23, %v5862_v35 }
 0xb4f   :  { %3160 = vst [vmem:[#allocation21 + $0x8] sm:$0xff] %v3159_v54  ;;  %3230 = vmatmul.mubr.f32.vlgmr.msra.gmra.mrb[24].mxu0 %v3159_v54  ;;  %3301 = vmatmul.mubr.f32.vlgmr.msra.gmra.mrb[24].mxu1 %v3159_v54 }
 0xb50   :  { %5244 = vmatpush1.bf16.msra.mxu0 %v6926_v32  ;;  %5276 = vmatpush1.bf16.msra.mxu1 %v6929_v38 }
 0xb51   :  { %5246 = vmatprep.subr.bf16.mxu0 %v6934_v43  ;;  %5278 = vmatprep.subr.bf16.mxu1 %v6936_v26 }
 0xb52   :  { %3404 = vmatprep.mubr.f32.mxu0 %v6231_v0  ;;  %3475 = vmatprep.mubr.f32.mxu1 %v6231_v0 }
 0xb54   :  { %5248 = vmatpush1.bf16.msra.mxu0 %v6938_v39  ;;  %5280 = vmatpush1.bf16.msra.mxu1 %v6941_v36 }
 0xb55   :  { %5250 = vmatprep.subr.bf16.mxu0 %v6946_v1  ;;  %5282 = vmatprep.subr.bf16.mxu1 %v6948_v61 }
 0xb58   :  { %5252 = vmatpush1.bf16.msra.mxu0 %v6950_v2  ;;  %5284 = vmatpush1.bf16.msra.mxu1 %v6953_v11 }
 0xb59   :  { %5254 = vmatprep.subr.bf16.mxu0 %v6958_v24  ;;  %5286 = vmatprep.subr.bf16.mxu1 %v6960_v37 }
 0xb5c   :  { %5256 = vmatpush1.bf16.msra.mxu0 %v6962_v41  ;;  %5288 = vmatpush1.bf16.msra.mxu1 %v6965_v53 }
 0xb5d   :  { %5258 = vmatprep.subr.bf16.mxu0 %v6969_v9  ;;  %5290 = vmatprep.subr.bf16.mxu1 %v6972_v48 }
 0xb60   :  { %5260 = vmatpush1.bf16.msra.mxu0 %v6974_v3  ;;  %5292 = vmatpush1.bf16.msra.mxu1 %v6977_v29 }
 0xb61   :  { %5262 = vmatprep.subr.bf16.mxu0 %v6980_v17  ;;  %5294 = vmatprep.subr.bf16.mxu1 %v6982_v60 }
 0xb64   :  { %5264 = vmatpush1.bf16.msra.mxu0 %v6985_v42  ;;  %5296 = vmatpush1.bf16.msra.mxu1 %v6989_v52 }
 0xb65   :  { %5266 = vmatprep.subr.bf16.mxu0 %v6991_v55  ;;  %5298 = vmatprep.subr.bf16.mxu1 %v6994_v15 }
 0xb68   :  { %5268 = vmatpush1.bf16.msra.mxu0 %v6997_v31  ;;  %5300 = vmatpush1.bf16.msra.mxu1 %v7001_v34 }
 0xb69   :  { %5270 = vmatprep.subr.bf16.mxu0 %v7006_v63  ;;  %5302 = vmatprep.subr.bf16.mxu1 %v7008_v40 }
 0xb6c   :  { %5272 = vmatpush1.bf16.msra.mxu0 %v7010_v51  ;;  %5304 = vmatpush1.bf16.msra.mxu1 %v7013_v10 }
 0xb6d   :  { %5306 = vmatprep.subr.bf16.mxu0 %v6922_v25  ;;  %5338 = vmatprep.subr.bf16.mxu1 %v6924_v27 }
 0xc22   :  { %v3231_v19 = vpop.f32.mrb[24].mxu0  ;;  %v3302_v57 = vpop.f32.mrb[24].mxu1 }
 0xc23   :  { %v5597_v30 = vadd.f32 %v3231_v19, %v6591_v62  ;;  %v3233_v16 = vpop.f32.mrb[25].mxu0  ;;  %v3304_v50 = vpop.f32.mrb[25].mxu1  ;;  %v5613_v56 = vadd.f32 %v3302_v57, %v6595_v7 }
 0xc24   :  { %v5598_v45 = vadd.f32 %v3233_v16, %v6593_v6  ;;  %v5614_v46 = vadd.f32 %v3304_v50, %v6597_v12 }
 0xc25   :  { %v4263_v13 = vmul.f32 -1.442695, %v5597_v30 }
 0xc26   :  { %v4264_v47 = vmul.f32 -1.442695, %v5598_v45  ;;  %v4265_v33 = vmul.f32 -1.442695, %v5614_v46 }
 0xc27   :  { %5865 = vpow2.f32 %v4263_v13 }
 0xc28   :  { %5867 = vpow2.f32 %v4264_v47 }
 0xc29   :  { %5869 = vpow2.f32 %v4265_v33 }
 0xc2a   :  { %5871 = vtanh.f32 %v5613_v56 }
 0xc31   :  { %v5866_v58 = vpop.eup %5865 }
 0xc32   :  { %v5868_v5 = vpop.eup %5867  ;;  %v3314_v8 = vadd.f32 1.0, %v5866_v58 }
 0xc33   :  { %v3320_v18 = vadd.f32 1.0, %v5868_v5  ;;  %v5870_v21 = vpop.eup %5869 }
 0xc34   :  { %5873 = vrcp.f32 %v3314_v8  ;;  %v5872_v28 = vpop.eup %5871  ;;  %v3327_v22 = vadd.f32 1.0, %v5870_v21 }
 0xc35   :  { %5875 = vrcp.f32 %v3320_v18 }
 0xc36   :  { %5877 = vrcp.f32 %v3327_v22 }
 0xc3e   :  { %v5874_v44 = vpop.eup %5873 }
 0xc3f   :  { %v5876_v20 = vpop.eup %5875  ;;  %v3331_v49 = vmul.f32 %v5874_v44, %v5872_v28 }
 0xc40   :  { %v3330_v59 = vmul.f32 %v5876_v20, %v7111_v14  ;;  %v5878_v35 = vpop.eup %5877 }
 0xc42   :  { %v7153_v4 = vadd.f32 %v3331_v49, %v3330_v59 }
 0xc44   :  { %5879 = vtanh.f32 %v7153_v4 }
 0xc4e   :  { %v5880_v23 = vpop.eup %5879 }
 0xc4f   :  { %v3334_v54 = vmul.f32 %v5880_v23, %v5878_v35 }
 0xc51   :  { %3335 = vst [vmem:[#allocation21 + $0x10] sm:$0xff] %v3334_v54  ;;  %3405 = vmatmul.mubr.f32.vlgmr.msra.gmra.mrb[26].mxu0 %v3334_v54  ;;  %3476 = vmatmul.mubr.f32.vlgmr.msra.gmra.mrb[26].mxu1 %v3334_v54 }
 0xc52   :  { %5308 = vmatpush1.bf16.msra.mxu0 %v6926_v32  ;;  %5340 = vmatpush1.bf16.msra.mxu1 %v6929_v38 }
 0xc53   :  { %5310 = vmatprep.subr.bf16.mxu0 %v6934_v43  ;;  %5342 = vmatprep.subr.bf16.mxu1 %v6936_v26 }
 0xc54   :  { %3579 = vmatprep.mubr.f32.mxu0 %v6231_v0  ;;  %3650 = vmatprep.mubr.f32.mxu1 %v6231_v0 }
 0xc56   :  { %5312 = vmatpush1.bf16.msra.mxu0 %v6938_v39  ;;  %5344 = vmatpush1.bf16.msra.mxu1 %v6941_v36 }
 0xc57   :  { %5314 = vmatprep.subr.bf16.mxu0 %v6946_v1  ;;  %5346 = vmatprep.subr.bf16.mxu1 %v6948_v61 }
 0xc5a   :  { %5316 = vmatpush1.bf16.msra.mxu0 %v6950_v2  ;;  %5348 = vmatpush1.bf16.msra.mxu1 %v6953_v11 }
 0xc5b   :  { %5318 = vmatprep.subr.bf16.mxu0 %v6958_v24  ;;  %5350 = vmatprep.subr.bf16.mxu1 %v6960_v37 }
 0xc5e   :  { %5320 = vmatpush1.bf16.msra.mxu0 %v6962_v41  ;;  %5352 = vmatpush1.bf16.msra.mxu1 %v6965_v53 }
 0xc5f   :  { %5322 = vmatprep.subr.bf16.mxu0 %v6969_v9  ;;  %5354 = vmatprep.subr.bf16.mxu1 %v6972_v48 }
 0xc62   :  { %5324 = vmatpush1.bf16.msra.mxu0 %v6974_v3  ;;  %5356 = vmatpush1.bf16.msra.mxu1 %v6977_v29 }
 0xc63   :  { %5326 = vmatprep.subr.bf16.mxu0 %v6980_v17  ;;  %5358 = vmatprep.subr.bf16.mxu1 %v6982_v60 }
 0xc66   :  { %5328 = vmatpush1.bf16.msra.mxu0 %v6985_v42  ;;  %5360 = vmatpush1.bf16.msra.mxu1 %v6989_v52 }
 0xc67   :  { %5330 = vmatprep.subr.bf16.mxu0 %v6991_v55  ;;  %5362 = vmatprep.subr.bf16.mxu1 %v6994_v15 }
 0xc6a   :  { %5332 = vmatpush1.bf16.msra.mxu0 %v6997_v31  ;;  %5364 = vmatpush1.bf16.msra.mxu1 %v7001_v34 }
 0xc6b   :  { %5334 = vmatprep.subr.bf16.mxu0 %v7006_v63  ;;  %5366 = vmatprep.subr.bf16.mxu1 %v7008_v40 }
 0xc6e   :  { %5336 = vmatpush1.bf16.msra.mxu0 %v7010_v51  ;;  %5368 = vmatpush1.bf16.msra.mxu1 %v7013_v10 }
 0xc6f   :  { %5370 = vmatprep.subr.bf16.mxu0 %v6922_v25  ;;  %5402 = vmatprep.subr.bf16.mxu1 %v6924_v27 }
 0xd24   :  { %v3406_v14 = vpop.f32.mrb[26].mxu0  ;;  %v3477_v19 = vpop.f32.mrb[26].mxu1 }
 0xd25   :  { %v5599_v57 = vadd.f32 %v3406_v14, %v6591_v62  ;;  %v3408_v30 = vpop.f32.mrb[27].mxu0  ;;  %v3479_v16 = vpop.f32.mrb[27].mxu1  ;;  %v5615_v33 = vadd.f32 %v3477_v19, %v6595_v7 }
 0xd26   :  { %v5600_v50 = vadd.f32 %v3408_v30, %v6593_v6  ;;  %v5616_v47 = vadd.f32 %v3479_v16, %v6597_v12 }
 0xd27   :  { %v4266_v45 = vmul.f32 -1.442695, %v5599_v57 }
 0xd28   :  { %v4267_v13 = vmul.f32 -1.442695, %v5600_v50  ;;  %v4268_v46 = vmul.f32 -1.442695, %v5616_v47 }
 0xd29   :  { %5881 = vpow2.f32 %v4266_v45 }
 0xd2a   :  { %5883 = vpow2.f32 %v4267_v13 }
 0xd2b   :  { %5885 = vpow2.f32 %v4268_v46 }
 0xd2c   :  { %5887 = vtanh.f32 %v5615_v33 }
 0xd33   :  { %v5882_v56 = vpop.eup %5881 }
 0xd34   :  { %v5884_v58 = vpop.eup %5883  ;;  %v3489_v5 = vadd.f32 1.0, %v5882_v56 }
 0xd35   :  { %v3495_v8 = vadd.f32 1.0, %v5884_v58  ;;  %v5886_v18 = vpop.eup %5885 }
 0xd36   :  { %5889 = vrcp.f32 %v3489_v5  ;;  %v5888_v21 = vpop.eup %5887  ;;  %v3502_v49 = vadd.f32 1.0, %v5886_v18 }
 0xd37   :  { %5891 = vrcp.f32 %v3495_v8 }
 0xd38   :  { %5893 = vrcp.f32 %v3502_v49 }
 0xd40   :  { %v5890_v28 = vpop.eup %5889 }
 0xd41   :  { %v5892_v44 = vpop.eup %5891  ;;  %v3506_v20 = vmul.f32 %v5890_v28, %v5888_v21 }
 0xd42   :  { %v3505_v22 = vmul.f32 %v5892_v44, %v7153_v4  ;;  %v5894_v35 = vpop.eup %5893 }
 0xd44   :  { %v7195_v59 = vadd.f32 %v3506_v20, %v3505_v22 }
 0xd46   :  { %5895 = vtanh.f32 %v7195_v59 }
 0xd50   :  { %v5896_v23 = vpop.eup %5895 }
 0xd51   :  { %v3509_v54 = vmul.f32 %v5896_v23, %v5894_v35 }
 0xd53   :  { %3510 = vst [vmem:[#allocation21 + $0x18] sm:$0xff] %v3509_v54  ;;  %3580 = vmatmul.mubr.f32.vlgmr.msra.gmra.mrb[28].mxu0 %v3509_v54  ;;  %3651 = vmatmul.mubr.f32.vlgmr.msra.gmra.mrb[28].mxu1 %v3509_v54 }
 0xd54   :  { %5372 = vmatpush1.bf16.msra.mxu0 %v6926_v32  ;;  %5404 = vmatpush1.bf16.msra.mxu1 %v6929_v38 }
 0xd55   :  { %5374 = vmatprep.subr.bf16.mxu0 %v6934_v43  ;;  %5406 = vmatprep.subr.bf16.mxu1 %v6936_v26 }
 0xd56   :  { %3754 = vmatprep.mubr.f32.mxu0 %v6231_v0  ;;  %3825 = vmatprep.mubr.f32.mxu1 %v6231_v0 }
 0xd58   :  { %5376 = vmatpush1.bf16.msra.mxu0 %v6938_v39  ;;  %5408 = vmatpush1.bf16.msra.mxu1 %v6941_v36 }
 0xd59   :  { %5378 = vmatprep.subr.bf16.mxu0 %v6946_v1  ;;  %5410 = vmatprep.subr.bf16.mxu1 %v6948_v61 }
 0xd5c   :  { %5380 = vmatpush1.bf16.msra.mxu0 %v6950_v2  ;;  %5412 = vmatpush1.bf16.msra.mxu1 %v6953_v11 }
 0xd5d   :  { %5382 = vmatprep.subr.bf16.mxu0 %v6958_v24  ;;  %5414 = vmatprep.subr.bf16.mxu1 %v6960_v37 }
 0xd60   :  { %5384 = vmatpush1.bf16.msra.mxu0 %v6962_v41  ;;  %5416 = vmatpush1.bf16.msra.mxu1 %v6965_v53 }
 0xd61   :  { %5386 = vmatprep.subr.bf16.mxu0 %v6969_v9  ;;  %5418 = vmatprep.subr.bf16.mxu1 %v6972_v48 }
 0xd64   :  { %5388 = vmatpush1.bf16.msra.mxu0 %v6974_v3  ;;  %5420 = vmatpush1.bf16.msra.mxu1 %v6977_v29 }
 0xd65   :  { %5390 = vmatprep.subr.bf16.mxu0 %v6980_v17  ;;  %5422 = vmatprep.subr.bf16.mxu1 %v6982_v60 }
 0xd68   :  { %5392 = vmatpush1.bf16.msra.mxu0 %v6985_v42  ;;  %5424 = vmatpush1.bf16.msra.mxu1 %v6989_v52 }
 0xd69   :  { %5394 = vmatprep.subr.bf16.mxu0 %v6991_v55  ;;  %5426 = vmatprep.subr.bf16.mxu1 %v6994_v15 }
 0xd6c   :  { %5396 = vmatpush1.bf16.msra.mxu0 %v6997_v31  ;;  %5428 = vmatpush1.bf16.msra.mxu1 %v7001_v34 }
 0xd6d   :  { %5398 = vmatprep.subr.bf16.mxu0 %v7006_v63  ;;  %5430 = vmatprep.subr.bf16.mxu1 %v7008_v40 }
 0xd70   :  { %5400 = vmatpush1.bf16.msra.mxu0 %v7010_v51  ;;  %5432 = vmatpush1.bf16.msra.mxu1 %v7013_v10 }
 0xd71   :  { %5434 = vmatprep.subr.bf16.mxu0 %v6922_v25  ;;  %5466 = vmatprep.subr.bf16.mxu1 %v6924_v27 }
 0xe26   :  { %v3581_v4 = vpop.f32.mrb[28].mxu0  ;;  %v3652_v14 = vpop.f32.mrb[28].mxu1 }
 0xe27   :  { %v5601_v19 = vadd.f32 %v3581_v4, %v6591_v62  ;;  %v3583_v57 = vpop.f32.mrb[29].mxu0  ;;  %v3654_v30 = vpop.f32.mrb[29].mxu1  ;;  %v5617_v46 = vadd.f32 %v3652_v14, %v6595_v7 }
 0xe28   :  { %v5602_v16 = vadd.f32 %v3583_v57, %v6593_v6  ;;  %v5618_v13 = vadd.f32 %v3654_v30, %v6597_v12 }
 0xe29   :  { %v4269_v50 = vmul.f32 -1.442695, %v5601_v19 }
 0xe2a   :  { %v4270_v45 = vmul.f32 -1.442695, %v5602_v16  ;;  %v4271_v47 = vmul.f32 -1.442695, %v5618_v13 }
 0xe2b   :  { %5897 = vpow2.f32 %v4269_v50 }
 0xe2c   :  { %5899 = vpow2.f32 %v4270_v45 }
 0xe2d   :  { %5901 = vpow2.f32 %v4271_v47 }
 0xe2e   :  { %5903 = vtanh.f32 %v5617_v46 }
 0xe35   :  { %v5898_v33 = vpop.eup %5897 }
 0xe36   :  { %v5900_v56 = vpop.eup %5899  ;;  %v3664_v58 = vadd.f32 1.0, %v5898_v33 }
 0xe37   :  { %v3670_v5 = vadd.f32 1.0, %v5900_v56  ;;  %v5902_v8 = vpop.eup %5901 }
 0xe38   :  { %5905 = vrcp.f32 %v3664_v58  ;;  %v5904_v18 = vpop.eup %5903  ;;  %v3677_v20 = vadd.f32 1.0, %v5902_v8 }
 0xe39   :  { %5907 = vrcp.f32 %v3670_v5 }
 0xe3a   :  { %5909 = vrcp.f32 %v3677_v20 }
 0xe42   :  { %v5906_v21 = vpop.eup %5905 }
 0xe43   :  { %v5908_v28 = vpop.eup %5907  ;;  %v3681_v44 = vmul.f32 %v5906_v21, %v5904_v18 }
 0xe44   :  { %v3680_v49 = vmul.f32 %v5908_v28, %v7195_v59  ;;  %v5910_v35 = vpop.eup %5909 }
 0xe46   :  { %v7237_v22 = vadd.f32 %v3681_v44, %v3680_v49 }
 0xe48   :  { %5911 = vtanh.f32 %v7237_v22 }
 0xe52   :  { %v5912_v23 = vpop.eup %5911 }
 0xe53   :  { %v3684_v54 = vmul.f32 %v5912_v23, %v5910_v35 }
 0xe55   :  { %3685 = vst [vmem:[#allocation21 + $0x20] sm:$0xff] %v3684_v54  ;;  %3755 = vmatmul.mubr.f32.vlgmr.msra.gmra.mrb[30].mxu0 %v3684_v54  ;;  %3826 = vmatmul.mubr.f32.vlgmr.msra.gmra.mrb[30].mxu1 %v3684_v54 }
 0xe56   :  { %5436 = vmatpush1.bf16.msra.mxu0 %v6926_v32  ;;  %5468 = vmatpush1.bf16.msra.mxu1 %v6929_v38 }
 0xe57   :  { %5438 = vmatprep.subr.bf16.mxu0 %v6934_v43  ;;  %5470 = vmatprep.subr.bf16.mxu1 %v6936_v26 }
 0xe58   :  { %3929 = vmatprep.mubr.f32.mxu0 %v6231_v0  ;;  %4000 = vmatprep.mubr.f32.mxu1 %v6231_v0 }
 0xe5a   :  { %5440 = vmatpush1.bf16.msra.mxu0 %v6938_v39  ;;  %5472 = vmatpush1.bf16.msra.mxu1 %v6941_v36 }
 0xe5b   :  { %5442 = vmatprep.subr.bf16.mxu0 %v6946_v1  ;;  %5474 = vmatprep.subr.bf16.mxu1 %v6948_v61 }
 0xe5e   :  { %5444 = vmatpush1.bf16.msra.mxu0 %v6950_v2  ;;  %5476 = vmatpush1.bf16.msra.mxu1 %v6953_v11 }
 0xe5f   :  { %5446 = vmatprep.subr.bf16.mxu0 %v6958_v24  ;;  %5478 = vmatprep.subr.bf16.mxu1 %v6960_v37 }
 0xe62   :  { %5448 = vmatpush1.bf16.msra.mxu0 %v6962_v41  ;;  %5480 = vmatpush1.bf16.msra.mxu1 %v6965_v53 }
 0xe63   :  { %5450 = vmatprep.subr.bf16.mxu0 %v6969_v9  ;;  %5482 = vmatprep.subr.bf16.mxu1 %v6972_v48 }
 0xe66   :  { %5452 = vmatpush1.bf16.msra.mxu0 %v6974_v3  ;;  %5484 = vmatpush1.bf16.msra.mxu1 %v6977_v29 }
 0xe67   :  { %5454 = vmatprep.subr.bf16.mxu0 %v6980_v17  ;;  %5486 = vmatprep.subr.bf16.mxu1 %v6982_v60 }
 0xe6a   :  { %5456 = vmatpush1.bf16.msra.mxu0 %v6985_v42  ;;  %5488 = vmatpush1.bf16.msra.mxu1 %v6989_v52 }
 0xe6b   :  { %5458 = vmatprep.subr.bf16.mxu0 %v6991_v55  ;;  %5490 = vmatprep.subr.bf16.mxu1 %v6994_v15 }
 0xe6e   :  { %5460 = vmatpush1.bf16.msra.mxu0 %v6997_v31  ;;  %5492 = vmatpush1.bf16.msra.mxu1 %v7001_v34 }
 0xe6f   :  { %5462 = vmatprep.subr.bf16.mxu0 %v7006_v63  ;;  %5494 = vmatprep.subr.bf16.mxu1 %v7008_v40 }
 0xe72   :  { %5464 = vmatpush1.bf16.msra.mxu0 %v7010_v51  ;;  %5496 = vmatpush1.bf16.msra.mxu1 %v7013_v10 }
 0xe73   :  { %5498 = vmatprep.subr.bf16.mxu0 %v6922_v25  ;;  %5530 = vmatprep.subr.bf16.mxu1 %v6924_v27 }
 0xf28   :  { %v3756_v59 = vpop.f32.mrb[30].mxu0  ;;  %v3827_v4 = vpop.f32.mrb[30].mxu1 }
 0xf29   :  { %v5603_v14 = vadd.f32 %v3756_v59, %v6591_v62  ;;  %v3758_v19 = vpop.f32.mrb[31].mxu0  ;;  %v3829_v57 = vpop.f32.mrb[31].mxu1  ;;  %v5619_v47 = vadd.f32 %v3827_v4, %v6595_v7 }
 0xf2a   :  { %v5604_v30 = vadd.f32 %v3758_v19, %v6593_v6  ;;  %v5620_v45 = vadd.f32 %v3829_v57, %v6597_v12 }
 0xf2b   :  { %v4272_v16 = vmul.f32 -1.442695, %v5603_v14 }
 0xf2c   :  { %v4273_v50 = vmul.f32 -1.442695, %v5604_v30  ;;  %v4274_v13 = vmul.f32 -1.442695, %v5620_v45 }
 0xf2d   :  { %5913 = vpow2.f32 %v4272_v16 }
 0xf2e   :  { %5915 = vpow2.f32 %v4273_v50 }
 0xf2f   :  { %5917 = vpow2.f32 %v4274_v13 }
 0xf30   :  { %5919 = vtanh.f32 %v5619_v47 }
 0xf37   :  { %v5914_v25 = vpop.eup %5913 }
 0xf38   :  { %v5916_v46 = vpop.eup %5915  ;;  %v3839_v27 = vadd.f32 1.0, %v5914_v25 }
 0xf39   :  { %v3845_v33 = vadd.f32 1.0, %v5916_v46  ;;  %v5918_v56 = vpop.eup %5917 }
 0xf3a   :  { %5921 = vrcp.f32 %v3839_v27  ;;  %v5920_v58 = vpop.eup %5919  ;;  %v3852_v21 = vadd.f32 1.0, %v5918_v56 }
 0xf3b   :  { %5923 = vrcp.f32 %v3845_v33 }
 0xf3c   :  { %5925 = vrcp.f32 %v3852_v21 }
 0xf44   :  { %v5922_v5 = vpop.eup %5921 }
 0xf45   :  { %v5924_v8 = vpop.eup %5923  ;;  %v3856_v18 = vmul.f32 %v5922_v5, %v5920_v58 }
 0xf46   :  { %v3855_v28 = vmul.f32 %v5924_v8, %v7237_v22  ;;  %v5926_v20 = vpop.eup %5925 }
 0xf48   :  { %v7279_v44 = vadd.f32 %v3856_v18, %v3855_v28 }
 0xf4a   :  { %5927 = vtanh.f32 %v7279_v44 }
 0xf54   :  { %v5928_v49 = vpop.eup %5927 }
 0xf55   :  { %v3859_v35 = vmul.f32 %v5928_v49, %v5926_v20 }
 0xf57   :  { %3860 = vst [vmem:[#allocation21 + $0x28] sm:$0xff] %v3859_v35  ;;  %3930 = vmatmul.mubr.f32.vlgmr.msra.gmra.mrb[32].mxu0 %v3859_v35  ;;  %4001 = vmatmul.mubr.f32.vlgmr.msra.gmra.mrb[32].mxu1 %v3859_v35 }
 0xf58   :  { %5500 = vmatpush1.bf16.msra.mxu0 %v6926_v32  ;;  %5532 = vmatpush1.bf16.msra.mxu1 %v6929_v38 }
 0xf59   :  { %5502 = vmatprep.subr.bf16.mxu0 %v6934_v43  ;;  %5534 = vmatprep.subr.bf16.mxu1 %v6936_v26 }
 0xf5a   :  { %4104 = vmatprep.mubr.f32.mxu0 %v6231_v0  ;;  %4175 = vmatprep.mubr.f32.mxu1 %v6231_v0 }
 0xf5c   :  { %5504 = vmatpush1.bf16.msra.mxu0 %v6938_v39  ;;  %5536 = vmatpush1.bf16.msra.mxu1 %v6941_v36 }
 0xf5d   :  { %5506 = vmatprep.subr.bf16.mxu0 %v6946_v1  ;;  %5538 = vmatprep.subr.bf16.mxu1 %v6948_v61 }
 0xf60   :  { %5508 = vmatpush1.bf16.msra.mxu0 %v6950_v2  ;;  %5540 = vmatpush1.bf16.msra.mxu1 %v6953_v11 }
 0xf61   :  { %5510 = vmatprep.subr.bf16.mxu0 %v6958_v24  ;;  %5542 = vmatprep.subr.bf16.mxu1 %v6960_v37 }
 0xf64   :  { %5512 = vmatpush1.bf16.msra.mxu0 %v6962_v41  ;;  %5544 = vmatpush1.bf16.msra.mxu1 %v6965_v53 }
 0xf65   :  { %5514 = vmatprep.subr.bf16.mxu0 %v6969_v9  ;;  %5546 = vmatprep.subr.bf16.mxu1 %v6972_v48 }
 0xf68   :  { %5516 = vmatpush1.bf16.msra.mxu0 %v6974_v3  ;;  %5548 = vmatpush1.bf16.msra.mxu1 %v6977_v29 }
 0xf69   :  { %5518 = vmatprep.subr.bf16.mxu0 %v6980_v17  ;;  %5550 = vmatprep.subr.bf16.mxu1 %v6982_v60 }
 0xf6c   :  { %5520 = vmatpush1.bf16.msra.mxu0 %v6985_v42  ;;  %5552 = vmatpush1.bf16.msra.mxu1 %v6989_v52 }
 0xf6d   :  { %5522 = vmatprep.subr.bf16.mxu0 %v6991_v55  ;;  %5554 = vmatprep.subr.bf16.mxu1 %v6994_v15 }
 0xf70   :  { %5524 = vmatpush1.bf16.msra.mxu0 %v6997_v31  ;;  %5556 = vmatpush1.bf16.msra.mxu1 %v7001_v34 }
 0xf71   :  { %5526 = vmatprep.subr.bf16.mxu0 %v7006_v63  ;;  %5558 = vmatprep.subr.bf16.mxu1 %v7008_v40 }
 0xf74   :  { %5528 = vmatpush1.bf16.msra.mxu0 %v7010_v51  ;;  %5560 = vmatpush1.bf16.msra.mxu1 %v7013_v10 }
0x102a   :  { %v3931_v0 = vpop.f32.mrb[32].mxu0  ;;  %v4002_v32 = vpop.f32.mrb[32].mxu1 }
0x102b   :  { %v5605_v38 = vadd.f32 %v3931_v0, %v6591_v62  ;;  %v3933_v43 = vpop.f32.mrb[33].mxu0  ;;  %v4004_v26 = vpop.f32.mrb[33].mxu1  ;;  %v5621_v11 = vadd.f32 %v4002_v32, %v6595_v7 }
0x102c   :  { %v5606_v39 = vadd.f32 %v3933_v43, %v6593_v6  ;;  %v5622_v61 = vadd.f32 %v4004_v26, %v6597_v12 }
0x102d   :  { %v4275_v36 = vmul.f32 -1.442695, %v5605_v38 }
0x102e   :  { %v4276_v1 = vmul.f32 -1.442695, %v5606_v39  ;;  %v4277_v2 = vmul.f32 -1.442695, %v5622_v61 }
0x102f   :  { %5929 = vpow2.f32 %v4275_v36 }
0x1030   :  { %5931 = vpow2.f32 %v4276_v1 }
0x1031   :  { %5933 = vpow2.f32 %v4277_v2 }
0x1032   :  { %5935 = vtanh.f32 %v5621_v11 }
0x1039   :  { %v5930_v24 = vpop.eup %5929 }
0x103a   :  { %v5932_v37 = vpop.eup %5931  ;;  %v4014_v41 = vadd.f32 1.0, %v5930_v24 }
0x103b   :  { %v4020_v53 = vadd.f32 1.0, %v5932_v37  ;;  %v5934_v9 = vpop.eup %5933 }
0x103c   :  { %5937 = vrcp.f32 %v4014_v41  ;;  %v5936_v48 = vpop.eup %5935  ;;  %v4027_v60 = vadd.f32 1.0, %v5934_v9 }
0x103d   :  { %5939 = vrcp.f32 %v4020_v53 }
0x103e   :  { %5941 = vrcp.f32 %v4027_v60 }
0x1046   :  { %v5938_v3 = vpop.eup %5937 }
0x1047   :  { %v5940_v29 = vpop.eup %5939  ;;  %v4031_v17 = vmul.f32 %v5938_v3, %v5936_v48 }
0x1048   :  { %v4030_v42 = vmul.f32 %v5940_v29, %v7279_v44  ;;  %v5942_v55 = vpop.eup %5941 }
0x104a   :  { %v4032_v52 = vadd.f32 %v4031_v17, %v4030_v42 }
0x104c   :  { %5943 = vtanh.f32 %v4032_v52 }
0x1056   :  { %v5944_v15 = vpop.eup %5943 }
0x1057   :  { %v4034_v31 = vmul.f32 %v5944_v15, %v5942_v55 }
0x1059   :  { %4035 = vst [vmem:[#allocation21 + $0x30] sm:$0xff] %v4034_v31  ;;  %4105 = vmatmul.mubr.f32.vlgmr.msra.gmra.mrb[34].mxu0 %v4034_v31  ;;  %4176 = vmatmul.mubr.f32.vlgmr.msra.gmra.mrb[34].mxu1 %v4034_v31 }
0x112c   :  { %v4106_v34 = vpop.f32.mrb[34].mxu0  ;;  %v4177_v63 = vpop.f32.mrb[34].mxu1 }
0x112d   :  { %v5607_v40 = vadd.f32 %v4106_v34, %v6591_v62  ;;  %v4108_v51 = vpop.f32.mrb[35].mxu0  ;;  %v4179_v10 = vpop.f32.mrb[35].mxu1  ;;  %v5623_v14 = vadd.f32 %v4177_v63, %v6595_v7 }
0x112e   :  { %v5608_v22 = vadd.f32 %v4108_v51, %v6593_v6  ;;  %v5624_v59 = vadd.f32 %v4179_v10, %v6597_v12 }
0x112f   :  { %v4278_v23 = vmul.f32 -1.442695, %v5607_v40 }
0x1130   :  { %v4279_v54 = vmul.f32 -1.442695, %v5608_v22  ;;  %v4280_v4 = vmul.f32 -1.442695, %v5624_v59 }
0x1131   :  { %5945 = vpow2.f32 %v4278_v23 }
0x1132   :  { %5947 = vpow2.f32 %v4279_v54 }
0x1133   :  { %5949 = vpow2.f32 %v4280_v4 }
0x1134   :  { %5951 = vtanh.f32 %v5623_v14 }
0x113b   :  { %v5946_v19 = vpop.eup %5945 }
0x113c   :  { %v5948_v57 = vpop.eup %5947  ;;  %v4189_v30 = vadd.f32 1.0, %v5946_v19 }
0x113d   :  { %v4195_v16 = vadd.f32 1.0, %v5948_v57  ;;  %v5950_v62 = vpop.eup %5949 }
0x113e   :  { %5953 = vrcp.f32 %v4189_v30  ;;  %v5952_v50 = vpop.eup %5951  ;;  %v4202_v47 = vadd.f32 1.0, %v5950_v62 }
0x113f   :  { %5955 = vrcp.f32 %v4195_v16 }
0x1140   :  { %5957 = vrcp.f32 %v4202_v47 }
0x1148   :  { %v5954_v6 = vpop.eup %5953 }
0x1149   :  { %v5956_v45 = vpop.eup %5955  ;;  %v4206_v13 = vmul.f32 %v5954_v6, %v5952_v50 }
0x114a   :  { %v4205_v25 = vmul.f32 %v5956_v45, %v4032_v52  ;;  %v5958_v7 = vpop.eup %5957 }
0x114c   :  { %v4207_v46 = vadd.f32 %v4206_v13, %v4205_v25 }
0x114e   :  { %5959 = vtanh.f32 %v4207_v46 }
0x1158   :  { %v5960_v12 = vpop.eup %5959 }
0x1159   :  { %v4209_v27 = vmul.f32 %v5960_v12, %v5958_v7 }
0x115b   :  { %4210 = vst [vmem:[#allocation21 + $0x38] sm:$0xff] %v4209_v27 }
0x115c   :  { %6192 = shalt.err (!%p6189_p0)
}
0x115d   :  { %s6193_s3 = scalar_lea.hbm %s7348_s10, 1024 }
0x115e   :  { %p6194_p1 = scmp.ne.s32.totalorder %s7348_s10, %s6193_s3  ;;  %p6197_p2 = scmp.lt.u32.totalorder %s6193_s3, %s7348_s10 }
0x1160   :  { %p6199_p3 = pnand %p6197_p2, %p6194_p1 }
0x1162   :  { %6202 = shalt.err (!%p6199_p3)
}
0x1163   :  { %4222 = dma.vmem_to_hbm [thread:$0]  %s4217_s19, 1024, %s7348_s10, [#allocation6], %s6218_s23, %s6218_s23, %s6219_s24  }
0x1164   :  { %6215 = dma.done.wait [#allocation6], 1024  }
0x1165   :  { %6216 = vsyncadd [#allocation6], 4294966272 }
0x1166   :  { %4226 = vsyncpa [#allocation5], 1 }
0x1167   :  { %4227 = vsyncpa [#allocation8], 1 }
0x1168   :  { %4228 = vsyncpa [#allocation11], 1 }
0x1169   :  { %4229 = vsyncpa [#allocation14], 1 }
0x116a   :  { %4230 = vsyncpa [#allocation17], 1 }
0x116b   :  { %4231 = vsyncpa [#allocation20], 1 }
0x116c   :  { %4232 = vsyncpa [#allocation6], 1 }

</bundles_post_ra>
